<compile_context>
chip_gen: v7x
topology: tpu7x:2x2x1
jax: 0.10.0
libtpu: 0.0.40
codegen_flags: <defaults>
</compile_context>

<pallas_src>
import numpy as np
import jax
import jax.numpy as jnp
from jax import lax
from jax.experimental import pallas as pl
from jax.experimental.pallas import tpu as pltpu

_N_BRANCHES = 5
_KERNEL_SIZES = (3, 5, 7)   # temporal depthwise kernel sizes of branches 2, 3, 4
_DW_MAX_K = 7               # width of the unified temporal filter
_PAD = _DW_MAX_K // 2       # 3


# --------------------------------------------------------------------------- #
# Pallas kernel: one Timeception layer on a tile of `tm` spatial positions.
# --------------------------------------------------------------------------- #
def _tc_layer_kernel(x_ref, w_ref, b_ref, f_ref, ps_ref, pb_ref, o_ref, ybuf):
    """
    x_ref  : (T,  tm, C_in)    f32  input activations (previous layer's raw order)
    w_ref  : (C_in, C_out)     bf16 block-diagonal pointwise weight (prev. shuffle folded in)
    b_ref  : (1, C_out)        f32  pointwise bias (kernel channel order)
    f_ref  : (7, 4*nb)         f32  unified temporal taps, branches 1-4 (BN scale folded)
    ps_ref : (1, nb)           f32  BN scale of the maxpool branch (branch 5)
    pb_ref : (1, C_out)        f32  additive term after branch assembly (dw bias / BN shift)
    o_ref  : (T//2, tm, C_out) f32  output tile
    ybuf   : (T+6, tm, C_out)  f32  VMEM scratch: zero temporal halo + pointwise output
    """
    T, tm, C_in = x_ref.shape
    Th, _, C_out = o_ref.shape
    nb = ps_ref.shape[1]
    ndw = 4 * nb                      # channels covered by the tap slab (branches 1-4)

    # ---- all G*5 pointwise 1x1x1 convs as ONE dense MXU matmul (bf16 in, f32 acc) ----
    xb = x_ref[...].reshape(T * tm, C_in).astype(jnp.bfloat16)
    y = jnp.dot(xb, w_ref[...], preferred_element_type=jnp.float32)
    y = y.reshape(T, tm, C_out) + b_ref[...].reshape(1, 1, C_out)

    # ---- stage into the temporally padded scratch ('same' zero padding, no concat) ----
    ybuf[0:_PAD] = jnp.zeros((_PAD, tm, C_out), jnp.float32)
    ybuf[_PAD + T:] = jnp.zeros((_PAD, tm, C_out), jnp.float32)
    ybuf[_PAD:_PAD + T] = y

    # ---- branches 1-4: unified 7-tap depthwise temporal conv over channels [0, 4*nb) ----
    # (branch 1 carries an identity center tap; BN scale is folded into every tap)
    f = f_ref[...]
    conv = f[0].reshape(1, 1, ndw) * ybuf[0:T, :, 0:ndw]
    for k in range(1, _DW_MAX_K):
        conv = conv + f[k].reshape(1, 1, ndw) * ybuf[k:k + T, :, 0:ndw]

    # ---- branch 5: temporal maxpool(2, stride 1) + front replication pad, [4*nb, 5*nb) ----
    y5 = y[:, :, ndw:]
    y5_prev = ybuf[_PAD - 1:_PAD - 1 + T, :, ndw:]     # [0, y5[0], ..., y5[T-2]]
    pool = jnp.maximum(y5, y5_prev)
    pool0 = jnp.maximum(y5[0:1], y5[1:2])              # replication pad: prev(0) := y5[1]
    t0 = lax.broadcasted_iota(jnp.int32, (T, 1, 1), 0) == 0
    pool = jnp.where(t0, pool0, pool)
    pool = pool * ps_ref[...].reshape(1, 1, nb)

    # ---- assemble, folded bias/BN shift, ReLU, layer maxpool(2, stride 2), dense store ----
    z = jnp.concatenate([conv, pool], axis=-1) + pb_ref[...].reshape(1, 1, C_out)
    z = jnp.maximum(z, 0.0)
    zz = z[:2 * Th].reshape(Th, 2, tm, C_out)
    o_ref[...] = jnp.maximum(zz[:, 0], zz[:, 1])


# --------------------------------------------------------------------------- #
# Host-side helpers
# --------------------------------------------------------------------------- #
def _round_up(v, m):
    return ((v + m - 1) // m) * m


def _vmem_capacity_bytes():
    try:
        return int(pltpu.get_tpu_info().vmem_capacity_bytes)
    except Exception:
        return 64 * 1024 * 1024        # conservative default (v7x per-TensorCore)


def _pick_tiling(T, C_max, M, budget_bytes):
    """Pick the spatial tile `tm` (sublane axis, multiple of 8) from the VMEM budget."""
    Cl = _round_up(C_max, 128)
    per_row = 4 * (2 * T * Cl                  # input block, double buffered
                   + 2 * (T // 2) * Cl         # output block, double buffered
                   + (T + 2 * _PAD) * Cl       # padded scratch
                   + 4 * T * Cl)               # in-flight temporaries (upper bound)
    tm = max(8, (budget_bytes // max(per_row, 1)) // 8 * 8)
    tm = min(tm, 2048)
    Mr = _round_up(max(M, 1), 8)
    if tm >= Mr:
        tm = Mr
    Mp = _round_up(M, tm)
    return tm, Mp


def prepare_timeception_params(params, n_groups, n_channels_in):
    """Fold eval-mode BatchNorm, the 5-branch structure and each layer's channel shuffle
    into kernel-ready arrays; returns per-layer dicts and the final inverse channel
    permutation that restores the PyTorch channel order."""
    G = n_groups
    layer_params = []
    chan_map = np.arange(n_channels_in)        # stored[..., c] == torch[..., chan_map[c]]
    for p in params:
        n_cpb = int(p["n_cpb"])
        nb = G * n_cpb
        C_out = _N_BRANCHES * nb
        Cg = int(p["pw_w"].shape[2])
        C_cur = G * Cg

        pw_w = np.asarray(p["pw_w"], np.float32)    # (G, 5*n_cpb, Cg)
        pw_b = np.asarray(p["pw_b"], np.float32)    # (G, 5*n_cpb)
        dw_w = np.asarray(p["dw_w"], np.float32)    # (G, 3*n_cpb, 7)
        dw_b = np.asarray(p["dw_b"], np.float32)    # (G, 3*n_cpb)
        scale = np.asarray(p["bn_scale"], np.float32)
        shift = np.asarray(p["bn_shift"], np.float32)

        def to_kernel_order(a):                     # (G, 5*n_cpb) -> (C_out,) branch-major
            return a.reshape(G, _N_BRANCHES, n_cpb).transpose(1, 0, 2).reshape(C_out)

        # Block-diagonal pointwise weight: torch input-channel rows, kernel-order columns.
        Wt = np.zeros((C_cur, C_out), np.float32)
        for g in range(G):
            for b in range(_N_BRANCHES):
                Wt[g * Cg:(g + 1) * Cg,
                   b * nb + g * n_cpb: b * nb + (g + 1) * n_cpb] = \
                    pw_w[g, b * n_cpb:(b + 1) * n_cpb, :].T
        # Fold the previous layer's channel shuffle (a row permutation) into the weight.
        Wk = Wt[chan_map, :]

        scale_k = to_kernel_order(scale)
        shift_k = to_kernel_order(shift)
        bias_k = to_kernel_order(pw_b)

        # Unified 7-tap temporal filter for branches 1-4 (BN scale folded into the taps).
        f = np.zeros((_DW_MAX_K, 4 * nb), np.float32)
        f[_PAD, 0:nb] = 1.0                          # branch 1: identity
        for bi, K in enumerate(_KERNEL_SIZES):       # branches 2-4: centered k=3/5/7
            kpad = (K - 1) // 2
            col0 = (bi + 1) * nb
            for k in range(K):
                f[_PAD - kpad + k, col0:col0 + nb] = \
                    dw_w[:, bi * n_cpb:(bi + 1) * n_cpb, k].reshape(nb)
        f = f * scale_k[None, 0:4 * nb]

        # Additive term after branch assembly:
        #   branches 2-4: scale*dw_bias + shift ; branches 1, 5: shift only.
        dwb_k = np.zeros(C_out, np.float32)
        for bi in range(3):
            dwb_k[(bi + 1) * nb:(bi + 2) * nb] = \
                dw_b[:, bi * n_cpb:(bi + 1) * n_cpb].reshape(nb)
        post_bias = scale_k * dwb_k + shift_k

        layer_params.append(dict(
            nb=nb, C_in=C_cur, C_out=C_out,
            w=jnp.asarray(Wk, jnp.bfloat16),
            b=jnp.asarray(bias_k.reshape(1, C_out)),
            f=jnp.asarray(f),
            ps=jnp.asarray(scale_k[4 * nb:].reshape(1, nb)),
            pb=jnp.asarray(post_bias.reshape(1, C_out)),
        ))

        # New stored order = kernel branch-major; map it to torch POST-shuffle channels.
        o = np.arange(C_out)
        b_idx, r = o // nb, o % nb
        g_idx, j_idx = r // n_cpb, r % n_cpb
        chan_map = (b_idx * n_cpb + j_idx) * G + g_idx

    inv_final = np.argsort(chan_map).astype(np.int32)
    return layer_params, inv_final


def timeception_layer_pallas(x, kp, tm, vmem_limit):
    """One Timeception layer: (T, Mp, C_in) -> (T//2, Mp, C_out) (kernel channel order)."""
    T, Mp, C_in = x.shape
    C_out, nb = kp["C_out"], kp["nb"]
    assert T >= 2 and Mp % tm == 0
    Th = T // 2
    return pl.pallas_call(
        _tc_layer_kernel,
        grid=(Mp // tm,),
        in_specs=[
            pl.BlockSpec((T, tm, C_in), lambda i: (0, i, 0)),
            # constant index_map -> fetched once, stays resident across grid steps
            pl.BlockSpec((C_in, C_out), lambda i: (0, 0)),
            pl.BlockSpec((1, C_out), lambda i: (0, 0)),
            pl.BlockSpec((_DW_MAX_K, 4 * nb), lambda i: (0, 0)),
            pl.BlockSpec((1, nb), lambda i: (0, 0)),
            pl.BlockSpec((1, C_out), lambda i: (0, 0)),
        ],
        out_specs=pl.BlockSpec((Th, tm, C_out), lambda i: (0, i, 0)),
        out_shape=jax.ShapeDtypeStruct((Th, Mp, C_out), jnp.float32),
        scratch_shapes=[pltpu.VMEM((T + 2 * _PAD, tm, C_out), jnp.float32)],
        compiler_params=pltpu.CompilerParams(
            dimension_semantics=("parallel",),
            vmem_limit_bytes=vmem_limit,
        ),
    )(x, kp["w"], kp["b"], kp["f"], kp["ps"], kp["pb"])


def timeception_forward_pallas(x, params, n_groups):
    """x: (N, C, T, H, W) -> (N, C_out, T // 2**n_layers, H, W) in PyTorch channel order."""
    N, C, T, H, W = x.shape
    M = N * H * W

    layer_params, inv_final = prepare_timeception_params(params, n_groups, C)

    cap = _vmem_capacity_bytes()
    C_max = max([C] + [kp["C_out"] for kp in layer_params])
    tm, Mp = _pick_tiling(T, C_max, M, budget_bytes=cap // 4)
    vmem_limit = cap // 2

    # (N, C, T, H, W) -> (T, M, C): time leading, spatial on sublanes, channels on lanes.
    z = jnp.transpose(x, (2, 0, 3, 4, 1)).reshape(T, M, C)
    if Mp != M:
        z = jnp.pad(z, ((0, 0), (0, Mp - M), (0, 0)))

    for kp in layer_params:
        z = timeception_layer_pallas(z, kp, tm, vmem_limit)

    # Back to (N, C_out, T_out, H, W); apply the accumulated (folded) shuffles once.
    T_out, _, C_out = z.shape
    a = z[:, :M, :]
    a = jnp.take(a, jnp.asarray(inv_final, dtype=jnp.int32), axis=2)
    a = a.reshape(T_out, N, H, W, C_out)
    return jnp.transpose(a, (1, 4, 0, 2, 3))


# --------------------------------------------------------------------------- #
# Synthetic parameters mirroring the PyTorch module shapes.
# --------------------------------------------------------------------------- #
def init_timeception_params(key, n_channels_in, n_layers, n_groups,
                            expansion_factor=1.25):
    params = []
    C = n_channels_in
    for _ in range(n_layers):
        n_cpb = int(C * expansion_factor / float(_N_BRANCHES * n_groups))
        C_out = int(n_cpb * n_groups * _N_BRANCHES)
        Cg = C // n_groups
        assert C % n_groups == 0 and n_cpb >= 1
        key, *ks = jax.random.split(key, 9)
        Cpg = _N_BRANCHES * n_cpb
        pw_w = jax.random.uniform(ks[0], (n_groups, Cpg, Cg), jnp.float32, -0.5, 0.5)
        pw_b = jax.random.uniform(ks[1], (n_groups, Cpg), jnp.float32, -0.1, 0.1)
        dw_w = jax.random.uniform(ks[2], (n_groups, 3 * n_cpb, _DW_MAX_K),
                                  jnp.float32, -0.5, 0.5)
        dw_b = jax.random.uniform(ks[3], (n_groups, 3 * n_cpb), jnp.float32, -0.1, 0.1)
        gamma = jax.random.uniform(ks[4], (n_groups, Cpg), jnp.float32, 0.5, 1.5)
        beta = jax.random.uniform(ks[5], (n_groups, Cpg), jnp.float32, -0.1, 0.1)
        r_mean = jax.random.uniform(ks[6], (n_groups, Cpg), jnp.float32, -0.1, 0.1)
        r_var = jax.random.uniform(ks[7], (n_groups, Cpg), jnp.float32, 0.5, 1.5)
        scale = gamma / jnp.sqrt(r_var + 1e-5)
        shift = beta - r_mean * scale
        params.append(dict(n_cpb=n_cpb, pw_w=pw_w, pw_b=pw_b, dw_w=dw_w, dw_b=dw_b,
                           bn_scale=scale, bn_shift=shift))
        C = C_out
    return params, C


# --------------------------------------------------------------------------- #
# Pure-JAX reference (mirrors the PyTorch op order; matmul inputs rounded to bf16
# to match the kernel's single-pass MXU matmul numerics).
# --------------------------------------------------------------------------- #
def _reference_layer(x, p, n_groups):
    C, T, M = x.shape
    Cg = C // n_groups
    n_cpb = p["n_cpb"]
    Cpg = _N_BRANCHES * n_cpb
    hp = lax.Precision.HIGHEST
    group_outs = []
    for g in range(n_groups):
        xg = x[g * Cg:(g + 1) * Cg]
        w_r = p["pw_w"][g].astype(jnp.bfloat16).astype(jnp.float32)
        x_r = xg.astype(jnp.bfloat16).astype(jnp.float32)
        pg = (jnp.einsum("jc,ctm->jtm", w_r, x_r, precision=hp)
              + p["pw_b"][g][:, None, None])
        branch_outs = []
        for b in range(_N_BRANCHES):
            blk = pg[b * n_cpb:(b + 1) * n_cpb]
            if b == 0:
                br = blk
            elif b in (1, 2, 3):
                K = _KERNEL_SIZES[b - 1]
                pad = (K - 1) // 2
                jd0 = (b - 1) * n_cpb
                w = p["dw_w"][g, jd0:jd0 + n_cpb, :K]
                xp = jnp.pad(blk, ((0, 0), (pad, pad), (0, 0)))
                br = sum(w[:, k][:, None, None] * xp[:, k:k + T, :] for k in range(K))
                br = br + p["dw_b"][g, jd0:jd0 + n_cpb][:, None, None]
            else:
                pooled = jnp.maximum(blk[:, :-1, :], blk[:, 1:, :])
                br = jnp.concatenate([pooled[:, :1, :], pooled], axis=1)
            j0 = b * n_cpb
            br = (br * p["bn_scale"][g, j0:j0 + n_cpb][:, None, None]
                  + p["bn_shift"][g, j0:j0 + n_cpb][:, None, None])
            branch_outs.append(br)
        group_outs.append(jnp.concatenate(branch_outs, axis=0))
    y = jnp.concatenate(group_outs, axis=0)
    y = jnp.maximum(y, 0.0)                                   # ReLU
    C_out = y.shape[0]
    y = y.reshape(n_groups, Cpg, T, M)                        # channel shuffle
    y = jnp.transpose(y, (1, 0, 2, 3)).reshape(C_out, T, M)
    T_half = T // 2                                           # maxpool (2, 1, 1)
    y = y[:, :2 * T_half].reshape(C_out, T_half, 2, M).max(axis=2)
    return y


def timeception_forward_ref(x, params, n_groups):
    N, C, T, H, W = x.shape
    z = jnp.transpose(x, (1, 2, 0, 3, 4)).reshape(C, T, N * H * W)
    for p in params:
        z = _reference_layer(z, p, n_groups)
    C_out, T_out, _ = z.shape
    z = z.reshape(C_out, T_out, N, H, W)
    return jnp.transpose(z, (2, 0, 1, 3, 4))


# --------------------------------------------------------------------------- #
# Self-test
# --------------------------------------------------------------------------- #
def _run_case(key, N, C, T, H, W, n_layers, n_groups):
    k_x, k_p = jax.random.split(key)
    x = jax.random.normal(k_x, (N, C, T, H, W), dtype=jnp.float32)
    params, C_out = init_timeception_params(k_p, C, n_layers, n_groups)

    out = jax.block_until_ready(timeception_forward_pallas(x, params, n_groups))
    ref = jax.block_until_ready(timeception_forward_ref(x, params, n_groups))

    assert out.shape == (N, C_out, T // (2 ** n_layers), H, W), out.shape
    max_err = float(jnp.max(jnp.abs(out - ref)))
    assert max_err < 2e-2, f"max abs error {max_err}"
    return max_err


if __name__ == "__main__":
    key = jax.random.PRNGKey(0)
    k1, k2 = jax.random.split(key)
    # Module defaults at small size: n_layers=4, n_groups=8.
    _run_case(k1, N=2, C=32, T=16, H=4, W=4, n_layers=4, n_groups=8)
    # Exercises a non-trivial folded channel shuffle (n_cpb = 2).
    _run_case(k2, N=1, C=64, T=8, H=2, W=2, n_layers=2, n_groups=8)
    print("KERNEL_OK")
</pallas_src>

<mosaic_0001>
module attributes {stable_mosaic.version = 11 : i64} {
  func.func @_tc_layer_kernel(%arg0: i32, %arg1: memref<16x32x32xf32, #tpu.memory_space<vmem>>, %arg2: memref<32x40xbf16, #tpu.memory_space<vmem>>, %arg3: memref<1x40xf32, #tpu.memory_space<vmem>>, %arg4: memref<7x32xf32, #tpu.memory_space<vmem>>, %arg5: memref<1x8xf32, #tpu.memory_space<vmem>>, %arg6: memref<1x40xf32, #tpu.memory_space<vmem>>, %arg7: memref<8x32x40xf32, #tpu.memory_space<vmem>>, %arg8: memref<22x32x40xf32, #tpu.memory_space<vmem>>) attributes {dimension_semantics = [#tpu.dimension_semantics<parallel>], iteration_bounds = array<i64: 1>, scalar_prefetch = 0 : i64, scratch_operands = 1 : i64, tpu.core_type = #tpu.core_type<tc>, window_params = [{transform_indices = @transform_0, window_bounds = array<i64: 16, 32, 32>}, {pipeline_mode = #tpu.pipeline_mode<synchronous>, transform_indices = @transform_1, window_bounds = array<i64: 32, 40>}, {pipeline_mode = #tpu.pipeline_mode<synchronous>, transform_indices = @transform_2, window_bounds = array<i64: 1, 40>}, {pipeline_mode = #tpu.pipeline_mode<synchronous>, transform_indices = @transform_3, window_bounds = array<i64: 7, 32>}, {pipeline_mode = #tpu.pipeline_mode<synchronous>, transform_indices = @transform_4, window_bounds = array<i64: 1, 8>}, {pipeline_mode = #tpu.pipeline_mode<synchronous>, transform_indices = @transform_5, window_bounds = array<i64: 1, 40>}, {transform_indices = @transform_6, window_bounds = array<i64: 8, 32, 40>}]} {
    %c0 = arith.constant 0 : index
    %c0_0 = arith.constant 0 : index
    %c0_1 = arith.constant 0 : index
    %0 = vector.load %arg1[%c0, %c0_0, %c0_1] : memref<16x32x32xf32, #tpu.memory_space<vmem>>, vector<16x32x32xf32>
    %1 = vector.shape_cast %0 : vector<16x32x32xf32> to vector<512x32xf32>
    %2 = arith.truncf %1 : vector<512x32xf32> to vector<512x32xbf16>
    %c0_2 = arith.constant 0 : index
    %c0_3 = arith.constant 0 : index
    %3 = vector.load %arg2[%c0_2, %c0_3] : memref<32x40xbf16, #tpu.memory_space<vmem>>, vector<32x40xbf16>
    %cst = arith.constant dense<0.000000e+00> : vector<512x40xf32>
    %4 = tpu.matmul %2, %3, %cst {dimension_numbers = #tpu.dot_dimension_numbers<[1], [0], [0], [1], [0, 0, 1, 1], [], []>} : vector<512x32xbf16>, vector<32x40xbf16>, vector<512x40xf32> -> vector<512x40xf32>
    %5 = vector.shape_cast %4 : vector<512x40xf32> to vector<16x32x40xf32>
    %c0_4 = arith.constant 0 : index
    %c0_5 = arith.constant 0 : index
    %6 = vector.load %arg3[%c0_4, %c0_5] : memref<1x40xf32, #tpu.memory_space<vmem>>, vector<1x40xf32>
    %7 = vector.shape_cast %6 : vector<1x40xf32> to vector<1x1x40xf32>
    %8 = vector.broadcast %7 : vector<1x1x40xf32> to vector<16x32x40xf32>
    %9 = arith.addf %5, %8 : vector<16x32x40xf32>
    %cst_6 = arith.constant 0.000000e+00 : f32
    %10 = vector.broadcast %cst_6 : f32 to vector<3x32x40xf32>
    %c0_7 = arith.constant 0 : index
    %c0_8 = arith.constant 0 : index
    %c0_9 = arith.constant 0 : index
    %11 = vector.load %arg8[%c0_7, %c0_8, %c0_9] : memref<22x32x40xf32, #tpu.memory_space<vmem>>, vector<3x32x40xf32>
    tpu.vector_store %arg8[%c0_7, %c0_8, %c0_9], %10 {strides = array<i32>} : memref<22x32x40xf32, #tpu.memory_space<vmem>>, vector<3x32x40xf32>,
    %cst_10 = arith.constant 0.000000e+00 : f32
    %12 = vector.broadcast %cst_10 : f32 to vector<3x32x40xf32>
    %c19 = arith.constant 19 : index
    %c0_11 = arith.constant 0 : index
    %c0_12 = arith.constant 0 : index
    %13 = vector.load %arg8[%c19, %c0_11, %c0_12] : memref<22x32x40xf32, #tpu.memory_space<vmem>>, vector<3x32x40xf32>
    tpu.vector_store %arg8[%c19, %c0_11, %c0_12], %12 {strides = array<i32>} : memref<22x32x40xf32, #tpu.memory_space<vmem>>, vector<3x32x40xf32>,
    %c3 = arith.constant 3 : index
    %c0_13 = arith.constant 0 : index
    %c0_14 = arith.constant 0 : index
    %14 = vector.load %arg8[%c3, %c0_13, %c0_14] : memref<22x32x40xf32, #tpu.memory_space<vmem>>, vector<16x32x40xf32>
    tpu.vector_store %arg8[%c3, %c0_13, %c0_14], %9 {strides = array<i32>} : memref<22x32x40xf32, #tpu.memory_space<vmem>>, vector<16x32x40xf32>,
    %c0_15 = arith.constant 0 : index
    %c0_16 = arith.constant 0 : index
    %15 = vector.load %arg4[%c0_15, %c0_16] : memref<7x32xf32, #tpu.memory_space<vmem>>, vector<7x32xf32>
    %16 = vector.extract_strided_slice %15 {offsets = [0, 0], sizes = [1, 32], strides = [1, 1]} : vector<7x32xf32> to vector<1x32xf32>
    %17 = vector.shape_cast %16 : vector<1x32xf32> to vector<32xf32>
    %18 = vector.shape_cast %17 : vector<32xf32> to vector<1x1x32xf32>
    %c0_17 = arith.constant 0 : index
    %c0_18 = arith.constant 0 : index
    %c0_19 = arith.constant 0 : index
    %19 = vector.load %arg8[%c0_17, %c0_18, %c0_19] : memref<22x32x40xf32, #tpu.memory_space<vmem>>, vector<16x32x32xf32>
    %20 = vector.broadcast %18 : vector<1x1x32xf32> to vector<16x32x32xf32>
    %21 = arith.mulf %20, %19 : vector<16x32x32xf32>
    %22 = vector.extract_strided_slice %15 {offsets = [1, 0], sizes = [1, 32], strides = [1, 1]} : vector<7x32xf32> to vector<1x32xf32>
    %23 = vector.shape_cast %22 : vector<1x32xf32> to vector<32xf32>
    %24 = vector.shape_cast %23 : vector<32xf32> to vector<1x1x32xf32>
    %c1 = arith.constant 1 : index
    %c0_20 = arith.constant 0 : index
    %c0_21 = arith.constant 0 : index
    %25 = vector.load %arg8[%c1, %c0_20, %c0_21] : memref<22x32x40xf32, #tpu.memory_space<vmem>>, vector<16x32x32xf32>
    %26 = vector.broadcast %24 : vector<1x1x32xf32> to vector<16x32x32xf32>
    %27 = arith.mulf %26, %25 : vector<16x32x32xf32>
    %28 = arith.addf %21, %27 : vector<16x32x32xf32>
    %29 = vector.extract_strided_slice %15 {offsets = [2, 0], sizes = [1, 32], strides = [1, 1]} : vector<7x32xf32> to vector<1x32xf32>
    %30 = vector.shape_cast %29 : vector<1x32xf32> to vector<32xf32>
    %31 = vector.shape_cast %30 : vector<32xf32> to vector<1x1x32xf32>
    %c2 = arith.constant 2 : index
    %c0_22 = arith.constant 0 : index
    %c0_23 = arith.constant 0 : index
    %32 = vector.load %arg8[%c2, %c0_22, %c0_23] : memref<22x32x40xf32, #tpu.memory_space<vmem>>, vector<16x32x32xf32>
    %33 = vector.broadcast %31 : vector<1x1x32xf32> to vector<16x32x32xf32>
    %34 = arith.mulf %33, %32 : vector<16x32x32xf32>
    %35 = arith.addf %28, %34 : vector<16x32x32xf32>
    %36 = vector.extract_strided_slice %15 {offsets = [3, 0], sizes = [1, 32], strides = [1, 1]} : vector<7x32xf32> to vector<1x32xf32>
    %37 = vector.shape_cast %36 : vector<1x32xf32> to vector<32xf32>
    %38 = vector.shape_cast %37 : vector<32xf32> to vector<1x1x32xf32>
    %c3_24 = arith.constant 3 : index
    %c0_25 = arith.constant 0 : index
    %c0_26 = arith.constant 0 : index
    %39 = vector.load %arg8[%c3_24, %c0_25, %c0_26] : memref<22x32x40xf32, #tpu.memory_space<vmem>>, vector<16x32x32xf32>
    %40 = vector.broadcast %38 : vector<1x1x32xf32> to vector<16x32x32xf32>
    %41 = arith.mulf %40, %39 : vector<16x32x32xf32>
    %42 = arith.addf %35, %41 : vector<16x32x32xf32>
    %43 = vector.extract_strided_slice %15 {offsets = [4, 0], sizes = [1, 32], strides = [1, 1]} : vector<7x32xf32> to vector<1x32xf32>
    %44 = vector.shape_cast %43 : vector<1x32xf32> to vector<32xf32>
    %45 = vector.shape_cast %44 : vector<32xf32> to vector<1x1x32xf32>
    %c4 = arith.constant 4 : index
    %c0_27 = arith.constant 0 : index
    %c0_28 = arith.constant 0 : index
    %46 = vector.load %arg8[%c4, %c0_27, %c0_28] : memref<22x32x40xf32, #tpu.memory_space<vmem>>, vector<16x32x32xf32>
    %47 = vector.broadcast %45 : vector<1x1x32xf32> to vector<16x32x32xf32>
    %48 = arith.mulf %47, %46 : vector<16x32x32xf32>
    %49 = arith.addf %42, %48 : vector<16x32x32xf32>
    %50 = vector.extract_strided_slice %15 {offsets = [5, 0], sizes = [1, 32], strides = [1, 1]} : vector<7x32xf32> to vector<1x32xf32>
    %51 = vector.shape_cast %50 : vector<1x32xf32> to vector<32xf32>
    %52 = vector.shape_cast %51 : vector<32xf32> to vector<1x1x32xf32>
    %c5 = arith.constant 5 : index
    %c0_29 = arith.constant 0 : index
    %c0_30 = arith.constant 0 : index
    %53 = vector.load %arg8[%c5, %c0_29, %c0_30] : memref<22x32x40xf32, #tpu.memory_space<vmem>>, vector<16x32x32xf32>
    %54 = vector.broadcast %52 : vector<1x1x32xf32> to vector<16x32x32xf32>
    %55 = arith.mulf %54, %53 : vector<16x32x32xf32>
    %56 = arith.addf %49, %55 : vector<16x32x32xf32>
    %57 = vector.extract_strided_slice %15 {offsets = [6, 0], sizes = [1, 32], strides = [1, 1]} : vector<7x32xf32> to vector<1x32xf32>
    %58 = vector.shape_cast %57 : vector<1x32xf32> to vector<32xf32>
    %59 = vector.shape_cast %58 : vector<32xf32> to vector<1x1x32xf32>
    %c6 = arith.constant 6 : index
    %c0_31 = arith.constant 0 : index
    %c0_32 = arith.constant 0 : index
    %60 = vector.load %arg8[%c6, %c0_31, %c0_32] : memref<22x32x40xf32, #tpu.memory_space<vmem>>, vector<16x32x32xf32>
    %61 = vector.broadcast %59 : vector<1x1x32xf32> to vector<16x32x32xf32>
    %62 = arith.mulf %61, %60 : vector<16x32x32xf32>
    %63 = arith.addf %56, %62 : vector<16x32x32xf32>
    %64 = vector.extract_strided_slice %9 {offsets = [0, 0, 32], sizes = [16, 32, 8], strides = [1, 1, 1]} : vector<16x32x40xf32> to vector<16x32x8xf32>
    %c2_33 = arith.constant 2 : index
    %c0_34 = arith.constant 0 : index
    %c32 = arith.constant 32 : index
    %65 = vector.load %arg8[%c2_33, %c0_34, %c32] : memref<22x32x40xf32, #tpu.memory_space<vmem>>, vector<16x32x8xf32>
    %66 = arith.maximumf %64, %65 : vector<16x32x8xf32>
    %67 = vector.extract_strided_slice %64 {offsets = [0, 0, 0], sizes = [1, 32, 8], strides = [1, 1, 1]} : vector<16x32x8xf32> to vector<1x32x8xf32>
    %68 = vector.extract_strided_slice %64 {offsets = [1, 0, 0], sizes = [1, 32, 8], strides = [1, 1, 1]} : vector<16x32x8xf32> to vector<1x32x8xf32>
    %69 = arith.maximumf %67, %68 : vector<1x32x8xf32>
    %70 = tpu.iota {dimensions = array<i32: 0>} : vector<16x1x1xi32>
    %c0_i32 = arith.constant 0 : i32
    %71 = vector.broadcast %c0_i32 : i32 to vector<16x1x1xi32>
    %72 = arith.cmpi eq, %70, %71 : vector<16x1x1xi32>
    %73 = vector.shape_cast %72 : vector<16x1x1xi1> to vector<16x1x1xi1>
    %74 = vector.broadcast %73 : vector<16x1x1xi1> to vector<16x32x8xi1>
    %75 = vector.shape_cast %69 : vector<1x32x8xf32> to vector<1x32x8xf32>
    %76 = vector.broadcast %75 : vector<1x32x8xf32> to vector<16x32x8xf32>
    %77 = arith.select %74, %76, %66 : vector<16x32x8xi1>, vector<16x32x8xf32>
    %c0_35 = arith.constant 0 : index
    %c0_36 = arith.constant 0 : index
    %78 = vector.load %arg5[%c0_35, %c0_36] : memref<1x8xf32, #tpu.memory_space<vmem>>, vector<1x8xf32>
    %79 = vector.shape_cast %78 : vector<1x8xf32> to vector<1x1x8xf32>
    %80 = vector.broadcast %79 : vector<1x1x8xf32> to vector<16x32x8xf32>
    %81 = arith.mulf %77, %80 : vector<16x32x8xf32>
    %82 = tpu.concatenate %63, %81 in 2 : vector<16x32x32xf32>, vector<16x32x8xf32> -> vector<16x32x40xf32>
    %c0_37 = arith.constant 0 : index
    %c0_38 = arith.constant 0 : index
    %83 = vector.load %arg6[%c0_37, %c0_38] : memref<1x40xf32, #tpu.memory_space<vmem>>, vector<1x40xf32>
    %84 = vector.shape_cast %83 : vector<1x40xf32> to vector<1x1x40xf32>
    %85 = vector.broadcast %84 : vector<1x1x40xf32> to vector<16x32x40xf32>
    %86 = arith.addf %82, %85 : vector<16x32x40xf32>
    %cst_39 = arith.constant 0.000000e+00 : f32
    %87 = vector.broadcast %cst_39 : f32 to vector<16x32x40xf32>
    %88 = arith.maximumf %86, %87 : vector<16x32x40xf32>
    %89 = vector.shape_cast %88 : vector<16x32x40xf32> to vector<8x2x32x40xf32>
    %90 = vector.extract_strided_slice %89 {offsets = [0, 0, 0, 0], sizes = [8, 1, 32, 40], strides = [1, 1, 1, 1]} : vector<8x2x32x40xf32> to vector<8x1x32x40xf32>
    %91 = vector.shape_cast %90 : vector<8x1x32x40xf32> to vector<8x32x40xf32>
    %92 = vector.extract_strided_slice %89 {offsets = [0, 1, 0, 0], sizes = [8, 1, 32, 40], strides = [1, 1, 1, 1]} : vector<8x2x32x40xf32> to vector<8x1x32x40xf32>
    %93 = vector.shape_cast %92 : vector<8x1x32x40xf32> to vector<8x32x40xf32>
    %94 = arith.maximumf %91, %93 : vector<8x32x40xf32>
    %c0_40 = arith.constant 0 : index
    %c0_41 = arith.constant 0 : index
    %c0_42 = arith.constant 0 : index
    %95 = vector.load %arg7[%c0_40, %c0_41, %c0_42] : memref<8x32x40xf32, #tpu.memory_space<vmem>>, vector<8x32x40xf32>
    tpu.vector_store %arg7[%c0_40, %c0_41, %c0_42], %94 {strides = array<i32>} : memref<8x32x40xf32, #tpu.memory_space<vmem>>, vector<8x32x40xf32>,
    return
  }
  func.func @transform_0(%arg0: i32) -> (i32, i32, i32) {
    %c0_i32 = arith.constant 0 : i32
    %c0_i32_0 = arith.constant 0 : i32
    %c0_i32_1 = arith.constant 0 : i32
    return %c0_i32, %arg0, %c0_i32_0 : i32, i32, i32
  }
  func.func @transform_1(%arg0: i32) -> (i32, i32) {
    %c0_i32 = arith.constant 0 : i32
    %c0_i32_0 = arith.constant 0 : i32
    %c0_i32_1 = arith.constant 0 : i32
    return %c0_i32, %c0_i32_0 : i32, i32
  }
  func.func @transform_2(%arg0: i32) -> (i32, i32) {
    %c0_i32 = arith.constant 0 : i32
    %c0_i32_0 = arith.constant 0 : i32
    %c0_i32_1 = arith.constant 0 : i32
    return %c0_i32, %c0_i32_0 : i32, i32
  }
  func.func @transform_3(%arg0: i32) -> (i32, i32) {
    %c0_i32 = arith.constant 0 : i32
    %c0_i32_0 = arith.constant 0 : i32
    %c0_i32_1 = arith.constant 0 : i32
    return %c0_i32, %c0_i32_0 : i32, i32
  }
  func.func @transform_4(%arg0: i32) -> (i32, i32) {
    %c0_i32 = arith.constant 0 : i32
    %c0_i32_0 = arith.constant 0 : i32
    %c0_i32_1 = arith.constant 0 : i32
    return %c0_i32, %c0_i32_0 : i32, i32
  }
  func.func @transform_5(%arg0: i32) -> (i32, i32) {
    %c0_i32 = arith.constant 0 : i32
    %c0_i32_0 = arith.constant 0 : i32
    %c0_i32_1 = arith.constant 0 : i32
    return %c0_i32, %c0_i32_0 : i32, i32
  }
  func.func @transform_6(%arg0: i32) -> (i32, i32, i32) {
    %c0_i32 = arith.constant 0 : i32
    %c0_i32_0 = arith.constant 0 : i32
    %c0_i32_1 = arith.constant 0 : i32
    return %c0_i32, %arg0, %c0_i32_0 : i32, i32, i32
  }
}

</mosaic_0001>

<bundles_post_ra>
// kernel: tpu_custom_call.1
= control target key start
LH: loop header
LB: loop body
LE: loop exit
PB: predicated region body
PF: predicated region fallthrough
CT: control target
= control target key end

     0   :  { %11 = vsyncpa [#allocation4], 0  ;;  %s5338_s0 = inlined_call_operand.hbm [shape: f32[16,32,32], index: 0, kind: input, shape index: {}]   ;;  %s5339_s1 = inlined_call_operand.hbm [shape: bf16[32,40], index: 1, kind: input, shape index: {}]   ;;  %s5340_s2 = inlined_call_operand.vmem [shape: f32[1,40], index: 2, kind: input, shape index: {}]   ;;  %s5341_s3 = inlined_call_operand.vmem [shape: f32[7,32], index: 3, kind: input, shape index: {}]   ;;  %s5342_s4 = inlined_call_operand.vmem [shape: f32[1,8], index: 4, kind: input, shape index: {}]   ;;  %s5343_s5 = inlined_call_operand.vmem [shape: f32[1,40], index: 5, kind: input, shape index: {}]   ;;  %s5344_s6 = inlined_call_operand.hbm [shape: f32[8,32,40], index: 6, kind: output, shape index: {}]  }
   0x1   :  { %12 = vsyncpa [#allocation7], 0 }
   0x2   :  { %13 = vsyncpa [#allocation5], 0  ;;  %s2743_s21 = smov [#allocation3]   ;;  %s2671_s25 = scalar_lea.hbm %s5338_s0, 8192 }
   0x3   :  { %s19_s22 = sshll.u32 %s2743_s21, 4  ;;  %p2672_p0 = scmp.ne.s32.totalorder %s5338_s0, %s2671_s25  ;;  %s20_s22 = int_to_ptr.vmem [resolvable:$true] %s19_s22 }
   0x4   :  { %p2675_p1 = scmp.lt.u32.totalorder %s2671_s25, %s5338_s0 }
   0x6   :  { %p2677_p2 = pnand %p2675_p1, %p2672_p0 }
   0x8   :  { %2680 = shalt.err (!%p2677_p2)
}
   0x9   :  { %s2681_s30 = scalar_lea.vmem %s20_s22, 8192  ;;  %p2686_p4 = scmp.lt.s32.totalorder %s20_s22, %s20_s22 }
   0xa   :  { %p2682_p3 = scmp.ne.s32.totalorder %s20_s22, %s2681_s30  ;;  %p2687_p5 = scmp.lt.s32.totalorder %s2681_s30, %s2681_s30 }
   0xc   :  { %p2688_p6 = por %p2687_p5, %p2686_p4 }
   0xe   :  { %p2689_p7 = pnand %p2688_p6, %p2682_p3 }
  0x10   :  { %2692 = shalt.err (!%p2689_p7)
}
  0x11   :  { %s2744_s7 = smov 128   ;;  %s2745_s8 = smov 8  }
  0x12   :  { %25 = dma.hbm_to_vmem [thread:$0]  %s5338_s0, 8192, %s20_s22, [#allocation4], %s2744_s7, %s2744_s7, %s2745_s8  }
  0x13   :  { %s2746_s11 = smov [#allocation6]   ;;  %s2693_s15 = scalar_lea.hbm %s5339_s1, 256 }
  0x14   :  { %s31_s12 = sshll.u32 %s2746_s11, 4  ;;  %p2694_p8 = scmp.ne.s32.totalorder %s5339_s1, %s2693_s15  ;;  %s32_s12 = int_to_ptr.vmem [resolvable:$true] %s31_s12 }
  0x15   :  { %p2697_p9 = scmp.lt.u32.totalorder %s2693_s15, %s5339_s1 }
  0x17   :  { %p2699_p10 = pnand %p2697_p9, %p2694_p8 }
  0x19   :  { %2702 = shalt.err (!%p2699_p10)
}
  0x1a   :  { %s2703_s20 = scalar_lea.vmem %s32_s12, 256  ;;  %p2708_p12 = scmp.lt.s32.totalorder %s32_s12, %s32_s12 }
  0x1b   :  { %p2704_p11 = scmp.ne.s32.totalorder %s32_s12, %s2703_s20  ;;  %p2709_p13 = scmp.lt.s32.totalorder %s2703_s20, %s2703_s20 }
  0x1d   :  { %p2710_p0 = por %p2709_p13, %p2708_p12 }
  0x1f   :  { %p2711_p1 = pnand %p2710_p0, %p2704_p11 }
  0x21   :  { %2714 = shalt.err (!%p2711_p1)
}
  0x22   :  { %s2747_s0 = smov 64   ;;  %s2748_s21 = smov 4  }
  0x23   :  { %37 = dma.hbm_to_vmem [thread:$0]  %s5339_s1, 256, %s32_s12, [#allocation7], %s2747_s0, %s2747_s0, %s2748_s21  }
  0x24   :  { %2737 = dma.done.wait [#allocation4], 8192  }
  0x25   :  { %2738 = vsyncadd [#allocation4], 4294959104 }
  0x26   :  { %2739 = dma.done.wait [#allocation7], 256  }
  0x27   :  { %2740 = vsyncadd [#allocation7], 4294967040  ;;  %v2665_v0 = vld [vmem:[#allocation6] sm:$0xff]   ;;  %v2666_v1 = vld [vmem:[#allocation6 + $0x8] sm:$0xff]   ;;  %vm165_vm0 = vcmask 261120   ;;  %s2749_s25 = smov 32  }
  0x28   :  { %2584 = vmatprep.subr.bf16.mxu0 %v2665_v0  ;;  %2652 = vmatprep.subr.bf16.mxu1 %v2665_v0  ;;  %v53_v2 = vld [vmem:[#allocation3] sm:$0xff]  ;;  %v54_v3 = vld [vmem:[#allocation3 + $0x8] sm:$0xff]  ;;  %v55_v7 = vld [vmem:[#allocation3 + $0x10] sm:$0xff]  ;;  %vm622_vm1 = vcmask 326656  }
  0x29   :  { %v85_v4 = vld [vmem:[#allocation3 + $0x100] sm:$0xff]  ;;  %2585 = vmatpush3.bf16.msra.mxu0 %v2665_v0  ;;  %2654 = vmatpush3.bf16.msra.mxu1 %v2665_v0  ;;  %v117_v5 = vpack.c.bf16 %v54_v3, %v53_v2  ;;  %v86_v6 = vld [vmem:[#allocation3 + $0x108] sm:$0xff]  ;;  %v56_v8 = vld [vmem:[#allocation3 + $0x18] sm:$0xff] }
  0x2a   :  { %2586 = vmatprep.subr.bf16.mxu0 %v2666_v1  ;;  %2653 = vmatprep.subr.bf16.mxu1 %v2666_v1  ;;  %v133_v9 = vpack.c.bf16 %v86_v6, %v85_v4  ;;  %v87_v10 = vld [vmem:[#allocation3 + $0x110] sm:$0xff]  ;;  %v88_v11 = vld [vmem:[#allocation3 + $0x118] sm:$0xff]  ;;  %v57_v12 = vld [vmem:[#allocation3 + $0x20] sm:$0xff]  ;;  %v118_v16 = vpack.c.bf16 %v56_v8, %v55_v7 }
  0x2b   :  { %2588 = vmatprep.mubr.msk.bf16.mxu0 %vm165_vm0, %v117_v5  ;;  %v58_v13 = vld [vmem:[#allocation3 + $0x28] sm:$0xff]  ;;  %v89_v14 = vld [vmem:[#allocation3 + $0x120] sm:$0xff]  ;;  %v134_v17 = vpack.c.bf16 %v88_v11, %v87_v10  ;;  %v59_v20 = vld [vmem:[#allocation3 + $0x30] sm:$0xff] }
  0x2c   :  { %v90_v15 = vld [vmem:[#allocation3 + $0x128] sm:$0xff]  ;;  %2620 = vmatprep.mubr.msk.bf16.mxu1 %vm165_vm0, %v133_v9  ;;  %v119_v18 = vpack.c.bf16 %v58_v13, %v57_v12  ;;  %v60_v21 = vld [vmem:[#allocation3 + $0x38] sm:$0xff]  ;;  %v91_v22 = vld [vmem:[#allocation3 + $0x130] sm:$0xff] }
  0x2d   :  { %2587 = vmatpush3.bf16.msra.mxu0 %v2666_v1  ;;  %2655 = vmatpush3.bf16.msra.mxu1 %v2666_v1  ;;  %v135_v19 = vpack.c.bf16 %v90_v15, %v89_v14  ;;  %v92_v23 = vld [vmem:[#allocation3 + $0x138] sm:$0xff]  ;;  %v61_v24 = vld [vmem:[#allocation3 + $0x40] sm:$0xff]  ;;  %v62_v25 = vld [vmem:[#allocation3 + $0x48] sm:$0xff]  ;;  %v120_v28 = vpack.c.bf16 %v60_v21, %v59_v20 }
  0x2e   :  { %v93_v26 = vld [vmem:[#allocation3 + $0x140] sm:$0xff]  ;;  %v94_v27 = vld [vmem:[#allocation3 + $0x148] sm:$0xff]  ;;  %v136_v29 = vpack.c.bf16 %v92_v23, %v91_v22  ;;  %v121_v30 = vpack.c.bf16 %v62_v25, %v61_v24  ;;  %v63_v32 = vld [vmem:[#allocation3 + $0x50] sm:$0xff] }
  0x2f   :  { %v137_v31 = vpack.c.bf16 %v94_v27, %v93_v26  ;;  %v64_v33 = vld [vmem:[#allocation3 + $0x58] sm:$0xff]  ;;  %v95_v34 = vld [vmem:[#allocation3 + $0x150] sm:$0xff]  ;;  %v65_v36 = vld [vmem:[#allocation3 + $0x60] sm:$0xff] }
  0x30   :  { %2589 = vmatmul.mubr.msk.bf16.vlgmr.msra.gmra.mrb[0].mxu0 %vm165_vm0, %v118_v16  ;;  %2621 = vmatmul.mubr.msk.bf16.vlgmr.msra.gmra.mrb[0].mxu1 %vm165_vm0, %v134_v17  ;;  %v96_v35 = vld [vmem:[#allocation3 + $0x158] sm:$0xff]  ;;  %v66_v37 = vld [vmem:[#allocation3 + $0x68] sm:$0xff]  ;;  %v97_v38 = vld [vmem:[#allocation3 + $0x160] sm:$0xff]  ;;  %v122_v40 = vpack.c.bf16 %v64_v33, %v63_v32 }
  0x31   :  { %2592 = vmatprep.mubr.msk.bf16.mxu0 %vm165_vm0, %v119_v18  ;;  %2624 = vmatprep.mubr.msk.bf16.mxu1 %vm165_vm0, %v135_v19  ;;  %v98_v39 = vld [vmem:[#allocation3 + $0x168] sm:$0xff]  ;;  %v138_v41 = vpack.c.bf16 %v96_v35, %v95_v34  ;;  %v123_v42 = vpack.c.bf16 %v66_v37, %v65_v36  ;;  %v2548_v44 = vld [vmem:[%s5342_s4] ss:$0 sm:$0xff]  ;;  %v67_v45 = vld [vmem:[#allocation3 + $0x70] sm:$0xff]  ;;  %v2750_v35 = vmov 0.0   ;;  %v778_v36 = vlaneseq }
  0x32   :  { %v139_v43 = vpack.c.bf16 %v98_v39, %v97_v38  ;;  %2165 = vrot.lane.b32.xlu0 %v2548_v44, %s2749_s25  ;;  %v68_v46 = vld [vmem:[#allocation3 + $0x78] sm:$0xff]  ;;  %v99_v47 = vld [vmem:[#allocation3 + $0x170] sm:$0xff]  ;;  %v69_v49 = vld [vmem:[#allocation3 + $0x80] sm:$0xff]  ;;  %625 = vst.msk [vmem:[#allocation2 + $0x10] sm:$0xff] %vm622_vm1, %v2750_v35 }
  0x33   :  { %v100_v48 = vld [vmem:[#allocation3 + $0x178] sm:$0xff]  ;;  %v70_v50 = vld [vmem:[#allocation3 + $0x88] sm:$0xff]  ;;  %v101_v51 = vld [vmem:[#allocation3 + $0x180] sm:$0xff]  ;;  %v124_v53 = vpack.c.bf16 %v68_v46, %v67_v45  ;;  %629 = vst.msk [vmem:[#allocation2 + $0x30] sm:$0xff] %vm622_vm1, %v2750_v35  ;;  %v2873_v37 = vshrl.u32 %v778_v36, 7 }
  0x34   :  { %v102_v52 = vld [vmem:[#allocation3 + $0x188] sm:$0xff]  ;;  %v140_v54 = vpack.c.bf16 %v100_v48, %v99_v47  ;;  %v125_v55 = vpack.c.bf16 %v70_v50, %v69_v49  ;;  %v71_v57 = vld [vmem:[#allocation3 + $0x90] sm:$0xff]  ;;  %v72_v58 = vld [vmem:[#allocation3 + $0x98] sm:$0xff]  ;;  %633 = vst.msk [vmem:[#allocation2 + $0x50] sm:$0xff] %vm622_vm1, %v2750_v35 }
  0x35   :  { %v141_v56 = vpack.c.bf16 %v102_v52, %v101_v51  ;;  %v103_v59 = vld [vmem:[#allocation3 + $0x190] sm:$0xff]  ;;  %v104_v60 = vld [vmem:[#allocation3 + $0x198] sm:$0xff]  ;;  %v73_v61 = vld [vmem:[#allocation3 + $0xa0] sm:$0xff]  ;;  %v126_v1 = vpack.c.bf16 %v72_v58, %v71_v57  ;;  %623 = vst.msk [vmem:[#allocation2] sm:$0xff] %vm622_vm1, %v2750_v35  ;;  %v780_v38 = vsub.s32 0, %v2873_v37  ;;  %v913_v39 = vsub.s32 1, %v2873_v37 }
  0x36   :  { %v74_v62 = vld [vmem:[#allocation3 + $0xa8] sm:$0xff]  ;;  %v105_v63 = vld [vmem:[#allocation3 + $0x1a0] sm:$0xff]  ;;  %v142_v2 = vpack.c.bf16 %v104_v60, %v103_v59  ;;  %v75_v5 = vld [vmem:[#allocation3 + $0xb0] sm:$0xff]  ;;  %624 = vst.msk [vmem:[#allocation2 + $0x8] sm:$0xff] %vm622_vm1, %v2750_v35 }
  0x37   :  { %v106_v0 = vld [vmem:[#allocation3 + $0x1a8] sm:$0xff]  ;;  %v127_v3 = vpack.c.bf16 %v74_v62, %v73_v61  ;;  %v76_v6 = vld [vmem:[#allocation3 + $0xb8] sm:$0xff]  ;;  %v107_v7 = vld [vmem:[#allocation3 + $0x1b0] sm:$0xff]  ;;  %626 = vst.msk [vmem:[#allocation2 + $0x18] sm:$0xff] %vm622_vm1, %v2750_v35 }
  0x38   :  { %2593 = vmatmul.mubr.msk.bf16.gmra.mrb[4].mxu0 %vm165_vm0, %v120_v28  ;;  %2625 = vmatmul.mubr.msk.bf16.gmra.mrb[4].mxu1 %vm165_vm0, %v136_v29  ;;  %v143_v4 = vpack.c.bf16 %v106_v0, %v105_v63  ;;  %v108_v8 = vld [vmem:[#allocation3 + $0x1b8] sm:$0xff]  ;;  %v77_v9 = vld [vmem:[#allocation3 + $0xc0] sm:$0xff]  ;;  %v78_v10 = vld [vmem:[#allocation3 + $0xc8] sm:$0xff]  ;;  %v128_v13 = vpack.c.bf16 %v76_v6, %v75_v5  ;;  %627 = vst.msk [vmem:[#allocation2 + $0x20] sm:$0xff] %vm622_vm1, %v2750_v35 }
  0x39   :  { %2596 = vmatprep.mubr.msk.bf16.mxu0 %vm165_vm0, %v121_v30  ;;  %2628 = vmatprep.mubr.msk.bf16.mxu1 %vm165_vm0, %v137_v31  ;;  %v109_v11 = vld [vmem:[#allocation3 + $0x1c0] sm:$0xff]  ;;  %v110_v12 = vld [vmem:[#allocation3 + $0x1c8] sm:$0xff]  ;;  %v144_v14 = vpack.c.bf16 %v108_v8, %v107_v7  ;;  %v129_v15 = vpack.c.bf16 %v78_v10, %v77_v9  ;;  %v79_v17 = vld [vmem:[#allocation3 + $0xd0] sm:$0xff]  ;;  %628 = vst.msk [vmem:[#allocation2 + $0x28] sm:$0xff] %vm622_vm1, %v2750_v35  ;;  %v1897_v7 = vsub.s32 6, %v2873_v37 }
  0x3a   :  { %v145_v16 = vpack.c.bf16 %v110_v12, %v109_v11  ;;  %v80_v18 = vld [vmem:[#allocation3 + $0xd8] sm:$0xff]  ;;  %v111_v19 = vld [vmem:[#allocation3 + $0x1d0] sm:$0xff]  ;;  %v81_v21 = vld [vmem:[#allocation3 + $0xe0] sm:$0xff]  ;;  %630 = vst.msk [vmem:[#allocation2 + $0x38] sm:$0xff] %vm622_vm1, %v2750_v35 }
  0x3b   :  { %v112_v20 = vld [vmem:[#allocation3 + $0x1d8] sm:$0xff]  ;;  %v82_v22 = vld [vmem:[#allocation3 + $0xe8] sm:$0xff]  ;;  %v113_v23 = vld [vmem:[#allocation3 + $0x1e0] sm:$0xff]  ;;  %v130_v25 = vpack.c.bf16 %v80_v18, %v79_v17  ;;  %631 = vst.msk [vmem:[#allocation2 + $0x40] sm:$0xff] %vm622_vm1, %v2750_v35 }
  0x3c   :  { %v114_v24 = vld [vmem:[#allocation3 + $0x1e8] sm:$0xff]  ;;  %v146_v26 = vpack.c.bf16 %v112_v20, %v111_v19  ;;  %v131_v27 = vpack.c.bf16 %v82_v22, %v81_v21  ;;  %v83_v29 = vld [vmem:[#allocation3 + $0xf0] sm:$0xff]  ;;  %v84_v30 = vld [vmem:[#allocation3 + $0xf8] sm:$0xff]  ;;  %632 = vst.msk [vmem:[#allocation2 + $0x48] sm:$0xff] %vm622_vm1, %v2750_v35  ;;  %v1503_v20 = vsub.s32 4, %v2873_v37 }
  0x3d   :  { %v147_v28 = vpack.c.bf16 %v114_v24, %v113_v23  ;;  %v115_v31 = vld [vmem:[#allocation3 + $0x1f0] sm:$0xff]  ;;  %v116_v32 = vld [vmem:[#allocation3 + $0x1f8] sm:$0xff]  ;;  %v132_v33 = vpack.c.bf16 %v84_v30, %v83_v29  ;;  %634 = vst.msk [vmem:[#allocation2 + $0x58] sm:$0xff] %vm622_vm1, %v2750_v35  ;;  %636 = vst.msk [vmem:[#allocation2 + $0x260] sm:$0xff] %vm622_vm1, %v2750_v35 }
  0x3e   :  { %v148_v34 = vpack.c.bf16 %v116_v32, %v115_v31  ;;  %637 = vst.msk [vmem:[#allocation2 + $0x268] sm:$0xff] %vm622_vm1, %v2750_v35  ;;  %638 = vst.msk [vmem:[#allocation2 + $0x270] sm:$0xff] %vm622_vm1, %v2750_v35  ;;  %v716_v44 = vld [vmem:[#allocation2 + $0x10] sm:$0xff]  ;;  %v714_v46 = vld [vmem:[#allocation2] sm:$0xff] }
  0x3f   :  { %639 = vst.msk [vmem:[#allocation2 + $0x278] sm:$0xff] %vm622_vm1, %v2750_v35  ;;  %640 = vst.msk [vmem:[#allocation2 + $0x280] sm:$0xff] %vm622_vm1, %v2750_v35  ;;  %v849_v45 = vld [vmem:[#allocation2 + $0x30] sm:$0xff]  ;;  %v847_v47 = vld [vmem:[#allocation2 + $0x20] sm:$0xff] }
  0x40   :  { %2597 = vmatmul.mubr.msk.bf16.gmra.mrb[8].mxu0 %vm165_vm0, %v122_v40  ;;  %2629 = vmatmul.mubr.msk.bf16.gmra.mrb[8].mxu1 %vm165_vm0, %v138_v41  ;;  %641 = vst.msk [vmem:[#allocation2 + $0x288] sm:$0xff] %vm622_vm1, %v2750_v35  ;;  %642 = vst.msk [vmem:[#allocation2 + $0x290] sm:$0xff] %vm622_vm1, %v2750_v35  ;;  %v2880_v40 = vld [vmem:[%s5341_s3] sm:$0x7f]  ;;  %v717_v48 = vld [vmem:[#allocation2 + $0x18] sm:$0xff] }
  0x41   :  { %2600 = vmatprep.mubr.msk.bf16.mxu0 %vm165_vm0, %v123_v42  ;;  %2632 = vmatprep.mubr.msk.bf16.mxu1 %vm165_vm0, %v139_v43  ;;  %643 = vst.msk [vmem:[#allocation2 + $0x298] sm:$0xff] %vm622_vm1, %v2750_v35  ;;  %644 = vst.msk [vmem:[#allocation2 + $0x2a0] sm:$0xff] %vm622_vm1, %v2750_v35  ;;  %v2883_v41 = vrot.slane %v2880_v40, %v780_v38  ;;  %v2886_v42 = vrot.slane %v2880_v40, %v913_v39  ;;  %v1110_v43 = vsub.s32 2, %v2873_v37  ;;  %v850_v49 = vld [vmem:[#allocation2 + $0x38] sm:$0xff]  ;;  %v715_v50 = vld [vmem:[#allocation2 + $0x8] sm:$0xff] }
  0x42   :  { %645 = vst.msk [vmem:[#allocation2 + $0x2a8] sm:$0xff] %vm622_vm1, %v2750_v35  ;;  %646 = vst.msk [vmem:[#allocation2 + $0x2b0] sm:$0xff] %vm622_vm1, %v2750_v35  ;;  %v848_v51 = vld [vmem:[#allocation2 + $0x28] sm:$0xff]  ;;  %v2900_v60 = vld [vmem:[#allocation2 + $0x40] sm:$0xff]  ;;  %v1700_v38 = vsub.s32 5, %v2873_v37 }
  0x43   :  { %647 = vst.msk [vmem:[#allocation2 + $0x2b8] sm:$0xff] %vm622_vm1, %v2750_v35  ;;  %v784_v52 = vmul.f32 %v2883_v41, %v716_v44  ;;  %v915_v57 = vmul.f32 %v2886_v42, %v847_v47  ;;  %v785_v58 = vmul.f32 %v2883_v41, %v717_v48  ;;  %v918_v59 = vmul.f32 %v2886_v42, %v850_v49  ;;  %v2906_v0 = vld [vmem:[#allocation2 + $0x48] sm:$0xff] }
  0x44   :  { %v783_v61 = vmul.f32 %v2883_v41, %v715_v50  ;;  %v916_v62 = vmul.f32 %v2886_v42, %v848_v51  ;;  %v2904_v63 = vld [vmem:[#allocation2 + $0x58] sm:$0xff]  ;;  %v789_v31 = vmul.f32 %v850_v49, %v2883_v41  ;;  %v787_v35 = vmul.f32 %v848_v51, %v2883_v41 }
  0x45   :  { %v982_v8 = vadd.f32 %v918_v59, %v785_v58  ;;  %v922_v32 = vmul.f32 %v2904_v63, %v2886_v42  ;;  %v920_v36 = vmul.f32 %v2906_v0, %v2886_v42  ;;  %v2984_v49 = vrot.slane %v2880_v40, %v1503_v20 }
  0x46   :  { %v980_v12 = vadd.f32 %v916_v62, %v783_v61  ;;  %v3003_v62 = vrot.slane %v2880_v40, %v1700_v38 }
  0x48   :  { %2601 = vmatmul.mubr.msk.bf16.gmra.mrb[12].mxu0 %vm165_vm0, %v124_v53  ;;  %2633 = vmatmul.mubr.msk.bf16.gmra.mrb[12].mxu1 %vm165_vm0, %v140_v54  ;;  %v917_v53 = vmul.f32 %v2886_v42, %v849_v45  ;;  %v2892_v54 = vrot.slane %v2880_v40, %v1110_v43 }
  0x49   :  { %2604 = vmatprep.mubr.msk.bf16.mxu0 %vm165_vm0, %v125_v55  ;;  %2636 = vmatprep.mubr.msk.bf16.mxu1 %vm165_vm0, %v141_v56  ;;  %v2894_v55 = vld [vmem:[#allocation2 + $0x50] sm:$0xff]  ;;  %v782_v56 = vmul.f32 %v2883_v41, %v714_v46 }
  0x4a   :  { %v1112_v6 = vmul.f32 %v2892_v54, %v2900_v60  ;;  %v1115_v11 = vmul.f32 %v2892_v54, %v2904_v63  ;;  %v921_v19 = vmul.f32 %v2894_v55, %v2886_v42 }
  0x4b   :  { %v979_v5 = vadd.f32 %v915_v57, %v782_v56  ;;  %v2994_v56 = vmul.f32 %v2894_v55, %v2883_v41 }
  0x4c   :  { %v1179_v46 = vadd.f32 %v1115_v11, %v982_v8 }
  0x4d   :  { %v1176_v44 = vadd.f32 %v1112_v6, %v979_v5 }
  0x50   :  { %2605 = vmatmul.mubr.msk.bf16.gmra.mrb[16].mxu0 %vm165_vm0, %v126_v1  ;;  %2637 = vmatmul.mubr.msk.bf16.gmra.mrb[16].mxu1 %vm165_vm0, %v142_v2  ;;  %v2911_v1 = vld [vmem:[%s5340_s2] ss:$0 sm:$0xff]  ;;  %v981_v2 = vadd.f32 %v917_v53, %v784_v52  ;;  %v2988_v52 = vadd.f32 %v922_v32, %v789_v31  ;;  %v2990_v53 = vadd.f32 %v920_v36, %v787_v35 }
  0x51   :  { %2608 = vmatprep.mubr.msk.bf16.mxu0 %vm165_vm0, %v127_v3  ;;  %2640 = vmatprep.mubr.msk.bf16.mxu1 %vm165_vm0, %v143_v4  ;;  %v1114_v3 = vmul.f32 %v2892_v54, %v2894_v55  ;;  %v1306_v4 = vsub.s32 3, %v2873_v37 }
  0x53   :  { %v1178_v39 = vadd.f32 %v1114_v3, %v981_v2  ;;  %v2974_v43 = vrot.slane %v2880_v40, %v1306_v4  ;;  %v3007_v2 = vmul.f32 %v2900_v60, %v2883_v41 }
  0x58   :  { %2609 = vmatmul.mubr.msk.bf16.gmra.mrb[20].mxu0 %vm165_vm0, %v128_v13  ;;  %2641 = vmatmul.mubr.msk.bf16.gmra.mrb[20].mxu1 %vm165_vm0, %v144_v14  ;;  %v1113_v13 = vmul.f32 %v2892_v54, %v2906_v0  ;;  %v788_v14 = vmul.f32 %v849_v45, %v2883_v41  ;;  %v2977_v45 = vrot.slane %v2880_v40, %v1897_v7 }
  0x59   :  { %2612 = vmatprep.mubr.msk.bf16.mxu0 %vm165_vm0, %v129_v15  ;;  %2644 = vmatprep.mubr.msk.bf16.mxu1 %vm165_vm0, %v145_v16  ;;  %v3023_v40 = vmul.f32 %v2904_v63, %v2883_v41 }
  0x5a   :  { %v985_v48 = vadd.f32 %v921_v19, %v788_v14 }
  0x60   :  { %2613 = vmatmul.mubr.msk.bf16.gmra.mrb[24].mxu0 %vm165_vm0, %v130_v25  ;;  %2645 = vmatmul.mubr.msk.bf16.gmra.mrb[24].mxu1 %vm165_vm0, %v146_v26  ;;  %v786_v25 = vmul.f32 %v847_v47, %v2883_v41  ;;  %v919_v26 = vmul.f32 %v2900_v60, %v2886_v42  ;;  %v1177_v47 = vadd.f32 %v1113_v13, %v980_v12 }
  0x61   :  { %2616 = vmatprep.mubr.msk.bf16.mxu0 %vm165_vm0, %v131_v27  ;;  %2648 = vmatprep.mubr.msk.bf16.mxu1 %vm165_vm0, %v147_v28  ;;  %v3027_v60 = vmul.f32 %v2906_v0, %v2883_v41 }
  0x62   :  { %v2986_v51 = vadd.f32 %v919_v26, %v786_v25 }
  0x68   :  { %2617 = vmatmul.mubr.msk.bf16.gmra.mrb[28].mxu0 %vm165_vm0, %v132_v33  ;;  %2649 = vmatmul.mubr.msk.bf16.gmra.mrb[28].mxu1 %vm165_vm0, %v148_v34 }
 0x103   :  { %v2590_v9 = vpop.f32.mrb[0].mxu0  ;;  %v2622_v10 = vpop.f32.mrb[0].mxu1 }
 0x104   :  { %v2925_v15 = vadd.f32 %v2590_v9, %v2911_v1  ;;  %v296_v16 = vpop.f32.mrb[1].mxu0  ;;  %v2928_v17 = vadd.f32 %v2622_v10, %v2911_v1  ;;  %v424_v18 = vpop.f32.mrb[1].mxu1 }
 0x105   :  { %v2934_v21 = vadd.f32 %v2911_v1, %v296_v16  ;;  %v2591_v22 = vpop.f32.mrb[2].mxu0  ;;  %v2937_v23 = vadd.f32 %v2911_v1, %v424_v18  ;;  %v2623_v24 = vpop.f32.mrb[2].mxu1 }
 0x106   :  { %5383 = vst [vmem:[#allocation12_spill] sm:$0xff] %v2928_v17  ;;  %651 = vst.msk [vmem:[#allocation2 + $0x70] sm:$0xff] %vm622_vm1, %v2925_v15  ;;  %v2947_v27 = vadd.f32 %v2591_v22, %v2911_v1  ;;  %v299_v28 = vpop.f32.mrb[3].mxu0  ;;  %v2950_v29 = vadd.f32 %v2623_v24, %v2911_v1  ;;  %v427_v30 = vpop.f32.mrb[3].mxu1 }
 0x107   :  { %5384 = vst [vmem:[#allocation13_spill] sm:$0xff] %v2937_v23  ;;  %683 = vst.msk [vmem:[#allocation2 + $0x170] sm:$0xff] %vm622_vm1, %v2928_v17  ;;  %v2960_v33 = vadd.f32 %v2911_v1, %v299_v28  ;;  %v2963_v34 = vadd.f32 %v2911_v1, %v427_v30 }
 0x108   :  { %5385 = vst [vmem:[#allocation14_spill] sm:$0xff] %v2947_v27  ;;  %5386 = vst [vmem:[#allocation15_spill] sm:$0xff] %v2950_v29 }
 0x109   :  { %649 = vst.msk [vmem:[#allocation2 + $0x60] sm:$0xff] %vm622_vm1, %v2934_v21  ;;  %681 = vst.msk [vmem:[#allocation2 + $0x160] sm:$0xff] %vm622_vm1, %v2937_v23 }
 0x10a   :  { %5387 = vst [vmem:[#allocation16_spill] sm:$0xff] %v2960_v33  ;;  %5388 = vst [vmem:[#allocation17_spill] sm:$0xff] %v2963_v34 }
 0x10b   :  { %652 = vst.msk [vmem:[#allocation2 + $0x78] sm:$0xff] %vm622_vm1, %v2947_v27  ;;  %684 = vst.msk [vmem:[#allocation2 + $0x178] sm:$0xff] %vm622_vm1, %v2950_v29  ;;  %v2594_v37 = vpop.f32.mrb[4].mxu0  ;;  %v2626_v50 = vpop.f32.mrb[4].mxu1 }
 0x10c   :  { %650 = vst.msk [vmem:[#allocation2 + $0x68] sm:$0xff] %vm622_vm1, %v2960_v33  ;;  %682 = vst.msk [vmem:[#allocation2 + $0x168] sm:$0xff] %vm622_vm1, %v2963_v34  ;;  %v2997_v57 = vadd.f32 %v2594_v37, %v2911_v1  ;;  %v3000_v58 = vadd.f32 %v2626_v50, %v2911_v1  ;;  %v312_v59 = vpop.f32.mrb[5].mxu0  ;;  %v440_v61 = vpop.f32.mrb[5].mxu1 }
 0x10d   :  { %v3009_v3 = vld [vmem:[#allocation2 + $0x70] sm:$0xff]  ;;  %v3014_v55 = vadd.f32 %v2911_v1, %v312_v59  ;;  %v3017_v5 = vadd.f32 %v2911_v1, %v440_v61  ;;  %v2595_v6 = vpop.f32.mrb[6].mxu0  ;;  %v3019_v7 = vpop.f32.mrb[6].mxu1 }
 0x10e   :  { %5389 = vst [vmem:[#allocation18_spill] sm:$0xff] %v3000_v58  ;;  %v3011_v4 = vld [vmem:[#allocation2 + $0x170] sm:$0xff]  ;;  %v1310_v8 = vmul.f32 %v2974_v43, %v3009_v3  ;;  %655 = vst.msk [vmem:[#allocation2 + $0x90] sm:$0xff] %vm622_vm1, %v2997_v57  ;;  %v3051_v0 = vpop.f32.mrb[7].mxu0  ;;  %v3053_v13 = vpop.f32.mrb[7].mxu1  ;;  %v1118_v50 = vmul.f32 %v3009_v3, %v2892_v54 }
 0x10f   :  { %5390 = vst [vmem:[#allocation19_spill] sm:$0xff] %v3011_v4  ;;  %5391 = vst [vmem:[#allocation20_spill] sm:$0xff] %v3017_v5  ;;  %v3035_v10 = vmul.f32 %v2886_v42, %v3011_v4  ;;  %v3039_v11 = vmul.f32 %v2974_v43, %v3011_v4  ;;  %v3043_v63 = vmul.f32 %v2977_v45, %v3011_v4 }
 0x110   :  { %v3031_v9 = vld [vmem:[#allocation2 + $0x60] sm:$0xff]  ;;  %687 = vst.msk [vmem:[#allocation2 + $0x190] sm:$0xff] %vm622_vm1, %v3000_v58  ;;  %653 = vst.msk [vmem:[#allocation2 + $0x80] sm:$0xff] %vm622_vm1, %v3014_v55  ;;  %v1374_v24 = vadd.f32 %v1310_v8, %v1178_v39  ;;  %v3121_v8 = vmul.f32 %v2892_v54, %v3011_v4 }
 0x111   :  { %5392 = vst [vmem:[#allocation21_spill] sm:$0xff] %v3035_v10  ;;  %5393 = vst [vmem:[#allocation22_spill] sm:$0xff] %v3039_v11  ;;  %v3045_v12 = vld [vmem:[#allocation2 + $0x160] sm:$0xff]  ;;  %v1308_v14 = vmul.f32 %v2974_v43, %v3031_v9 }
 0x112   :  { %5394 = vst [vmem:[#allocation23_spill] sm:$0xff] %v3043_v63  ;;  %5395 = vst [vmem:[#allocation24_spill] sm:$0xff] %v3045_v12  ;;  %v3057_v16 = vld [vmem:[#allocation2 + $0x78] sm:$0xff]  ;;  %v3061_v18 = vmul.f32 %v2886_v42, %v3045_v12  ;;  %v3065_v19 = vmul.f32 %v2974_v43, %v3045_v12  ;;  %v3069_v20 = vmul.f32 %v2977_v45, %v3045_v12 }
 0x113   :  { %5396 = vst [vmem:[#allocation25_spill] sm:$0xff] %v3057_v16  ;;  %v3071_v22 = vld [vmem:[#allocation2 + $0x178] sm:$0xff]  ;;  %685 = vst.msk [vmem:[#allocation2 + $0x180] sm:$0xff] %vm622_vm1, %v3017_v5  ;;  %v1311_v25 = vmul.f32 %v2974_v43, %v3057_v16  ;;  %v3079_v26 = vld [vmem:[#allocation2 + $0x68] sm:$0xff]  ;;  %v1372_v32 = vadd.f32 %v1308_v14, %v1176_v44  ;;  %v2598_v14 = vpop.f32.mrb[8].mxu0 }
 0x114   :  { %5397 = vst [vmem:[#allocation26_spill] sm:$0xff] %v3061_v18  ;;  %5398 = vst [vmem:[#allocation27_spill] sm:$0xff] %v3065_v19  ;;  %v3083_v28 = vmul.f32 %v2886_v42, %v3071_v22  ;;  %v3087_v30 = vmul.f32 %v2974_v43, %v3071_v22  ;;  %v3089_v31 = vld [vmem:[#allocation2 + $0x168] sm:$0xff]  ;;  %v1309_v35 = vmul.f32 %v2974_v43, %v3079_v26  ;;  %v328_v61 = vpop.f32.mrb[9].mxu0 }
 0x115   :  { %5399 = vst [vmem:[#allocation28_spill] sm:$0xff] %v3069_v20  ;;  %5400 = vst [vmem:[#allocation29_spill] sm:$0xff] %v3071_v22  ;;  %v3095_v36 = vmul.f32 %v2977_v45, %v3071_v22  ;;  %v3099_v38 = vmul.f32 %v2886_v42, %v3089_v31  ;;  %v3101_v39 = vadd.f32 %v1311_v25, %v1179_v46  ;;  %v3123_v25 = vpop.f32.mrb[8].mxu1  ;;  %v3133_v46 = vld [vmem:[#allocation2 + $0x90] sm:$0xff] }
 0x116   :  { %5401 = vst [vmem:[#allocation30_spill] sm:$0xff] %v3079_v26  ;;  %5402 = vst [vmem:[#allocation31_spill] sm:$0xff] %v3083_v28  ;;  %v3105_v37 = vmul.f32 %v2974_v43, %v3089_v31  ;;  %v3109_v44 = vmul.f32 %v2977_v45, %v3089_v31  ;;  %v3113_v59 = vadd.f32 %v1309_v35, %v1177_v47  ;;  %v3148_v35 = vpop.f32.mrb[10].mxu0 }
 0x117   :  { %5403 = vst [vmem:[#allocation32_spill] sm:$0xff] %v3087_v30  ;;  %5404 = vst [vmem:[#allocation33_spill] sm:$0xff] %v3089_v31  ;;  %v1116_v47 = vmul.f32 %v3031_v9, %v2892_v54  ;;  %v3135_v34 = vld [vmem:[#allocation2 + $0x190] sm:$0xff]  ;;  %v1314_v28 = vmul.f32 %v2974_v43, %v3133_v46  ;;  %v3168_v19 = vpop.f32.mrb[11].mxu0 }
 0x118   :  { %5405 = vst [vmem:[#allocation34_spill] sm:$0xff] %v3095_v36  ;;  %5406 = vst [vmem:[#allocation35_spill] sm:$0xff] %v3099_v38  ;;  %v3131_v38 = vpop.f32.mrb[9].mxu1  ;;  %v1507_v36 = vmul.f32 %v2984_v49, %v3133_v46  ;;  %v3158_v29 = vmul.f32 %v2974_v43, %v3135_v34 }
 0x119   :  { %5407 = vst [vmem:[#allocation36_spill] sm:$0xff] %v3105_v37  ;;  %5408 = vst [vmem:[#allocation37_spill] sm:$0xff] %v3109_v44  ;;  %v1182_v37 = vadd.f32 %v1118_v50, %v985_v48  ;;  %v3141_v48 = vmul.f32 %v2892_v54, %v3045_v12  ;;  %v3146_v44 = vadd.f32 %v2595_v6, %v2911_v1  ;;  %v3150_v30 = vpop.f32.mrb[10].mxu1  ;;  %v3164_v6 = vld [vmem:[#allocation2 + $0x80] sm:$0xff] }
 0x11a   :  { %5409 = vst [vmem:[#allocation38_spill] sm:$0xff] %v3121_v8  ;;  %5410 = vst [vmem:[#allocation39_spill] sm:$0xff] %v3135_v34  ;;  %v3162_v50 = vmul.f32 %v2984_v49, %v3135_v34  ;;  %v3166_v20 = vld [vmem:[#allocation2 + $0x180] sm:$0xff]  ;;  %v1180_v23 = vadd.f32 %v1116_v47, %v2986_v51  ;;  %v1312_v18 = vmul.f32 %v2974_v43, %v3164_v6 }
 0x11b   :  { %5411 = vst [vmem:[#allocation40_spill] sm:$0xff] %v3141_v48  ;;  %5412 = vst [vmem:[#allocation41_spill] sm:$0xff] %v3146_v44  ;;  %v3170_v48 = vpop.f32.mrb[11].mxu1  ;;  %v1505_v5 = vmul.f32 %v2984_v49, %v3164_v6  ;;  %v3179_v17 = vmul.f32 %v2974_v43, %v3166_v20  ;;  %v3189_v51 = vmul.f32 %v2984_v49, %v3166_v20 }
 0x11c   :  { %5413 = vst [vmem:[#allocation42_spill] sm:$0xff] %v3158_v29  ;;  %5414 = vst [vmem:[#allocation43_spill] sm:$0xff] %v3162_v50  ;;  %v3183_v50 = vadd.f32 %v1314_v28, %v1182_v37  ;;  %v3185_v29 = vadd.f32 %v1507_v36, %v1374_v24  ;;  %v1119_v47 = vmul.f32 %v3057_v16, %v2892_v54 }
 0x11d   :  { %5415 = vst [vmem:[#allocation44_spill] sm:$0xff] %v3179_v17  ;;  %656 = vst.msk [vmem:[#allocation2 + $0x98] sm:$0xff] %vm622_vm1, %v3146_v44  ;;  %v3193_v63 = vadd.f32 %v1312_v18, %v1180_v23  ;;  %v3195_v11 = vadd.f32 %v1505_v5, %v1372_v32  ;;  %v3204_v36 = vadd.f32 %v3019_v7, %v2911_v1  ;;  %v3214_v5 = vpop.permute.xlu0 %2165  ;;  %v3229_v17 = vpop.f32.mrb[12].mxu1 }
 0x11e   :  { %5416 = vst [vmem:[#allocation45_spill] sm:$0xff] %v3189_v51  ;;  %v1183_v24 = vadd.f32 %v1119_v47, %v2988_v52  ;;  %v3208_v37 = vmul.f32 %v2892_v54, %v3071_v22  ;;  %v3212_v23 = vadd.f32 %v2911_v1, %v3051_v0  ;;  %v1117_v18 = vmul.f32 %v3079_v26, %v2892_v54  ;;  %v3227_v47 = vpop.f32.mrb[12].mxu0 }
 0x11f   :  { %5417 = vst [vmem:[#allocation46_spill] sm:$0xff] %v3204_v36  ;;  %v3220_v52 = vadd.f32 %v2911_v1, %v3053_v13  ;;  %v3224_v7 = vmul.f32 %v2892_v54, %v3089_v31  ;;  %v568_v32 = vadd.f32 %v2598_v14, %v2911_v1  ;;  %688 = vst.msk [vmem:[#allocation2 + $0x198] sm:$0xff] %vm622_vm1, %v3204_v36 }
 0x120   :  { %5418 = vst [vmem:[#allocation47_spill] sm:$0xff] %v3208_v37  ;;  %5419 = vst [vmem:[#allocation48_spill] sm:$0xff] %v3212_v23  ;;  %v925_v14 = vmul.f32 %v3009_v3, %v2886_v42  ;;  %v3245_v37 = vpop.f32.mrb[13].mxu1  ;;  %v1181_v51 = vadd.f32 %v1117_v18, %v2990_v53  ;;  %v1122_v13 = vmul.f32 %v3133_v46, %v2892_v54 }
 0x121   :  { %5420 = vst [vmem:[#allocation49_spill] sm:$0xff] %v3220_v52  ;;  %5421 = vst [vmem:[#allocation50_spill] sm:$0xff] %v3224_v7  ;;  %v3243_v7 = vpop.f32.mrb[13].mxu0  ;;  %v2037_v28 = vmax.f32 %v568_v32, %v3133_v46  ;;  %v3258_v8 = vpop.f32.mrb[14].mxu1  ;;  %v600_v18 = vadd.f32 %v3123_v25, %v2911_v1  ;;  %v3267_v0 = vmul.f32 %v3135_v34, %v2892_v54 }
 0x122   :  { %654 = vst.msk [vmem:[#allocation2 + $0x88] sm:$0xff] %vm622_vm1, %v3212_v23  ;;  %686 = vst.msk [vmem:[#allocation2 + $0x188] sm:$0xff] %vm622_vm1, %v3220_v52  ;;  %v3256_v36 = vpop.f32.mrb[14].mxu0  ;;  %v989_v53 = vadd.f32 %v925_v14, %v2994_v56  ;;  %v566_v52 = vadd.f32 %v2911_v1, %v328_v61  ;;  %v923_v25 = vmul.f32 %v3031_v9, %v2886_v42 }
 0x123   :  { %659 = vst.msk [vmem:[#allocation2 + $0xb0] sm:$0xff] %vm622_vm1, %v568_v32  ;;  %5422 = vst [vmem:[#allocation51_spill] sm:$0xff] %v3258_v8  ;;  %v3270_v58 = vpop.f32.mrb[15].mxu0  ;;  %v3272_v32 = vpop.f32.mrb[15].mxu1  ;;  %v3279_v56 = vmul.f32 %v3214_v5, %v2037_v28  ;;  %v2069_v61 = vmax.f32 %v600_v18, %v3135_v34 }
 0x124   :  { %v3260_v10 = vld [vmem:[#allocation2 + $0x98] sm:$0xff]  ;;  %5423 = vst [vmem:[#allocation52_spill] sm:$0xff] %v3267_v0  ;;  %5424 = vst [vmem:[#allocation53_spill] sm:$0xff] %v3270_v58  ;;  %v1186_v14 = vadd.f32 %v1122_v13, %v989_v53  ;;  %v1120_v0 = vmul.f32 %v3164_v6, %v2892_v54  ;;  %v598_v13 = vadd.f32 %v2911_v1, %v3131_v38 }
 0x125   :  { %5425 = vst [vmem:[#allocation54_spill] sm:$0xff] %v3272_v32  ;;  %v1315_v31 = vmul.f32 %v2974_v43, %v3260_v10  ;;  %v1508_v23 = vmul.f32 %v2984_v49, %v3260_v10  ;;  %5426 = vst [vmem:[#allocation55_spill] sm:$0xff] %v3279_v56  ;;  %v2035_v32 = vmax.f32 %v566_v52, %v3164_v6 }
 0x126   :  { %691 = vst.msk [vmem:[#allocation2 + $0x1b0] sm:$0xff] %vm622_vm1, %v600_v18  ;;  %657 = vst.msk [vmem:[#allocation2 + $0xa0] sm:$0xff] %vm622_vm1, %v566_v52  ;;  %v987_v56 = vadd.f32 %v923_v25, %v3007_v2  ;;  %v3298_v53 = vmul.f32 %v3214_v5, %v2069_v61  ;;  %v3305_v58 = vmul.f32 %v3166_v20, %v2892_v54  ;;  %v3321_v25 = vpop.f32.mrb[16].mxu1 }
 0x127   :  { %v3289_v33 = vadd.f32 %v1315_v31, %v1183_v24  ;;  %v3292_v28 = vadd.f32 %v1508_v23, %v3101_v39  ;;  %v3301_v18 = vmul.f32 %v3214_v5, %v2035_v32  ;;  %v569_v31 = vadd.f32 %v3148_v35, %v2911_v1  ;;  %v3309_v39 = vld [vmem:[#allocation2 + $0x198] sm:$0xff]  ;;  %689 = vst.msk [vmem:[#allocation2 + $0x1a0] sm:$0xff] %vm622_vm1, %v598_v13  ;;  %v3319_v32 = vpop.f32.mrb[16].mxu0 }
 0x128   :  { %5427 = vst [vmem:[#allocation56_spill] sm:$0xff] %v3298_v53  ;;  %5429 = vst [vmem:[#allocation58_spill] sm:$0xff] %v3305_v58  ;;  %v1184_v2 = vadd.f32 %v1120_v0, %v987_v56  ;;  %v2067_v38 = vmax.f32 %v598_v13, %v3166_v20  ;;  %v926_v23 = vmul.f32 %v3057_v16, %v2886_v42  ;;  %v3340_v53 = vpop.f32.mrb[17].mxu0 }
 0x129   :  { %5428 = vst [vmem:[#allocation57_spill] sm:$0xff] %v3301_v18  ;;  %v3311_v24 = vld [vmem:[#allocation2 + $0x88] sm:$0xff]  ;;  %v1123_v52 = vmul.f32 %v3260_v10, %v2892_v54  ;;  %5430 = vst [vmem:[#allocation59_spill] sm:$0xff] %v3319_v32  ;;  %v3325_v35 = vmul.f32 %v2974_v43, %v3309_v39  ;;  %v3329_v0 = vmul.f32 %v2984_v49, %v3309_v39  ;;  %v3342_v18 = vpop.f32.mrb[17].mxu1  ;;  %v3356_v22 = vpop.f32.mrb[18].mxu0 }
 0x12a   :  { %5431 = vst [vmem:[#allocation60_spill] sm:$0xff] %v3321_v25  ;;  %v1313_v56 = vmul.f32 %v2974_v43, %v3311_v24  ;;  %v1506_v61 = vmul.f32 %v2984_v49, %v3311_v24  ;;  %v3335_v13 = vld [vmem:[#allocation2 + $0x188] sm:$0xff]  ;;  %v3337_v58 = vld [vmem:[#allocation2 + $0xb0] sm:$0xff]  ;;  %660 = vst.msk [vmem:[#allocation2 + $0xb8] sm:$0xff] %vm622_vm1, %v569_v31  ;;  %v3358_v8 = vpop.f32.mrb[18].mxu1  ;;  %v3370_v44 = vpop.f32.mrb[19].mxu0 }
 0x12b   :  { %5432 = vst [vmem:[#allocation61_spill] sm:$0xff] %v3325_v35  ;;  %5433 = vst [vmem:[#allocation62_spill] sm:$0xff] %v3329_v0  ;;  %v3346_v35 = vmul.f32 %v2974_v43, %v3335_v13  ;;  %v3350_v0 = vmul.f32 %v2984_v49, %v3335_v13  ;;  %v1318_v25 = vmul.f32 %v2974_v43, %v3337_v58  ;;  %v3372_v27 = vpop.f32.mrb[19].mxu1 }
 0x12c   :  { %5434 = vst [vmem:[#allocation63_spill] sm:$0xff] %v3340_v53  ;;  %5435 = vst [vmem:[#allocation64_spill] sm:$0xff] %v3342_v18  ;;  %v1511_v32 = vmul.f32 %v2984_v49, %v3337_v58  ;;  %v3360_v53 = vadd.f32 %v1313_v56, %v1181_v51  ;;  %v3363_v18 = vadd.f32 %v1506_v61, %v3113_v59 }
 0x12d   :  { %5436 = vst [vmem:[#allocation65_spill] sm:$0xff] %v3346_v35  ;;  %5437 = vst [vmem:[#allocation66_spill] sm:$0xff] %v3350_v0  ;;  %v1704_v35 = vmul.f32 %v3003_v62, %v3337_v58  ;;  %v3368_v0 = vmul.f32 %v3214_v5, %v2067_v38  ;;  %v3374_v16 = vadd.f32 %v1318_v25, %v1186_v14  ;;  %v3379_v51 = vld [vmem:[#allocation2 + $0x1b0] sm:$0xff]  ;;  %v3381_v56 = vld [vmem:[#allocation2 + $0xa0] sm:$0xff] }
 0x12e   :  { %5438 = vst [vmem:[#allocation67_spill] sm:$0xff] %v3356_v22  ;;  %5439 = vst [vmem:[#allocation68_spill] sm:$0xff] %v3358_v8  ;;  %v3377_v22 = vadd.f32 %v1511_v32, %v3183_v50  ;;  %v990_v59 = vadd.f32 %v926_v23, %v3023_v40  ;;  %v2038_v61 = vmax.f32 %v569_v31, %v3260_v10  ;;  %v3406_v32 = vld [vmem:[#allocation2 + $0x1a0] sm:$0xff] }
 0x12f   :  { %5440 = vst [vmem:[#allocation69_spill] sm:$0xff] %v3368_v0  ;;  %5441 = vst [vmem:[#allocation70_spill] sm:$0xff] %v3370_v44  ;;  %v3386_v38 = vadd.f32 %v1704_v35, %v3185_v29  ;;  %v3390_v0 = vmul.f32 %v2974_v43, %v3379_v51  ;;  %v3394_v14 = vmul.f32 %v2984_v49, %v3379_v51 }
 0x130   :  { %5442 = vst [vmem:[#allocation71_spill] sm:$0xff] %v3372_v27  ;;  %v3398_v50 = vmul.f32 %v3003_v62, %v3379_v51  ;;  %v1316_v40 = vmul.f32 %v2974_v43, %v3381_v56  ;;  %v1509_v31 = vmul.f32 %v2984_v49, %v3381_v56  ;;  %v1702_v29 = vmul.f32 %v3003_v62, %v3381_v56 }
 0x131   :  { %5443 = vst [vmem:[#allocation72_spill] sm:$0xff] %v3390_v0  ;;  %5444 = vst [vmem:[#allocation73_spill] sm:$0xff] %v3394_v14  ;;  %v1187_v23 = vadd.f32 %v1123_v52, %v990_v59  ;;  %v3409_v25 = vmul.f32 %v3214_v5, %v2038_v61  ;;  %v601_v35 = vadd.f32 %v3150_v30, %v2911_v1  ;;  %v3431_v30 = vld [vmem:[#allocation2 + $0xb8] sm:$0xff]  ;;  %v3433_v61 = vpop.f32.mrb[20].mxu0 }
 0x132   :  { %5445 = vst [vmem:[#allocation74_spill] sm:$0xff] %v3398_v50  ;;  %v3415_v50 = vmul.f32 %v3309_v39, %v2892_v54  ;;  %v567_v14 = vadd.f32 %v2911_v1, %v3168_v19  ;;  %v3419_v0 = vadd.f32 %v1316_v40, %v1184_v2  ;;  %v3422_v27 = vadd.f32 %v1509_v31, %v3193_v63  ;;  %v3451_v40 = vpop.f32.mrb[21].mxu0 }
 0x133   :  { %5446 = vst [vmem:[#allocation75_spill] sm:$0xff] %v3409_v25  ;;  %v3425_v52 = vadd.f32 %v1702_v29, %v3195_v11  ;;  %v3429_v59 = vmul.f32 %v2974_v43, %v3406_v32  ;;  %5449 = vst [vmem:[#allocation78_spill] sm:$0xff] %v3433_v61  ;;  %v3439_v19 = vmul.f32 %v2984_v49, %v3406_v32  ;;  %v3462_v25 = vpop.f32.mrb[22].mxu0 }
 0x134   :  { %5447 = vst [vmem:[#allocation76_spill] sm:$0xff] %v3415_v50  ;;  %v3435_v50 = vpop.f32.mrb[20].mxu1  ;;  %v3443_v63 = vmul.f32 %v3003_v62, %v3406_v32  ;;  %v1319_v11 = vmul.f32 %v2974_v43, %v3431_v30  ;;  %v1512_v2 = vmul.f32 %v2984_v49, %v3431_v30  ;;  %692 = vst.msk [vmem:[#allocation2 + $0x1b8] sm:$0xff] %vm622_vm1, %v601_v35  ;;  %v3474_v44 = vpop.f32.mrb[23].mxu0 }
 0x135   :  { %5448 = vst [vmem:[#allocation77_spill] sm:$0xff] %v3429_v59  ;;  %5450 = vst [vmem:[#allocation79_spill] sm:$0xff] %v3435_v50  ;;  %v3453_v31 = vpop.f32.mrb[21].mxu1  ;;  %v1705_v29 = vmul.f32 %v3003_v62, %v3431_v30  ;;  %v1121_v59 = vmul.f32 %v3311_v24, %v2892_v54 }
 0x136   :  { %5451 = vst [vmem:[#allocation80_spill] sm:$0xff] %v3439_v19  ;;  %5452 = vst [vmem:[#allocation81_spill] sm:$0xff] %v3443_v63  ;;  %v2070_v19 = vmax.f32 %v601_v35, %v3309_v39  ;;  %v924_v63 = vmul.f32 %v3079_v26, %v2886_v42  ;;  %v3464_v50 = vpop.f32.mrb[22].mxu1  ;;  %v3466_v61 = vadd.f32 %v1319_v11, %v1187_v23 }
 0x137   :  { %658 = vst.msk [vmem:[#allocation2 + $0xa8] sm:$0xff] %vm622_vm1, %v567_v14  ;;  %5453 = vst [vmem:[#allocation82_spill] sm:$0xff] %v3451_v40  ;;  %v3469_v40 = vadd.f32 %v1512_v2, %v3289_v33  ;;  %v599_v35 = vadd.f32 %v2911_v1, %v3170_v48  ;;  %v3476_v8 = vpop.f32.mrb[23].mxu1  ;;  %v3479_v26 = vadd.f32 %v1705_v29, %v3292_v28 }
 0x138   :  { %5454 = vst [vmem:[#allocation83_spill] sm:$0xff] %v3453_v31  ;;  %5455 = vst [vmem:[#allocation84_spill] sm:$0xff] %v3462_v25  ;;  %v2036_v31 = vmax.f32 %v567_v14, %v3311_v24  ;;  %v3482_v25 = vmul.f32 %v3214_v5, %v2070_v19  ;;  %v988_v23 = vadd.f32 %v924_v63, %v3027_v60 }
 0x139   :  { %5456 = vst [vmem:[#allocation85_spill] sm:$0xff] %v3464_v50  ;;  %5457 = vst [vmem:[#allocation86_spill] sm:$0xff] %v3474_v44  ;;  %v3487_v33 = vmul.f32 %v3335_v13, %v2892_v54  ;;  %v2068_v48 = vmax.f32 %v599_v35, %v3335_v13  ;;  %v572_v28 = vadd.f32 %v3227_v47, %v2911_v1 }
 0x13a   :  { %5458 = vst [vmem:[#allocation87_spill] sm:$0xff] %v3476_v8  ;;  %5459 = vst [vmem:[#allocation88_spill] sm:$0xff] %v3482_v25  ;;  %v3490_v14 = vmul.f32 %v3214_v5, %v2036_v31  ;;  %v796_v19 = vmul.f32 %v3009_v3, %v2883_v41  ;;  %v1185_v11 = vadd.f32 %v1121_v59, %v988_v23 }
 0x13b   :  { %5460 = vst [vmem:[#allocation89_spill] sm:$0xff] %v3487_v33  ;;  %690 = vst.msk [vmem:[#allocation2 + $0x1a8] sm:$0xff] %vm622_vm1, %v599_v35  ;;  %v929_v60 = vmul.f32 %v3133_v46, %v2886_v42  ;;  %v1126_v63 = vmul.f32 %v3337_v58, %v2892_v54  ;;  %v5462_v2 = vmax.f32 %v2925_v15, %v2997_v57  ;;  %v3517_v23 = vld [vmem:[#allocation2 + $0x1b8] sm:$0xff] }
 0x13c   :  { %5461 = vst [vmem:[#allocation90_spill] sm:$0xff] %v3490_v14  ;;  %v3509_v29 = vmul.f32 %v3214_v5, %v2068_v48  ;;  %663 = vst.msk [vmem:[#allocation2 + $0xd0] sm:$0xff] %vm622_vm1, %v572_v28  ;;  %v2041_v47 = vmax.f32 %v572_v28, %v3337_v58  ;;  %v604_v59 = vadd.f32 %v3229_v17, %v2911_v1  ;;  %v3529_v17 = vpop.f32.mrb[24].mxu1 }
 0x13d   :  { %v3506_v31 = vmul.f32 %v3214_v5, %v5462_v2  ;;  %v828_v35 = vmul.f32 %v3011_v4, %v2883_v41  ;;  %5464 = vst [vmem:[#allocation92_spill] sm:$0xff] %v3517_v23  ;;  %v993_v15 = vadd.f32 %v929_v60, %v796_v19  ;;  %v961_v2 = vmul.f32 %v3135_v34, %v2886_v42 }
 0x13e   :  { %5463 = vst [vmem:[#allocation91_spill] sm:$0xff] %v3509_v29  ;;  %v3519_v33 = vld [vmem:[#allocation2 + $0xa8] sm:$0xff]  ;;  %v1158_v48 = vmul.f32 %v3379_v51, %v2892_v54  ;;  %v570_v28 = vadd.f32 %v2911_v1, %v3243_v7  ;;  %v3527_v29 = vpop.f32.mrb[24].mxu0  ;;  %5467 = vst [vmem:[#allocation95_spill] sm:$0xff] %v3529_v17  ;;  %v3533_v25 = vmul.f32 %v2974_v43, %v3517_v23  ;;  %v3548_v17 = vpop.f32.mrb[25].mxu1 }
 0x13f   :  { %5465 = vst [vmem:[#allocation93_spill] sm:$0xff] %v3519_v33  ;;  %5466 = vst [vmem:[#allocation94_spill] sm:$0xff] %v3527_v29  ;;  %v3537_v19 = vmul.f32 %v2984_v49, %v3517_v23  ;;  %v3541_v60 = vmul.f32 %v3003_v62, %v3517_v23  ;;  %v1317_v4 = vmul.f32 %v2974_v43, %v3519_v33  ;;  %v3546_v7 = vpop.f32.mrb[25].mxu0  ;;  %v3560_v8 = vpop.f32.mrb[26].mxu1 }
 0x140   :  { %5468 = vst [vmem:[#allocation96_spill] sm:$0xff] %v3533_v25  ;;  %695 = vst.msk [vmem:[#allocation2 + $0x1d0] sm:$0xff] %vm622_vm1, %v604_v59  ;;  %v1510_v25 = vmul.f32 %v2984_v49, %v3519_v33  ;;  %v1703_v29 = vmul.f32 %v3003_v62, %v3519_v33  ;;  %v3555_v14 = vmul.f32 %v3214_v5, %v2041_v47 }
 0x141   :  { %5469 = vst [vmem:[#allocation97_spill] sm:$0xff] %v3537_v19  ;;  %5470 = vst [vmem:[#allocation98_spill] sm:$0xff] %v3541_v60  ;;  %v1190_v19 = vadd.f32 %v1126_v63, %v993_v15  ;;  %v3558_v60 = vpop.f32.mrb[26].mxu0  ;;  %v3562_v44 = vadd.f32 %v1317_v4, %v1185_v11  ;;  %v794_v50 = vmul.f32 %v3031_v9, %v2883_v41 }
 0x142   :  { %5471 = vst [vmem:[#allocation99_spill] sm:$0xff] %v3546_v7  ;;  %5472 = vst [vmem:[#allocation100_spill] sm:$0xff] %v3548_v17  ;;  %v1025_v7 = vadd.f32 %v961_v2, %v828_v35  ;;  %v2073_v17 = vmax.f32 %v604_v59, %v3379_v51  ;;  %v3568_v34 = vadd.f32 %v1510_v25, %v3360_v53  ;;  %v3573_v47 = vld [vmem:[#allocation2 + $0x1a8] sm:$0xff] }
 0x143   :  { %5473 = vst [vmem:[#allocation101_spill] sm:$0xff] %v3555_v14  ;;  %661 = vst.msk [vmem:[#allocation2 + $0xc0] sm:$0xff] %vm622_vm1, %v570_v28  ;;  %v3571_v63 = vadd.f32 %v1703_v29, %v3363_v18  ;;  %v927_v15 = vmul.f32 %v3164_v6, %v2886_v42  ;;  %v1124_v4 = vmul.f32 %v3381_v56, %v2892_v54  ;;  %v3591_v25 = vld [vmem:[#allocation2 + $0xd0] sm:$0xff] }
 0x144   :  { %5474 = vst [vmem:[#allocation102_spill] sm:$0xff] %v3558_v60  ;;  %5475 = vst [vmem:[#allocation103_spill] sm:$0xff] %v3560_v8  ;;  %v3581_v11 = vmul.f32 %v2974_v43, %v3573_v47  ;;  %v3585_v59 = vmul.f32 %v2984_v49, %v3573_v47  ;;  %v3589_v53 = vmul.f32 %v3003_v62, %v3573_v47 }
 0x145   :  { %5476 = vst [vmem:[#allocation104_spill] sm:$0xff] %v3573_v47  ;;  %v1222_v18 = vadd.f32 %v1158_v48, %v1025_v7  ;;  %v3594_v29 = vmul.f32 %v3214_v5, %v2073_v17  ;;  %v991_v35 = vadd.f32 %v927_v15, %v794_v50  ;;  %v2039_v2 = vmax.f32 %v570_v28, %v3381_v56 }
 0x146   :  { %5477 = vst [vmem:[#allocation105_spill] sm:$0xff] %v3581_v11  ;;  %5478 = vst [vmem:[#allocation106_spill] sm:$0xff] %v3585_v59  ;;  %v5481_v11 = vmax.f32 %v2934_v21, %v3014_v55  ;;  %v1322_v59 = vmul.f32 %v2974_v43, %v3591_v25  ;;  %v1708_v48 = vmul.f32 %v3003_v62, %v3591_v25 }
 0x147   :  { %5479 = vst [vmem:[#allocation107_spill] sm:$0xff] %v3589_v53  ;;  %5480 = vst [vmem:[#allocation108_spill] sm:$0xff] %v3594_v29  ;;  %v1515_v53 = vmul.f32 %v2984_v49, %v3591_v25  ;;  %v1901_v17 = vmul.f32 %v2977_v45, %v3591_v25  ;;  %v3609_v50 = vld [vmem:[#allocation2 + $0x1d0] sm:$0xff]  ;;  %v1188_v28 = vadd.f32 %v1124_v4, %v991_v35  ;;  %v3630_v4 = vld [vmem:[%s5343_s5] ss:$0 sm:$0xff] }
 0x148   :  { %v2168_v14 = vmul.f32 %v3214_v5, %v5481_v11  ;;  %v3612_v7 = vmul.f32 %v3214_v5, %v2039_v2  ;;  %v602_v21 = vadd.f32 %v2911_v1, %v3245_v37  ;;  %v826_v15 = vmul.f32 %v3045_v12, %v2883_v41 }
 0x149   :  { %v3618_v11 = vadd.f32 %v1322_v59, %v1190_v19  ;;  %v3621_v29 = vadd.f32 %v1515_v53, %v3374_v16  ;;  %v3624_v8 = vadd.f32 %v1708_v48, %v3377_v22  ;;  %v1965_v60 = vadd.f32 %v1901_v17, %v3386_v38  ;;  %v3649_v38 = vpop.f32.mrb[27].mxu0 }
 0x14a   :  { %5482 = vst [vmem:[#allocation109_spill] sm:$0xff] %v3612_v7  ;;  %v3632_v35 = vld [vmem:[#allocation2 + $0xc0] sm:$0xff]  ;;  %v1354_v37 = vmul.f32 %v2974_v43, %v3609_v50  ;;  %v3638_v19 = vmul.f32 %v2984_v49, %v3609_v50  ;;  %v3642_v16 = vmul.f32 %v3003_v62, %v3609_v50  ;;  %v3646_v22 = vmul.f32 %v2977_v45, %v3609_v50 }
 0x14b   :  { %693 = vst.msk [vmem:[#allocation2 + $0x1c0] sm:$0xff] %vm622_vm1, %v602_v21  ;;  %5486 = vst [vmem:[#allocation113_spill] sm:$0xff] %v3649_v38  ;;  %v2234_v59 = vsel %vm165_vm0, %v1965_v60, %v3506_v31  ;;  %v1320_v53 = vmul.f32 %v2974_v43, %v3632_v35  ;;  %v1513_v2 = vmul.f32 %v2984_v49, %v3632_v35 }
 0x14c   :  { %5483 = vst [vmem:[#allocation110_spill] sm:$0xff] %v3638_v19  ;;  %5484 = vst [vmem:[#allocation111_spill] sm:$0xff] %v3642_v16  ;;  %v1706_v48 = vmul.f32 %v3003_v62, %v3632_v35  ;;  %v3660_v17 = vadd.f32 %v3630_v4, %v2234_v59  ;;  %v3662_v12 = vadd.f32 %v1354_v37, %v1222_v18 }
 0x14d   :  { %5485 = vst [vmem:[#allocation112_spill] sm:$0xff] %v3646_v22  ;;  %v1899_v22 = vmul.f32 %v2977_v45, %v3632_v35  ;;  %v959_v31 = vmul.f32 %v3166_v20, %v2886_v42  ;;  %v3668_v60 = vadd.f32 %v1320_v53, %v1188_v28  ;;  %v3671_v16 = vadd.f32 %v1513_v2, %v3419_v0  ;;  %v5491_v53 = vld [vmem:[#allocation25_spill] sm:$0xff] }
 0x14e   :  { %5487 = vst [vmem:[#allocation114_spill] sm:$0xff] %v3662_v12  ;;  %v3674_v19 = vadd.f32 %v1706_v48, %v3422_v27  ;;  %v1156_v59 = vmul.f32 %v3406_v32, %v2892_v54  ;;  %v2071_v7 = vmax.f32 %v602_v21, %v3406_v32  ;;  %v573_v28 = vadd.f32 %v3256_v36, %v2911_v1  ;;  %v5494_v21 = vld [vmem:[#allocation41_spill] sm:$0xff] }
 0x14f   :  { %5488 = vst [vmem:[#allocation115_spill] sm:$0xff] %v3668_v60  ;;  %5489 = vst [vmem:[#allocation116_spill] sm:$0xff] %v3671_v16  ;;  %v1963_v37 = vadd.f32 %v1899_v22, %v3425_v52  ;;  %v1023_v38 = vadd.f32 %v959_v31, %v826_v15  ;;  %v797_v0 = vmul.f32 %v5491_v53, %v2883_v41  ;;  %v5493_v15 = vld [vmem:[#allocation14_spill] sm:$0xff] }
 0x150   :  { %5490 = vst [vmem:[#allocation117_spill] sm:$0xff] %v3674_v19  ;;  %v930_v27 = vmul.f32 %v3260_v10, %v2886_v42  ;;  %v1127_v2 = vmul.f32 %v3431_v30, %v2892_v54  ;;  %v3691_v52 = vmul.f32 %v3214_v5, %v2071_v7  ;;  %v5495_v22 = vmax.f32 %v5493_v15, %v5494_v21 }
 0x151   :  { %v2232_v48 = vsel %vm165_vm0, %v1963_v37, %v2168_v14  ;;  %v1220_v18 = vadd.f32 %v1156_v59, %v1023_v38  ;;  %664 = vst.msk [vmem:[#allocation2 + $0xd8] sm:$0xff] %vm622_vm1, %v573_v28  ;;  %v2042_v60 = vmax.f32 %v573_v28, %v3431_v30  ;;  %v5497_v14 = vld [vmem:[#allocation51_spill] sm:$0xff]  ;;  %v5505_v28 = vld [vmem:[#allocation53_spill] sm:$0xff] }
 0x152   :  { %5492 = vst [vmem:[#allocation118_spill] sm:$0xff] %v3691_v52  ;;  %v2171_v36 = vmul.f32 %v3214_v5, %v5495_v22  ;;  %v3698_v31 = vadd.f32 %v3630_v4, %v2232_v48  ;;  %v3700_v19 = vld [vmem:[#allocation2 + $0x1c0] sm:$0xff]  ;;  %v994_v16 = vadd.f32 %v930_v27, %v797_v0  ;;  %v605_v38 = vadd.f32 %v5497_v14, %v2911_v1  ;;  %v3720_v0 = vpop.f32.mrb[27].mxu1  ;;  %v5503_v22 = vld [vmem:[#allocation29_spill] sm:$0xff]  ;;  %v5509_v52 = vld [vmem:[#allocation48_spill] sm:$0xff] }
 0x153   :  { %v1352_v7 = vmul.f32 %v2974_v43, %v3700_v19  ;;  %v3710_v59 = vmul.f32 %v2984_v49, %v3700_v19  ;;  %v3714_v37 = vmul.f32 %v3003_v62, %v3700_v19  ;;  %v3718_v48 = vmul.f32 %v2977_v45, %v3700_v19  ;;  %5501 = vst [vmem:[#allocation120_spill] sm:$0xff] %v3720_v0 }
 0x154   :  { %5496 = vst [vmem:[#allocation14_spill] sm:$0xff] %v3698_v31  ;;  %v1191_v27 = vadd.f32 %v1127_v2, %v994_v16  ;;  %v3724_v15 = vmul.f32 %v3214_v5, %v2042_v60  ;;  %696 = vst.msk [vmem:[#allocation2 + $0x1d8] sm:$0xff] %vm622_vm1, %v605_v38  ;;  %v829_v14 = vmul.f32 %v5503_v22, %v2883_v41  ;;  %v5506_v60 = vld [vmem:[#allocation30_spill] sm:$0xff]  ;;  %v5508_v22 = vld [vmem:[#allocation16_spill] sm:$0xff] }
 0x155   :  { %5498 = vst [vmem:[#allocation41_spill] sm:$0xff] %v3710_v59  ;;  %5499 = vst [vmem:[#allocation51_spill] sm:$0xff] %v3714_v37  ;;  %v3729_v59 = vadd.f32 %v1352_v7, %v1220_v18  ;;  %v962_v37 = vmul.f32 %v3309_v39, %v2886_v42  ;;  %v2074_v0 = vmax.f32 %v605_v38, %v3517_v23 }
 0x156   :  { %5500 = vst [vmem:[#allocation119_spill] sm:$0xff] %v3718_v48  ;;  %5502 = vst [vmem:[#allocation121_spill] sm:$0xff] %v3724_v15  ;;  %v1159_v48 = vmul.f32 %v3517_v23, %v2892_v54  ;;  %v571_v16 = vadd.f32 %v2911_v1, %v5505_v28  ;;  %v795_v2 = vmul.f32 %v5506_v60, %v2883_v41  ;;  %v5512_v23 = vld [vmem:[#allocation33_spill] sm:$0xff] }
 0x157   :  { %5504 = vst [vmem:[#allocation122_spill] sm:$0xff] %v3729_v59  ;;  %v928_v15 = vmul.f32 %v3311_v24, %v2886_v42  ;;  %v1125_v18 = vmul.f32 %v3519_v33, %v2892_v54  ;;  %v1026_v7 = vadd.f32 %v962_v37, %v829_v14  ;;  %v3745_v39 = vmul.f32 %v3214_v5, %v2074_v0  ;;  %v5511_v59 = vld [vmem:[#allocation54_spill] sm:$0xff] }
 0x158   :  { %v5510_v31 = vmax.f32 %v5508_v22, %v5509_v52  ;;  %v603_v28 = vadd.f32 %v2911_v1, %v5511_v59  ;;  %662 = vst.msk [vmem:[#allocation2 + $0xc8] sm:$0xff] %vm622_vm1, %v571_v16  ;;  %v2040_v24 = vmax.f32 %v571_v16, %v3519_v33  ;;  %v827_v12 = vmul.f32 %v5512_v23, %v2883_v41  ;;  %v3759_v0 = vld [vmem:[#allocation2 + $0xd8] sm:$0xff] }
 0x159   :  { %5507 = vst [vmem:[#allocation53_spill] sm:$0xff] %v3745_v39  ;;  %v992_v60 = vadd.f32 %v928_v15, %v795_v2  ;;  %v960_v37 = vmul.f32 %v3335_v13, %v2886_v42  ;;  %v1223_v14 = vadd.f32 %v1159_v48, %v1026_v7  ;;  %v5513_v15 = vld [vmem:[#allocation59_spill] sm:$0xff]  ;;  %v1323_v16 = vmul.f32 %v2974_v43, %v3759_v0 }
 0x15a   :  { %v2169_v38 = vmul.f32 %v3214_v5, %v5510_v31  ;;  %694 = vst.msk [vmem:[#allocation2 + $0x1c8] sm:$0xff] %vm622_vm1, %v603_v28  ;;  %v1157_v31 = vmul.f32 %v3573_v47, %v2892_v54  ;;  %v2072_v59 = vmax.f32 %v603_v28, %v3573_v47  ;;  %v576_v22 = vadd.f32 %v5513_v15, %v2911_v1  ;;  %v3784_v47 = vpop.f32.mrb[28].mxu0 }
 0x15b   :  { %v1516_v2 = vmul.f32 %v2984_v49, %v3759_v0  ;;  %v1709_v13 = vmul.f32 %v3003_v62, %v3759_v0  ;;  %v1902_v48 = vmul.f32 %v2977_v45, %v3759_v0  ;;  %v3775_v7 = vld [vmem:[#allocation2 + $0x1d8] sm:$0xff]  ;;  %v1189_v23 = vadd.f32 %v1125_v18, %v992_v60  ;;  %5516 = vst [vmem:[#allocation59_spill] sm:$0xff] %v3784_v47 }
 0x15c   :  { %v3778_v28 = vmul.f32 %v3214_v5, %v2040_v24  ;;  %v1024_v39 = vadd.f32 %v960_v37, %v827_v12  ;;  %v3781_v15 = vmul.f32 %v3214_v5, %v2072_v59  ;;  %667 = vst.msk [vmem:[#allocation2 + $0xf0] sm:$0xff] %vm622_vm1, %v576_v22  ;;  %v3786_v52 = vadd.f32 %v1323_v16, %v1191_v27 }
 0x15d   :  { %v3789_v33 = vadd.f32 %v1516_v2, %v3466_v61  ;;  %v3792_v53 = vadd.f32 %v1709_v13, %v3469_v40  ;;  %v1966_v60 = vadd.f32 %v1902_v48, %v3479_v26  ;;  %v1355_v12 = vmul.f32 %v2974_v43, %v3775_v7 }
 0x15e   :  { %5514 = vst [vmem:[#allocation16_spill] sm:$0xff] %v3778_v28  ;;  %5515 = vst [vmem:[#allocation54_spill] sm:$0xff] %v3781_v15  ;;  %v3799_v18 = vmul.f32 %v2984_v49, %v3775_v7  ;;  %v3803_v24 = vmul.f32 %v3003_v62, %v3775_v7  ;;  %v3807_v61 = vmul.f32 %v2977_v45, %v3775_v7 }
 0x15f   :  { %v2235_v40 = vsel %vm165_vm0, %v1966_v60, %v2171_v36  ;;  %v1221_v27 = vadd.f32 %v1157_v31, %v1024_v39  ;;  %v800_v26 = vmul.f32 %v3133_v46, %v2883_v41  ;;  %v933_v37 = vmul.f32 %v3337_v58, %v2886_v42  ;;  %v3819_v2 = vld [vmem:[#allocation2 + $0xc8] sm:$0xff] }
 0x160   :  { %5517 = vst [vmem:[#allocation123_spill] sm:$0xff] %v3799_v18  ;;  %5518 = vst [vmem:[#allocation124_spill] sm:$0xff] %v3803_v24  ;;  %v3815_v59 = vadd.f32 %v3630_v4, %v2235_v40  ;;  %v3817_v16 = vadd.f32 %v1355_v12, %v1223_v14  ;;  %v1130_v13 = vmul.f32 %v3591_v25, %v2892_v54 }
 0x161   :  { %5519 = vst [vmem:[#allocation125_spill] sm:$0xff] %v3807_v61  ;;  %v2045_v48 = vmax.f32 %v576_v22, %v3591_v25  ;;  %v1321_v36 = vmul.f32 %v2974_v43, %v3819_v2  ;;  %v1514_v46 = vmul.f32 %v2984_v49, %v3819_v2  ;;  %v1707_v58 = vmul.f32 %v3003_v62, %v3819_v2  ;;  %v3832_v14 = vld [vmem:[#allocation2 + $0x1c8] sm:$0xff] }
 0x162   :  { %v1900_v39 = vmul.f32 %v2977_v45, %v3819_v2  ;;  %v1353_v60 = vmul.f32 %v2974_v43, %v3832_v14  ;;  %v3839_v22 = vmul.f32 %v2984_v49, %v3832_v14  ;;  %v3843_v12 = vmul.f32 %v3003_v62, %v3832_v14 }
 0x163   :  { %v3845_v40 = vadd.f32 %v1321_v36, %v1189_v23  ;;  %v3848_v61 = vadd.f32 %v1514_v46, %v3562_v44  ;;  %v3851_v24 = vadd.f32 %v1707_v58, %v3568_v34  ;;  %v3854_v18 = vld [vmem:[#allocation2 + $0xf0] sm:$0xff]  ;;  %v997_v28 = vadd.f32 %v933_v37, %v800_v26 }
 0x164   :  { %5520 = vst [vmem:[#allocation126_spill] sm:$0xff] %v3839_v22  ;;  %5521 = vst [vmem:[#allocation127_spill] sm:$0xff] %v3843_v12  ;;  %v1964_v31 = vadd.f32 %v1900_v39, %v3571_v63  ;;  %v3856_v15 = vadd.f32 %v1353_v60, %v1221_v27  ;;  %v3860_v22 = vmul.f32 %v2977_v45, %v3832_v14  ;;  %v5525_v60 = vld [vmem:[#allocation60_spill] sm:$0xff] }
 0x165   :  { %v1326_v23 = vmul.f32 %v2974_v43, %v3854_v18  ;;  %v1519_v34 = vmul.f32 %v2984_v49, %v3854_v18  ;;  %v1712_v63 = vmul.f32 %v3003_v62, %v3854_v18  ;;  %v1905_v27 = vmul.f32 %v2977_v45, %v3854_v18 }
 0x166   :  { %5522 = vst [vmem:[#allocation128_spill] sm:$0xff] %v3860_v22  ;;  %v2233_v44 = vsel %vm165_vm0, %v1964_v31, %v2169_v38  ;;  %v1194_v46 = vadd.f32 %v1130_v13, %v997_v28  ;;  %v5523_v26 = vmax.f32 %v2997_v57, %v3009_v3  ;;  %v3879_v38 = vmul.f32 %v3214_v5, %v2045_v48  ;;  %v5526_v57 = vld [vmem:[#allocation39_spill] sm:$0xff]  ;;  %v5543_v28 = vld [vmem:[#allocation114_spill] sm:$0xff] }
 0x167   :  { %v3872_v36 = vadd.f32 %v3630_v4, %v2233_v44  ;;  %v3882_v58 = vadd.f32 %v1519_v34, %v3618_v11  ;;  %v3885_v39 = vadd.f32 %v1712_v63, %v3621_v29  ;;  %v1969_v31 = vadd.f32 %v1905_v27, %v3624_v8  ;;  %v5527_v34 = vld [vmem:[#allocation63_spill] sm:$0xff] }
 0x168   :  { %v2174_v37 = vmul.f32 %v3214_v5, %v5523_v26  ;;  %5524 = vst [vmem:[#allocation129_spill] sm:$0xff] %v3879_v38  ;;  %v608_v44 = vadd.f32 %v5525_v60, %v2911_v1  ;;  %v3891_v13 = vadd.f32 %v1326_v23, %v1194_v46  ;;  %v832_v3 = vmul.f32 %v5526_v57, %v2883_v41 }
 0x169   :  { %v965_v48 = vmul.f32 %v3379_v51, %v2886_v42  ;;  %v1162_v8 = vmul.f32 %v3609_v50, %v2892_v54  ;;  %v574_v63 = vadd.f32 %v2911_v1, %v5527_v34  ;;  %v798_v46 = vmul.f32 %v3164_v6, %v2883_v41 }
 0x16a   :  { %v2238_v11 = vsel %vm165_vm0, %v1969_v31, %v2174_v37  ;;  %699 = vst.msk [vmem:[#allocation2 + $0x1f0] sm:$0xff] %vm622_vm1, %v608_v44  ;;  %v2077_v29 = vmax.f32 %v608_v44, %v3609_v50  ;;  %v931_v51 = vmul.f32 %v3381_v56, %v2886_v42  ;;  %v1128_v37 = vmul.f32 %v3632_v35, %v2892_v54 }
 0x16b   :  { %v2309_v23 = vadd.f32 %v3630_v4, %v2238_v11  ;;  %v1029_v27 = vadd.f32 %v965_v48, %v832_v3  ;;  %665 = vst.msk [vmem:[#allocation2 + $0xe0] sm:$0xff] %vm622_vm1, %v574_v63  ;;  %v2043_v31 = vmax.f32 %v574_v63, %v3632_v35  ;;  %v5529_v60 = vmax.f32 %v3014_v55, %v3031_v9  ;;  %v5530_v48 = vld [vmem:[#allocation64_spill] sm:$0xff]  ;;  %v3922_v11 = vpop.f32.mrb[28].mxu1 }
 0x16c   :  { %v3910_v26 = vmul.f32 %v3214_v5, %v2077_v29  ;;  %v995_v3 = vadd.f32 %v931_v51, %v798_v46  ;;  %v606_v56 = vadd.f32 %v2911_v1, %v5530_v48  ;;  %5531 = vst [vmem:[#allocation39_spill] sm:$0xff] %v3922_v11  ;;  %v830_v34 = vmul.f32 %v3166_v20, %v2883_v41  ;;  %v5534_v46 = vld [vmem:[#allocation67_spill] sm:$0xff]  ;;  %v3960_v48 = vld [vmem:[%s5340_s2] ss:$0 sm:$0xff] }
 0x16d   :  { %v2172_v44 = vmul.f32 %v3214_v5, %v5529_v60  ;;  %v2373_v57 = vmax.f32 %v2309_v23, 0.0  ;;  %v1226_v6 = vadd.f32 %v1162_v8, %v1029_v27  ;;  %v3925_v29 = vmul.f32 %v3214_v5, %v2043_v31 }
 0x16e   :  { %5528 = vst [vmem:[#allocation60_spill] sm:$0xff] %v3910_v26  ;;  %v963_v63 = vmul.f32 %v3406_v32, %v2886_v42  ;;  %v1160_v55 = vmul.f32 %v3700_v19, %v2892_v54  ;;  %v5533_v9 = vmax.f32 %v3660_v17, 0.0  ;;  %v1192_v23 = vadd.f32 %v1128_v37, %v995_v3  ;;  %697 = vst.msk [vmem:[#allocation2 + $0x1e0] sm:$0xff] %vm622_vm1, %v606_v56  ;;  %v765_v17 = vld [vmem:[#allocation2 + $0x198] sm:$0xff] }
 0x16f   :  { %5532 = vst [vmem:[#allocation63_spill] sm:$0xff] %v3925_v29  ;;  %v2075_v27 = vmax.f32 %v606_v56, %v3700_v19  ;;  %v577_v51 = vadd.f32 %v5534_v46, %v2911_v1  ;;  %v801_v20 = vmul.f32 %v3260_v10, %v2883_v41  ;;  %v934_v32 = vmul.f32 %v3431_v30, %v2886_v42  ;;  %v5537_v10 = vld [vmem:[#allocation25_spill] sm:$0xff]  ;;  %v5539_v56 = vld [vmem:[#allocation68_spill] sm:$0xff] }
 0x170   :  { %v2433_v8 = vmax.f32 %v5533_v9, %v2373_v57  ;;  %v1027_v31 = vadd.f32 %v963_v63, %v830_v34  ;;  %v1131_v60 = vmul.f32 %v3759_v0, %v2892_v54  ;;  %v5538_v3 = vmax.f32 %v5494_v21, %v5537_v10  ;;  %v5546_v29 = vld [vmem:[#allocation116_spill] sm:$0xff] }
 0x171   :  { %v3946_v37 = vld [vmem:[#allocation2 + $0x1f0] sm:$0xff]  ;;  %v3949_v57 = vmul.f32 %v3214_v5, %v2075_v27  ;;  %668 = vst.msk [vmem:[#allocation2 + $0xf8] sm:$0xff] %vm622_vm1, %v577_v51  ;;  %v2046_v1 = vmax.f32 %v577_v51, %v3759_v0  ;;  %v609_v34 = vadd.f32 %v3960_v48, %v5539_v56  ;;  %v998_v51 = vadd.f32 %v934_v32, %v801_v20 }
 0x172   :  { %2465 = vst.msk [vmem:[#allocation8 + $0x10] sm:$0xff] %vm622_vm1, %v2433_v8  ;;  %5535 = vst [vmem:[#allocation64_spill] sm:$0xff] %v3946_v37  ;;  %v2175_v30 = vmul.f32 %v3214_v5, %v5538_v3  ;;  %v1358_v63 = vmul.f32 %v2974_v43, %v3946_v37  ;;  %v1551_v9 = vmul.f32 %v2984_v49, %v3946_v37  ;;  %v3976_v27 = vld [vmem:[#allocation2 + $0xe0] sm:$0xff]  ;;  %v5544_v32 = vld [vmem:[#allocation92_spill] sm:$0xff] }
 0x173   :  { %5536 = vst [vmem:[#allocation67_spill] sm:$0xff] %v3949_v57  ;;  %v3970_v8 = vmul.f32 %v3003_v62, %v3946_v37  ;;  %v3974_v21 = vmul.f32 %v2977_v45, %v3946_v37  ;;  %v1224_v46 = vadd.f32 %v1160_v55, %v1027_v31  ;;  %v3979_v10 = vmul.f32 %v3214_v5, %v2046_v1 }
 0x174   :  { %700 = vst.msk [vmem:[#allocation2 + $0x1f8] sm:$0xff] %vm622_vm1, %v609_v34  ;;  %v833_v3 = vmul.f32 %v2883_v41, %v765_v17  ;;  %v3983_v56 = vadd.f32 %v1358_v63, %v1226_v6  ;;  %v3986_v22 = vadd.f32 %v1551_v9, %v5543_v28  ;;  %v1324_v12 = vmul.f32 %v2974_v43, %v3976_v27  ;;  %v5545_v28 = vld [vmem:[#allocation115_spill] sm:$0xff] }
 0x175   :  { %5540 = vst [vmem:[#allocation25_spill] sm:$0xff] %v3970_v8  ;;  %5541 = vst [vmem:[#allocation68_spill] sm:$0xff] %v3974_v21  ;;  %v1517_v57 = vmul.f32 %v2984_v49, %v3976_v27  ;;  %v1710_v55 = vmul.f32 %v3003_v62, %v3976_v27  ;;  %v1903_v31 = vmul.f32 %v2977_v45, %v3976_v27  ;;  %v4003_v63 = vld [vmem:[#allocation2 + $0x1e0] sm:$0xff]  ;;  %v5547_v21 = vld [vmem:[#allocation117_spill] sm:$0xff] }
 0x176   :  { %5542 = vst [vmem:[#allocation130_spill] sm:$0xff] %v3979_v10  ;;  %v1195_v20 = vadd.f32 %v1131_v60, %v998_v51  ;;  %v966_v6 = vmul.f32 %v5544_v32, %v2886_v42  ;;  %v3998_v17 = vadd.f32 %v1324_v12, %v1192_v23  ;;  %v1163_v9 = vmul.f32 %v3775_v7, %v2892_v54  ;;  %v5551_v32 = vld [vmem:[#allocation122_spill] sm:$0xff] }
 0x177   :  { %v4001_v1 = vadd.f32 %v1517_v57, %v5545_v28  ;;  %v2078_v10 = vmax.f32 %v609_v34, %v3775_v7  ;;  %v4009_v26 = vadd.f32 %v1710_v55, %v5546_v29  ;;  %v1967_v60 = vadd.f32 %v1903_v31, %v5547_v21 }
 0x178   :  { %v1356_v51 = vmul.f32 %v2974_v43, %v4003_v63  ;;  %v1549_v12 = vmul.f32 %v2984_v49, %v4003_v63  ;;  %v4018_v23 = vmul.f32 %v3003_v62, %v4003_v63  ;;  %v4022_v57 = vmul.f32 %v2977_v45, %v4003_v63  ;;  %v4024_v34 = vld [vmem:[#allocation2 + $0xf8] sm:$0xff] }
 0x179   :  { %v1030_v29 = vadd.f32 %v966_v6, %v833_v3  ;;  %v4027_v55 = vmul.f32 %v3214_v5, %v2078_v10  ;;  %v2236_v21 = vsel %vm165_vm0, %v1967_v60, %v2172_v44  ;;  %v1713_v3 = vmul.f32 %v3003_v62, %v4024_v34 }
 0x17a   :  { %5548 = vst [vmem:[#allocation114_spill] sm:$0xff] %v4018_v23  ;;  %5549 = vst [vmem:[#allocation92_spill] sm:$0xff] %v4022_v57  ;;  %v4030_v31 = vadd.f32 %v1356_v51, %v1224_v46  ;;  %v4033_v28 = vadd.f32 %v1549_v12, %v5551_v32  ;;  %v1327_v23 = vmul.f32 %v2974_v43, %v4024_v34  ;;  %v4046_v46 = vpop.f32.mrb[29].mxu0 }
 0x17b   :  { %5550 = vst [vmem:[#allocation115_spill] sm:$0xff] %v4027_v55  ;;  %v2307_v38 = vadd.f32 %v3630_v4, %v2236_v21  ;;  %v1520_v57 = vmul.f32 %v2984_v49, %v4024_v34  ;;  %v1906_v10 = vmul.f32 %v2977_v45, %v4024_v34  ;;  %v4044_v44 = vld [vmem:[#allocation2 + $0x1f8] sm:$0xff]  ;;  %5553 = vst [vmem:[#allocation117_spill] sm:$0xff] %v4046_v46  ;;  %v731_v21 = vld [vmem:[#allocation2 + $0x88] sm:$0xff] }
 0x17c   :  { %5552 = vst [vmem:[#allocation116_spill] sm:$0xff] %v4044_v44  ;;  %v4048_v6 = vadd.f32 %v1327_v23, %v1195_v20  ;;  %v1227_v60 = vadd.f32 %v1163_v9, %v1030_v29  ;;  %v1359_v51 = vmul.f32 %v2974_v43, %v4044_v44  ;;  %v1552_v12 = vmul.f32 %v2984_v49, %v4044_v44  ;;  %v5558_v23 = vld [vmem:[#allocation14_spill] sm:$0xff] }
 0x17d   :  { %v2371_v32 = vmax.f32 %v2307_v38, 0.0  ;;  %v4055_v55 = vadd.f32 %v1520_v57, %v3786_v52  ;;  %v4058_v8 = vadd.f32 %v1713_v3, %v3789_v33  ;;  %v1970_v11 = vadd.f32 %v1906_v10, %v3792_v53  ;;  %v763_v52 = vld [vmem:[#allocation2 + $0x188] sm:$0xff]  ;;  %v5560_v53 = vld [vmem:[#allocation70_spill] sm:$0xff] }
 0x17e   :  { %v4061_v46 = vadd.f32 %v1359_v51, %v1227_v60  ;;  %v4064_v20 = vadd.f32 %v1552_v12, %v3817_v16  ;;  %v4068_v9 = vmul.f32 %v3003_v62, %v4044_v44  ;;  %v4072_v38 = vmul.f32 %v2977_v45, %v4044_v44  ;;  %v5561_v60 = vld [vmem:[#allocation93_spill] sm:$0xff] }
 0x17f   :  { %v5559_v57 = vmax.f32 %v5558_v23, 0.0  ;;  %v2239_v29 = vsel %vm165_vm0, %v1970_v11, %v2175_v30  ;;  %v575_v3 = vadd.f32 %v3960_v48, %v5560_v53  ;;  %v799_v16 = vmul.f32 %v2883_v41, %v731_v21  ;;  %v736_v11 = vld [vmem:[#allocation2 + $0xb0] sm:$0xff]  ;;  %v5565_v21 = vld [vmem:[#allocation71_spill] sm:$0xff] }
 0x180   :  { %5554 = vst [vmem:[#allocation122_spill] sm:$0xff] %v4061_v46  ;;  %5555 = vst [vmem:[#allocation131_spill] sm:$0xff] %v4064_v20  ;;  %v2310_v10 = vadd.f32 %v3630_v4, %v2239_v29  ;;  %v932_v51 = vmul.f32 %v5561_v60, %v2886_v42  ;;  %v1129_v12 = vmul.f32 %v3819_v2, %v2892_v54  ;;  %v5566_v29 = vld [vmem:[#allocation104_spill] sm:$0xff] }
 0x181   :  { %5556 = vst [vmem:[#allocation132_spill] sm:$0xff] %v4068_v9  ;;  %5557 = vst [vmem:[#allocation133_spill] sm:$0xff] %v4072_v38  ;;  %v2431_v33 = vmax.f32 %v5559_v57, %v2371_v32  ;;  %v5562_v38 = vld [vmem:[#allocation48_spill] sm:$0xff]  ;;  %v5563_v9 = vld [vmem:[#allocation30_spill] sm:$0xff]  ;;  %v2044_v30 = vmax.f32 %v575_v3, %v3819_v2  ;;  %v607_v23 = vadd.f32 %v3960_v48, %v5565_v21 }
 0x182   :  { %v5564_v47 = vmax.f32 %v5562_v38, %v5563_v9  ;;  %666 = vst.msk [vmem:[#allocation2 + $0xe8] sm:$0xff] %vm622_vm1, %v575_v3  ;;  %v831_v57 = vmul.f32 %v2883_v41, %v763_v52  ;;  %v964_v53 = vmul.f32 %v5566_v29, %v2886_v42  ;;  %v2374_v60 = vmax.f32 %v2310_v10, 0.0  ;;  %v5567_v38 = vld [vmem:[#allocation78_spill] sm:$0xff]  ;;  %v4109_v46 = vld [vmem:[#allocation2 + $0x1b0] sm:$0xff] }
 0x183   :  { %2463 = vst.msk [vmem:[#allocation8] sm:$0xff] %vm622_vm1, %v2431_v33  ;;  %v996_v9 = vadd.f32 %v932_v51, %v799_v16  ;;  %v580_v33 = vadd.f32 %v3960_v48, %v5567_v38  ;;  %v4104_v20 = vmul.f32 %v3214_v5, %v2044_v30  ;;  %698 = vst.msk [vmem:[#allocation2 + $0x1e8] sm:$0xff] %vm622_vm1, %v607_v23  ;;  %v5570_v16 = vmax.f32 %v3815_v59, 0.0  ;;  %v734_v38 = vld [vmem:[#allocation2 + $0xa0] sm:$0xff] }
 0x184   :  { %v4089_v32 = vmul.f32 %v3214_v5, %v5564_v47  ;;  %v1161_v47 = vmul.f32 %v3832_v14, %v2892_v54  ;;  %v1028_v3 = vadd.f32 %v964_v53, %v831_v57  ;;  %v2076_v21 = vmax.f32 %v607_v23, %v3832_v14  ;;  %5569 = vst [vmem:[#allocation70_spill] sm:$0xff] %v4109_v46  ;;  %v5572_v53 = vld [vmem:[#allocation79_spill] sm:$0xff] }
 0x185   :  { %5568 = vst [vmem:[#allocation14_spill] sm:$0xff] %v4104_v20  ;;  %v804_v52 = vmul.f32 %v2883_v41, %v736_v11  ;;  %v2434_v10 = vmax.f32 %v5570_v16, %v2374_v60  ;;  %v1193_v51 = vadd.f32 %v1129_v12, %v996_v9  ;;  %671 = vst.msk [vmem:[#allocation2 + $0x110] sm:$0xff] %vm622_vm1, %v580_v33 }
 0x186   :  { %v937_v29 = vmul.f32 %v3591_v25, %v2886_v42  ;;  %v1134_v30 = vmul.f32 %v3854_v18, %v2892_v54  ;;  %v1225_v57 = vadd.f32 %v1161_v47, %v1028_v3  ;;  %v4119_v23 = vmul.f32 %v3214_v5, %v2076_v21  ;;  %v5574_v3 = vld [vmem:[#allocation82_spill] sm:$0xff] }
 0x187   :  { %v2049_v11 = vmax.f32 %v580_v33, %v3854_v18  ;;  %v612_v59 = vadd.f32 %v3960_v48, %v5572_v53  ;;  %2466 = vst.msk [vmem:[#allocation8 + $0x18] sm:$0xff] %vm622_vm1, %v2434_v10  ;;  %v836_v60 = vmul.f32 %v2883_v41, %v4109_v46  ;;  %v969_v25 = vmul.f32 %v3609_v50, %v2886_v42 }
 0x188   :  { %5571 = vst [vmem:[#allocation93_spill] sm:$0xff] %v4119_v23  ;;  %v1001_v12 = vadd.f32 %v937_v29, %v804_v52  ;;  %v1166_v9 = vmul.f32 %v3946_v37, %v2892_v54  ;;  %v578_v21 = vadd.f32 %v3960_v48, %v5574_v3  ;;  %v802_v52 = vmul.f32 %v2883_v41, %v734_v38 }
 0x189   :  { %v4132_v47 = vmul.f32 %v3214_v5, %v2049_v11  ;;  %703 = vst.msk [vmem:[#allocation2 + $0x210] sm:$0xff] %vm622_vm1, %v612_v59  ;;  %v2081_v33 = vmax.f32 %v612_v59, %v3946_v37  ;;  %v4139_v16 = vld [vmem:[#allocation2 + $0xe8] sm:$0xff]  ;;  %v1033_v29 = vadd.f32 %v969_v25, %v836_v60  ;;  %v935_v50 = vmul.f32 %v3632_v35, %v2886_v42 }
 0x18a   :  { %5575 = vst [vmem:[#allocation30_spill] sm:$0xff] %v4139_v16  ;;  %v1198_v10 = vadd.f32 %v1134_v30, %v1001_v12  ;;  %v1132_v11 = vmul.f32 %v3976_v27, %v2892_v54  ;;  %v1325_v53 = vmul.f32 %v2974_v43, %v4139_v16  ;;  %v1518_v59 = vmul.f32 %v2984_v49, %v4139_v16  ;;  %v4154_v30 = vld [vmem:[#allocation2 + $0x1e8] sm:$0xff] }
 0x18b   :  { %5573 = vst [vmem:[#allocation48_spill] sm:$0xff] %v4132_v47  ;;  %v1711_v3 = vmul.f32 %v3003_v62, %v4139_v16  ;;  %v1904_v38 = vmul.f32 %v2977_v45, %v4139_v16  ;;  %669 = vst.msk [vmem:[#allocation2 + $0x100] sm:$0xff] %vm622_vm1, %v578_v21  ;;  %v1230_v35 = vadd.f32 %v1166_v9, %v1033_v29  ;;  %v4193_v29 = vpop.f32.mrb[29].mxu1 }
 0x18c   :  { %v4157_v12 = vmul.f32 %v3214_v5, %v2081_v33  ;;  %v999_v60 = vadd.f32 %v935_v50, %v802_v52  ;;  %v2047_v25 = vmax.f32 %v578_v21, %v3976_v27  ;;  %v4160_v23 = vadd.f32 %v1325_v53, %v1193_v51  ;;  %v4169_v37 = vld [vmem:[#allocation2 + $0x110] sm:$0xff]  ;;  %5579 = vst [vmem:[#allocation79_spill] sm:$0xff] %v4193_v29 }
 0x18d   :  { %v4163_v20 = vadd.f32 %v1518_v59, %v3845_v40  ;;  %v4166_v47 = vadd.f32 %v1711_v3, %v3848_v61  ;;  %v1968_v46 = vadd.f32 %v1904_v38, %v3851_v24  ;;  %v1357_v9 = vmul.f32 %v2974_v43, %v4154_v30 }
 0x18e   :  { %5576 = vst [vmem:[#allocation71_spill] sm:$0xff] %v4157_v12  ;;  %v1550_v33 = vmul.f32 %v2984_v49, %v4154_v30  ;;  %v4177_v51 = vmul.f32 %v3003_v62, %v4154_v30  ;;  %v4181_v40 = vmul.f32 %v2977_v45, %v4154_v30  ;;  %v4187_v24 = vmul.f32 %v2883_v41, %v4169_v37 }
 0x18f   :  { %v2237_v61 = vsel %vm165_vm0, %v1968_v46, %v4089_v32  ;;  %v1330_v21 = vmul.f32 %v2974_v43, %v4169_v37  ;;  %v1523_v52 = vmul.f32 %v2984_v49, %v4169_v37  ;;  %v4196_v53 = vadd.f32 %v1357_v9, %v1225_v57 }
 0x190   :  { %5577 = vst [vmem:[#allocation104_spill] sm:$0xff] %v4177_v51  ;;  %5578 = vst [vmem:[#allocation78_spill] sm:$0xff] %v4181_v40  ;;  %v2308_v50 = vadd.f32 %v3630_v4, %v2237_v61  ;;  %v4199_v59 = vadd.f32 %v1550_v33, %v3856_v15  ;;  %v1716_v46 = vmul.f32 %v3003_v62, %v4169_v37  ;;  %v4203_v32 = vld [vmem:[#allocation2 + $0x210] sm:$0xff] }
 0x191   :  { %v4205_v3 = vadd.f32 %v1330_v21, %v1198_v10  ;;  %v4208_v38 = vadd.f32 %v1523_v52, %v3891_v13  ;;  %v1909_v40 = vmul.f32 %v2977_v45, %v4169_v37  ;;  %v1362_v57 = vmul.f32 %v2974_v43, %v4203_v32 }
 0x192   :  { %v2372_v9 = vmax.f32 %v2308_v50, 0.0  ;;  %v4215_v15 = vadd.f32 %v1716_v46, %v3882_v58  ;;  %v1555_v33 = vmul.f32 %v2984_v49, %v4203_v32  ;;  %v1748_v10 = vmul.f32 %v3003_v62, %v4203_v32  ;;  %v4221_v61 = vld [vmem:[#allocation2 + $0x100] sm:$0xff] }
 0x193   :  { %v1973_v13 = vadd.f32 %v1909_v40, %v3885_v39  ;;  %v4224_v21 = vadd.f32 %v1362_v57, %v1230_v35  ;;  %v4228_v52 = vmul.f32 %v2977_v45, %v4203_v32  ;;  %v4232_v58 = vmul.f32 %v2883_v41, %v4221_v61  ;;  %v766_v35 = vld [vmem:[#allocation2 + $0x1a0] sm:$0xff]  ;;  %v5582_v40 = vld [vmem:[#allocation55_spill] sm:$0xff] }
 0x194   :  { %v5581_v50 = vmax.f32 %v3872_v36, 0.0  ;;  %v4237_v51 = vadd.f32 %v1555_v33, %v3983_v56  ;;  %v4240_v29 = vadd.f32 %v1748_v10, %v3986_v22  ;;  %v1196_v39 = vadd.f32 %v1132_v11, %v999_v60  ;;  %v5585_v60 = vld [vmem:[#allocation83_spill] sm:$0xff]  ;;  %v737_v33 = vld [vmem:[#allocation2 + $0xb8] sm:$0xff] }
 0x195   :  { %5580 = vst [vmem:[#allocation82_spill] sm:$0xff] %v4228_v52  ;;  %v2242_v57 = vsel %vm165_vm0, %v1973_v13, %v5582_v40  ;;  %v1328_v12 = vmul.f32 %v2974_v43, %v4221_v61  ;;  %v1521_v52 = vmul.f32 %v2984_v49, %v4221_v61  ;;  %v1714_v36 = vmul.f32 %v3003_v62, %v4221_v61 }
 0x196   :  { %v2432_v46 = vmax.f32 %v5581_v50, %v2372_v9  ;;  %v4252_v56 = vadd.f32 %v3630_v4, %v2242_v57  ;;  %v1907_v22 = vmul.f32 %v2977_v45, %v4221_v61  ;;  %v4257_v11 = vmul.f32 %v3214_v5, %v2047_v25 }
 0x197   :  { %v610_v9 = vadd.f32 %v3960_v48, %v5585_v60  ;;  %v4261_v10 = vadd.f32 %v1328_v12, %v1196_v39  ;;  %v4264_v13 = vadd.f32 %v1521_v52, %v3998_v17  ;;  %v4267_v50 = vadd.f32 %v1714_v36, %v4001_v1  ;;  %v4277_v39 = vpop.f32.mrb[30].mxu0  ;;  %v5588_v1 = vld [vmem:[#allocation84_spill] sm:$0xff]  ;;  %v769_v36 = vld [vmem:[#allocation2 + $0x1b8] sm:$0xff] }
 0x198   :  { %2464 = vst.msk [vmem:[#allocation8 + $0x8] sm:$0xff] %vm622_vm1, %v2432_v46  ;;  %5583 = vst [vmem:[#allocation55_spill] sm:$0xff] %v4252_v56  ;;  %v834_v46 = vmul.f32 %v2883_v41, %v766_v35  ;;  %v1971_v57 = vadd.f32 %v1907_v22, %v4009_v26  ;;  %v967_v25 = vmul.f32 %v3700_v19, %v2886_v42  ;;  %v5589_v22 = vld [vmem:[#allocation57_spill] sm:$0xff]  ;;  %v735_v56 = vld [vmem:[#allocation2 + $0xa8] sm:$0xff] }
 0x199   :  { %5584 = vst [vmem:[#allocation134_spill] sm:$0xff] %v4257_v11  ;;  %5586 = vst [vmem:[#allocation83_spill] sm:$0xff] %v4267_v50  ;;  %v1164_v12 = vmul.f32 %v4003_v63, %v2892_v54  ;;  %v2079_v17 = vmax.f32 %v610_v9, %v4003_v63  ;;  %v581_v52 = vadd.f32 %v3960_v48, %v5588_v1  ;;  %v5590_v11 = vld [vmem:[#allocation85_spill] sm:$0xff] }
 0x19a   :  { %701 = vst.msk [vmem:[#allocation2 + $0x200] sm:$0xff] %vm622_vm1, %v610_v9  ;;  %5587 = vst [vmem:[#allocation135_spill] sm:$0xff] %v4277_v39  ;;  %v805_v35 = vmul.f32 %v2883_v41, %v737_v33  ;;  %v938_v26 = vmul.f32 %v3759_v0, %v2886_v42  ;;  %v2240_v60 = vsel %vm165_vm0, %v1971_v57, %v5589_v22  ;;  %v767_v22 = vld [vmem:[#allocation2 + $0x1a8] sm:$0xff] }
 0x19b   :  { %v1031_v19 = vadd.f32 %v967_v25, %v834_v46  ;;  %v1135_v40 = vmul.f32 %v4024_v34, %v2892_v54  ;;  %v613_v39 = vadd.f32 %v3960_v48, %v5590_v11  ;;  %v4292_v9 = vadd.f32 %v3630_v4, %v2240_v60  ;;  %672 = vst.msk [vmem:[#allocation2 + $0x118] sm:$0xff] %vm622_vm1, %v581_v52 }
 0x19c   :  { %v4295_v1 = vmul.f32 %v3214_v5, %v2079_v17  ;;  %v1002_v0 = vadd.f32 %v938_v26, %v805_v35  ;;  %v2050_v33 = vmax.f32 %v581_v52, %v4024_v34  ;;  %v837_v46 = vmul.f32 %v2883_v41, %v769_v36  ;;  %v5594_v26 = vld [vmem:[#allocation86_spill] sm:$0xff] }
 0x19d   :  { %5591 = vst [vmem:[#allocation84_spill] sm:$0xff] %v4292_v9  ;;  %v1228_v57 = vadd.f32 %v1164_v12, %v1031_v19  ;;  %704 = vst.msk [vmem:[#allocation2 + $0x218] sm:$0xff] %vm622_vm1, %v613_v39  ;;  %v970_v11 = vmul.f32 %v3775_v7, %v2886_v42  ;;  %v1167_v25 = vmul.f32 %v4044_v44, %v2892_v54 }
 0x19e   :  { %5592 = vst [vmem:[#allocation57_spill] sm:$0xff] %v4295_v1  ;;  %v1199_v60 = vadd.f32 %v1135_v40, %v1002_v0  ;;  %v4307_v35 = vmul.f32 %v3214_v5, %v2050_v33  ;;  %v2082_v52 = vmax.f32 %v613_v39, %v4044_v44  ;;  %v579_v19 = vadd.f32 %v3960_v48, %v5594_v26  ;;  %v5596_v0 = vld [vmem:[#allocation87_spill] sm:$0xff] }
 0x19f   :  { %v1034_v12 = vadd.f32 %v970_v11, %v837_v46  ;;  %v803_v36 = vmul.f32 %v2883_v41, %v735_v56  ;;  %v936_v7 = vmul.f32 %v3819_v2, %v2886_v42  ;;  %v1133_v40 = vmul.f32 %v4139_v16, %v2892_v54 }
 0x1a0   :  { %5593 = vst [vmem:[#allocation85_spill] sm:$0xff] %v4307_v35  ;;  %v4318_v50 = vmul.f32 %v3214_v5, %v2082_v52  ;;  %v611_v39 = vadd.f32 %v3960_v48, %v5596_v0  ;;  %v835_v33 = vmul.f32 %v2883_v41, %v767_v22  ;;  %670 = vst.msk [vmem:[#allocation2 + $0x108] sm:$0xff] %vm622_vm1, %v579_v19 }
 0x1a1   :  { %v4315_v1 = vld [vmem:[#allocation2 + $0x200] sm:$0xff]  ;;  %v1231_v52 = vadd.f32 %v1167_v25, %v1034_v12  ;;  %v1000_v26 = vadd.f32 %v936_v7, %v803_v36  ;;  %v2048_v0 = vmax.f32 %v579_v19, %v4139_v16  ;;  %v968_v22 = vmul.f32 %v3832_v14, %v2886_v42 }
 0x1a2   :  { %5595 = vst [vmem:[#allocation86_spill] sm:$0xff] %v4318_v50  ;;  %v1360_v46 = vmul.f32 %v2974_v43, %v4315_v1  ;;  %v1553_v56 = vmul.f32 %v2984_v49, %v4315_v1  ;;  %v1746_v2 = vmul.f32 %v3003_v62, %v4315_v1  ;;  %v4333_v11 = vmul.f32 %v2977_v45, %v4315_v1 }
 0x1a3   :  { %702 = vst.msk [vmem:[#allocation2 + $0x208] sm:$0xff] %vm622_vm1, %v611_v39  ;;  %v1165_v25 = vmul.f32 %v4154_v30, %v2892_v54 }
 0x1a4   :  { %5597 = vst [vmem:[#allocation87_spill] sm:$0xff] %v4333_v11  ;;  %v4340_v17 = vadd.f32 %v1360_v46, %v1228_v57  ;;  %v4343_v50 = vadd.f32 %v1553_v56, %v4030_v31  ;;  %v4346_v35 = vadd.f32 %v1746_v2, %v4033_v28  ;;  %v4348_v11 = vld [vmem:[#allocation2 + $0x118] sm:$0xff] }
 0x1a5   :  { %v4354_v12 = vmul.f32 %v2883_v41, %v4348_v11  ;;  %v1331_v14 = vmul.f32 %v2974_v43, %v4348_v11  ;;  %v1524_v57 = vmul.f32 %v2984_v49, %v4348_v11  ;;  %v1717_v31 = vmul.f32 %v3003_v62, %v4348_v11  ;;  %v4362_v28 = vld [vmem:[#allocation2 + $0x218] sm:$0xff] }
 0x1a6   :  { %5598 = vst [vmem:[#allocation136_spill] sm:$0xff] %v4340_v17  ;;  %5599 = vst [vmem:[#allocation137_spill] sm:$0xff] %v4343_v50  ;;  %v1910_v19 = vmul.f32 %v2977_v45, %v4348_v11  ;;  %v1363_v36 = vmul.f32 %v2974_v43, %v4362_v28  ;;  %v1556_v7 = vmul.f32 %v2984_v49, %v4362_v28  ;;  %v5604_v17 = vld [vmem:[#allocation131_spill] sm:$0xff] }
 0x1a7   :  { %5600 = vst [vmem:[#allocation138_spill] sm:$0xff] %v4346_v35  ;;  %5601 = vst [vmem:[#allocation139_spill] sm:$0xff] %v4354_v12  ;;  %v1749_v46 = vmul.f32 %v3003_v62, %v4362_v28  ;;  %v4372_v56 = vadd.f32 %v1331_v14, %v1199_v60  ;;  %v4375_v2 = vadd.f32 %v1524_v57, %v4048_v6  ;;  %v5603_v35 = vld [vmem:[#allocation122_spill] sm:$0xff]  ;;  %v4393_v14 = vld [vmem:[#allocation2 + $0x108] sm:$0xff] }
 0x1a8   :  { %v4378_v16 = vadd.f32 %v1717_v31, %v4055_v55  ;;  %v4382_v44 = vmul.f32 %v2977_v45, %v4362_v28  ;;  %v1974_v9 = vadd.f32 %v1910_v19, %v4058_v8  ;;  %v4385_v12 = vadd.f32 %v1363_v36, %v1231_v52  ;;  %v740_v36 = vld [vmem:[#allocation2 + $0xd0] sm:$0xff] }
 0x1a9   :  { %v4388_v50 = vadd.f32 %v1556_v7, %v5603_v35  ;;  %v4391_v60 = vadd.f32 %v1749_v46, %v5604_v17  ;;  %v1197_v6 = vadd.f32 %v1133_v40, %v1000_v26  ;;  %v4396_v55 = vmul.f32 %v3214_v5, %v2048_v0 }
 0x1aa   :  { %5602 = vst [vmem:[#allocation140_spill] sm:$0xff] %v4382_v44  ;;  %v1032_v57 = vadd.f32 %v968_v22, %v835_v33  ;;  %v2080_v31 = vmax.f32 %v611_v39, %v4154_v30  ;;  %v5606_v44 = vld [vmem:[#allocation75_spill] sm:$0xff]  ;;  %v4403_v52 = vmul.f32 %v2883_v41, %v4393_v14  ;;  %v1329_v17 = vmul.f32 %v2974_v43, %v4393_v14 }
 0x1ab   :  { %5605 = vst [vmem:[#allocation122_spill] sm:$0xff] %v4396_v55  ;;  %v2243_v8 = vsel %vm165_vm0, %v1974_v9, %v5606_v44  ;;  %v1522_v35 = vmul.f32 %v2984_v49, %v4393_v14  ;;  %v4409_v40 = vld [vmem:[#allocation2 + $0x208] sm:$0xff]  ;;  %v1715_v39 = vmul.f32 %v3003_v62, %v4393_v14  ;;  %v1908_v44 = vmul.f32 %v2977_v45, %v4393_v14 }
 0x1ac   :  { %v4412_v26 = vadd.f32 %v3630_v4, %v2243_v8  ;;  %v1229_v9 = vadd.f32 %v1165_v25, %v1032_v57  ;;  %v4418_v33 = vadd.f32 %v1329_v17, %v1197_v6  ;;  %v1361_v22 = vmul.f32 %v2974_v43, %v4409_v40 }
 0x1ad   :  { %v4421_v0 = vadd.f32 %v1522_v35, %v4160_v23  ;;  %v1554_v19 = vmul.f32 %v2984_v49, %v4409_v40  ;;  %v4429_v46 = vadd.f32 %v1715_v39, %v4163_v20  ;;  %v1972_v8 = vadd.f32 %v1908_v44, %v4166_v47  ;;  %v772_v35 = vld [vmem:[#allocation2 + $0x1d0] sm:$0xff]  ;;  %v5611_v20 = vld [vmem:[#allocation90_spill] sm:$0xff] }
 0x1ae   :  { %v1747_v25 = vmul.f32 %v3003_v62, %v4409_v40  ;;  %v4434_v6 = vadd.f32 %v1361_v22, %v1229_v9  ;;  %v4441_v57 = vmul.f32 %v2977_v45, %v4409_v40  ;;  %v4444_v17 = vmul.f32 %v3214_v5, %v2080_v31  ;;  %v5613_v44 = vld [vmem:[#allocation94_spill] sm:$0xff]  ;;  %v4454_v22 = vpop.f32.mrb[30].mxu1 }
 0x1af   :  { %v4437_v23 = vadd.f32 %v1554_v19, %v4196_v53  ;;  %v2241_v39 = vsel %vm165_vm0, %v1972_v8, %v5611_v20  ;;  %v584_v9 = vadd.f32 %v3960_v48, %v5613_v44  ;;  %v808_v53 = vmul.f32 %v2883_v41, %v740_v36  ;;  %5614 = vst [vmem:[#allocation94_spill] sm:$0xff] %v4454_v22  ;;  %v5616_v8 = vld [vmem:[#allocation95_spill] sm:$0xff]  ;;  %v5617_v44 = vld [vmem:[#allocation64_spill] sm:$0xff]  ;;  %v770_v22 = vld [vmem:[#allocation2 + $0x1c0] sm:$0xff] }
 0x1b0   :  { %5607 = vst [vmem:[#allocation131_spill] sm:$0xff] %v4434_v6  ;;  %5609 = vst [vmem:[#allocation141_spill] sm:$0xff] %v4441_v57  ;;  %v4449_v47 = vadd.f32 %v1747_v25, %v4199_v59  ;;  %v4457_v19 = vadd.f32 %v3630_v4, %v2241_v39  ;;  %v941_v31 = vmul.f32 %v3854_v18, %v2886_v42  ;;  %v738_v25 = vld [vmem:[#allocation2 + $0xc0] sm:$0xff]  ;;  %v5618_v57 = vld [vmem:[#allocation99_spill] sm:$0xff] }
 0x1b1   :  { %5608 = vst [vmem:[#allocation75_spill] sm:$0xff] %v4437_v23  ;;  %5610 = vst [vmem:[#allocation142_spill] sm:$0xff] %v4444_v17  ;;  %v1138_v7 = vmul.f32 %v2892_v54, %v4169_v37  ;;  %v616_v59 = vadd.f32 %v3960_v48, %v5616_v8  ;;  %v2053_v20 = vmax.f32 %v584_v9, %v4169_v37 }
 0x1b2   :  { %5612 = vst [vmem:[#allocation90_spill] sm:$0xff] %v4449_v47  ;;  %5615 = vst [vmem:[#allocation143_spill] sm:$0xff] %v4457_v19  ;;  %v840_v36 = vmul.f32 %v2883_v41, %v772_v35  ;;  %v973_v4 = vmul.f32 %v5617_v44, %v2886_v42  ;;  %v1170_v39 = vmul.f32 %v4203_v32, %v2892_v54 }
 0x1b3   :  { %675 = vst.msk [vmem:[#allocation2 + $0x130] sm:$0xff] %vm622_vm1, %v584_v9  ;;  %v1005_v17 = vadd.f32 %v941_v31, %v808_v53  ;;  %707 = vst.msk [vmem:[#allocation2 + $0x230] sm:$0xff] %vm622_vm1, %v616_v59  ;;  %v2085_v8 = vmax.f32 %v616_v59, %v4203_v32  ;;  %v582_v55 = vadd.f32 %v3960_v48, %v5618_v57  ;;  %v741_v31 = vld [vmem:[#allocation2 + $0xd8] sm:$0xff] }
 0x1b4   :  { %v4478_v9 = vmul.f32 %v3214_v5, %v2053_v20  ;;  %v1037_v35 = vadd.f32 %v973_v4, %v840_v36  ;;  %v806_v44 = vmul.f32 %v2883_v41, %v738_v25  ;;  %v939_v47 = vmul.f32 %v3976_v27, %v2886_v42  ;;  %v5621_v36 = vld [vmem:[#allocation100_spill] sm:$0xff] }
 0x1b5   :  { %v1202_v23 = vadd.f32 %v1138_v7, %v1005_v17  ;;  %v4484_v53 = vmul.f32 %v3214_v5, %v2085_v8  ;;  %673 = vst.msk [vmem:[#allocation2 + $0x120] sm:$0xff] %vm622_vm1, %v582_v55  ;;  %v1136_v32 = vmul.f32 %v2892_v54, %v4221_v61  ;;  %v2051_v57 = vmax.f32 %v582_v55, %v4221_v61  ;;  %v5623_v8 = vld [vmem:[#allocation102_spill] sm:$0xff] }
 0x1b6   :  { %5619 = vst [vmem:[#allocation95_spill] sm:$0xff] %v4478_v9  ;;  %v1234_v59 = vadd.f32 %v1170_v39, %v1037_v35  ;;  %v1003_v20 = vadd.f32 %v939_v47, %v806_v44  ;;  %v4492_v25 = vadd.f32 %v3960_v48, %v5621_v36  ;;  %v838_v27 = vmul.f32 %v2883_v41, %v770_v22  ;;  %v4517_v39 = vpop.f32.mrb[31].mxu0 }
 0x1b7   :  { %5620 = vst [vmem:[#allocation64_spill] sm:$0xff] %v4484_v53  ;;  %v4496_v7 = vmul.f32 %v3214_v5, %v2051_v57  ;;  %v971_v17 = vmul.f32 %v4003_v63, %v2886_v42  ;;  %v1168_v4 = vmul.f32 %v4315_v1, %v2892_v54  ;;  %v4504_v61 = vadd.f32 %v3960_v48, %v5623_v8  ;;  %v5625_v57 = vld [vmem:[#allocation103_spill] sm:$0xff] }
 0x1b8   :  { %v1200_v55 = vadd.f32 %v1136_v32, %v1003_v20  ;;  %705 = vst.msk [vmem:[#allocation2 + $0x220] sm:$0xff] %vm622_vm1, %v4492_v25  ;;  %v2083_v47 = vmax.f32 %v4492_v25, %v4315_v1  ;;  %v4511_v22 = vmul.f32 %v2883_v41, %v741_v31  ;;  %v4515_v63 = vmul.f32 %v4024_v34, %v2886_v42 }
 0x1b9   :  { %5622 = vst [vmem:[#allocation99_spill] sm:$0xff] %v4496_v7  ;;  %5624 = vst [vmem:[#allocation100_spill] sm:$0xff] %v4517_v39  ;;  %v1035_v44 = vadd.f32 %v971_v17, %v838_v27  ;;  %v4525_v32 = vmul.f32 %v2892_v54, %v4348_v11  ;;  %v4531_v31 = vadd.f32 %v3960_v48, %v5625_v57 }
 0x1ba   :  { %v4519_v35 = vld [vmem:[#allocation2 + $0x130] sm:$0xff]  ;;  %676 = vst.msk [vmem:[#allocation2 + $0x138] sm:$0xff] %vm622_vm1, %v4504_v61 }
 0x1bb   :  { %v4535_v34 = vmul.f32 %v2883_v41, %v4519_v35  ;;  %v949_v20 = vmul.f32 %v2886_v42, %v4519_v35  ;;  %v1334_v36 = vmul.f32 %v2974_v43, %v4519_v35  ;;  %v1527_v25 = vmul.f32 %v2984_v49, %v4519_v35  ;;  %v4543_v27 = vld [vmem:[#allocation2 + $0x230] sm:$0xff]  ;;  %708 = vst.msk [vmem:[#allocation2 + $0x238] sm:$0xff] %vm622_vm1, %v4531_v31 }
 0x1bc   :  { %v1720_v17 = vmul.f32 %v3003_v62, %v4519_v35  ;;  %v1913_v8 = vmul.f32 %v2977_v45, %v4519_v35  ;;  %v1366_v57 = vmul.f32 %v2974_v43, %v4543_v27  ;;  %v1559_v18 = vmul.f32 %v2984_v49, %v4543_v27  ;;  %v4565_v9 = vld [vmem:[#allocation2 + $0x120] sm:$0xff] }
 0x1bd   :  { %5626 = vst [vmem:[#allocation102_spill] sm:$0xff] %v4535_v34  ;;  %v4556_v1 = vadd.f32 %v949_v20, %v4187_v24  ;;  %v4558_v39 = vadd.f32 %v1334_v36, %v1202_v23  ;;  %v4561_v7 = vadd.f32 %v1527_v25, %v4205_v3  ;;  %v1752_v53 = vmul.f32 %v3003_v62, %v4543_v27  ;;  %v5631_v36 = vld [vmem:[#allocation101_spill] sm:$0xff] }
 0x1be   :  { %v4568_v19 = vadd.f32 %v1720_v17, %v4208_v38  ;;  %v1977_v34 = vadd.f32 %v1913_v8, %v4215_v15  ;;  %v4571_v6 = vadd.f32 %v1366_v57, %v1234_v59  ;;  %v4574_v24 = vadd.f32 %v1559_v18, %v4224_v21  ;;  %v4600_v59 = vld [vmem:[%s5343_s5] ss:$0 sm:$0xff] }
 0x1bf   :  { %v4577_v23 = vadd.f32 %v1752_v53, %v4237_v51  ;;  %v1945_v3 = vmul.f32 %v2977_v45, %v4543_v27  ;;  %v4583_v20 = vmul.f32 %v2883_v41, %v4565_v9  ;;  %v947_v38 = vmul.f32 %v2886_v42, %v4565_v9  ;;  %v4595_v53 = vld [vmem:[#allocation2 + $0x220] sm:$0xff] }
 0x1c0   :  { %5627 = vst [vmem:[#allocation103_spill] sm:$0xff] %v4571_v6  ;;  %5628 = vst [vmem:[#allocation144_spill] sm:$0xff] %v4574_v24  ;;  %v2246_v15 = vsel %vm165_vm0, %v1977_v34, %v5631_v36  ;;  %v1332_v21 = vmul.f32 %v2974_v43, %v4565_v9  ;;  %v1525_v51 = vmul.f32 %v2984_v49, %v4565_v9  ;;  %v5635_v6 = vld [vmem:[#allocation108_spill] sm:$0xff] }
 0x1c1   :  { %5629 = vst [vmem:[#allocation145_spill] sm:$0xff] %v4577_v23  ;;  %5630 = vst [vmem:[#allocation146_spill] sm:$0xff] %v4583_v20  ;;  %v1718_v18 = vmul.f32 %v3003_v62, %v4565_v9  ;;  %v2317_v25 = vadd.f32 %v4600_v59, %v2246_v15  ;;  %v2009_v34 = vadd.f32 %v1945_v3, %v4240_v29  ;;  %v5636_v29 = vld [vmem:[#allocation83_spill] sm:$0xff] }
 0x1c2   :  { %v4605_v17 = vadd.f32 %v947_v38, %v4232_v58  ;;  %v1911_v8 = vmul.f32 %v2977_v45, %v4565_v9  ;;  %v4609_v57 = vadd.f32 %v1332_v21, %v1200_v55  ;;  %v4612_v36 = vadd.f32 %v1525_v51, %v4261_v10  ;;  %v4631_v55 = vld [vmem:[#allocation2 + $0x138] sm:$0xff] }
 0x1c3   :  { %v4615_v20 = vadd.f32 %v1718_v18, %v4264_v13  ;;  %v1232_v23 = vadd.f32 %v1168_v4, %v1035_v44  ;;  %v2381_v24 = vmax.f32 %v2317_v25, 0.0  ;;  %v2278_v15 = vsel %vm165_vm0, %v2009_v34, %v5635_v6  ;;  %v5637_v6 = vld [vmem:[#allocation55_spill] sm:$0xff]  ;;  %v5639_v51 = vld [vmem:[#allocation109_spill] sm:$0xff] }
 0x1c4   :  { %5632 = vst [vmem:[#allocation101_spill] sm:$0xff] %v4609_v57  ;;  %5633 = vst [vmem:[#allocation147_spill] sm:$0xff] %v4612_v36  ;;  %v1975_v3 = vadd.f32 %v1911_v8, %v5636_v29  ;;  %v1364_v58 = vmul.f32 %v2974_v43, %v4595_v53  ;;  %v4623_v38 = vadd.f32 %v4600_v59, %v2278_v15  ;;  %v5638_v44 = vmax.f32 %v5637_v6, 0.0  ;;  %v5641_v29 = vld [vmem:[#allocation136_spill] sm:$0xff]  ;;  %v5642_v36 = vld [vmem:[#allocation137_spill] sm:$0xff] }
 0x1c5   :  { %5634 = vst [vmem:[#allocation148_spill] sm:$0xff] %v4615_v20  ;;  %v1557_v10 = vmul.f32 %v2984_v49, %v4595_v53  ;;  %v1750_v13 = vmul.f32 %v3003_v62, %v4595_v53  ;;  %v1943_v4 = vmul.f32 %v2977_v45, %v4595_v53  ;;  %v4640_v34 = vmul.f32 %v3214_v5, %v2083_v47 }
 0x1c6   :  { %v2437_v21 = vmax.f32 %v5638_v44, %v2381_v24  ;;  %v2244_v18 = vsel %vm165_vm0, %v1975_v3, %v5639_v51  ;;  %v4637_v25 = vadd.f32 %v1364_v58, %v1232_v23  ;;  %v5643_v24 = vld [vmem:[#allocation138_spill] sm:$0xff]  ;;  %v4654_v23 = vmul.f32 %v2883_v41, %v4631_v55  ;;  %v5646_v51 = vld [vmem:[#allocation139_spill] sm:$0xff] }
 0x1c7   :  { %5640 = vst [vmem:[#allocation108_spill] sm:$0xff] %v4640_v34  ;;  %v2315_v15 = vadd.f32 %v4600_v59, %v2244_v18  ;;  %v4645_v20 = vadd.f32 %v1557_v10, %v5641_v29  ;;  %v4648_v57 = vadd.f32 %v1750_v13, %v5642_v36  ;;  %v2007_v6 = vadd.f32 %v1943_v4, %v5643_v24  ;;  %v773_v4 = vld [vmem:[#allocation2 + $0x1d8] sm:$0xff]  ;;  %v5645_v44 = vld [vmem:[#allocation118_spill] sm:$0xff] }
 0x1c8   :  { %2469 = vst.msk [vmem:[#allocation8 + $0x30] sm:$0xff] %vm622_vm1, %v2437_v21  ;;  %5644 = vst [vmem:[#allocation83_spill] sm:$0xff] %v4654_v23  ;;  %v950_v47 = vmul.f32 %v2886_v42, %v4631_v55  ;;  %v1006_v3 = vadd.f32 %v4515_v63, %v4511_v22  ;;  %v1335_v10 = vmul.f32 %v2974_v43, %v4631_v55  ;;  %v4674_v63 = vld [vmem:[#allocation2 + $0x238] sm:$0xff] }
 0x1c9   :  { %v2379_v58 = vmax.f32 %v2315_v15, 0.0  ;;  %v1528_v36 = vmul.f32 %v2984_v49, %v4631_v55  ;;  %v1721_v13 = vmul.f32 %v3003_v62, %v4631_v55  ;;  %v2276_v21 = vsel %vm165_vm0, %v2007_v6, %v5645_v44  ;;  %v5647_v15 = vld [vmem:[#allocation84_spill] sm:$0xff] }
 0x1ca   :  { %v4669_v18 = vadd.f32 %v950_v47, %v5646_v51  ;;  %v1203_v29 = vadd.f32 %v4525_v32, %v1006_v3  ;;  %v1914_v22 = vmul.f32 %v2977_v45, %v4631_v55  ;;  %v5648_v24 = vmax.f32 %v5647_v15, 0.0  ;;  %v4713_v51 = vpop.f32.mrb[31].mxu1 }
 0x1cb   :  { %v4679_v23 = vadd.f32 %v4600_v59, %v2276_v21  ;;  %v4682_v34 = vadd.f32 %v1528_v36, %v4372_v56  ;;  %v4685_v6 = vadd.f32 %v1721_v13, %v4375_v2  ;;  %v5649_v3 = vmax.f32 %v4504_v61, %v4348_v11  ;;  %v5651_v36 = vld [vmem:[#allocation116_spill] sm:$0xff]  ;;  %v739_v13 = vld [vmem:[#allocation2 + $0xc8] sm:$0xff]  ;;  %v5652_v11 = vld [vmem:[#allocation121_spill] sm:$0xff]  ;;  %5653 = vst [vmem:[#allocation109_spill] sm:$0xff] %v4713_v51 }
 0x1cc   :  { %v2435_v8 = vmax.f32 %v5648_v24, %v2379_v58  ;;  %v4687_v47 = vadd.f32 %v1335_v10, %v1203_v29  ;;  %v1978_v32 = vadd.f32 %v1914_v22, %v4378_v16  ;;  %v841_v58 = vmul.f32 %v2883_v41, %v773_v4  ;;  %v5654_v24 = vld [vmem:[#allocation113_spill] sm:$0xff] }
 0x1cd   :  { %v4694_v44 = vmul.f32 %v3214_v5, %v5649_v3  ;;  %v974_v2 = vmul.f32 %v5651_v36, %v2886_v42  ;;  %v1171_v10 = vmul.f32 %v4362_v28, %v2892_v54  ;;  %v1367_v16 = vmul.f32 %v2974_v43, %v4674_v63 }
 0x1ce   :  { %2467 = vst.msk [vmem:[#allocation8 + $0x20] sm:$0xff] %vm622_vm1, %v2435_v8  ;;  %v2247_v61 = vsel %vm165_vm0, %v1978_v32, %v5652_v11  ;;  %v1560_v4 = vmul.f32 %v2984_v49, %v4674_v63  ;;  %v1753_v8 = vmul.f32 %v3003_v62, %v4674_v63  ;;  %v1946_v21 = vmul.f32 %v2977_v45, %v4674_v63 }
 0x1cf   :  { %5650 = vst [vmem:[#allocation55_spill] sm:$0xff] %v4694_v44  ;;  %v2318_v29 = vadd.f32 %v4600_v59, %v2247_v61  ;;  %v1038_v22 = vadd.f32 %v974_v2, %v841_v58  ;;  %v2086_v15 = vmax.f32 %v4531_v31, %v4362_v28  ;;  %v583_v32 = vadd.f32 %v3960_v48, %v5654_v24  ;;  %v5658_v28 = vld [vmem:[#allocation30_spill] sm:$0xff]  ;;  %v771_v2 = vld [vmem:[#allocation2 + $0x1c8] sm:$0xff] }
 0x1d0   :  { %v4721_v3 = vadd.f32 %v1560_v4, %v4385_v12  ;;  %v4724_v36 = vadd.f32 %v1753_v8, %v4388_v50  ;;  %v2010_v11 = vadd.f32 %v1946_v21, %v4391_v60  ;;  %v807_v56 = vmul.f32 %v2883_v41, %v739_v13  ;;  %v5659_v12 = vld [vmem:[#allocation53_spill] sm:$0xff]  ;;  %v5660_v13 = vld [vmem:[#allocation120_spill] sm:$0xff] }
 0x1d1   :  { %v2382_v51 = vmax.f32 %v2318_v29, 0.0  ;;  %v1235_v44 = vadd.f32 %v1171_v10, %v1038_v22  ;;  %v4729_v58 = vmul.f32 %v3214_v5, %v2086_v15  ;;  %674 = vst.msk [vmem:[#allocation2 + $0x128] sm:$0xff] %vm622_vm1, %v583_v32  ;;  %v940_v31 = vmul.f32 %v5658_v28, %v2886_v42  ;;  %v744_v15 = vld [vmem:[#allocation2 + $0xf0] sm:$0xff]  ;;  %v5665_v28 = vld [vmem:[#allocation59_spill] sm:$0xff] }
 0x1d2   :  { %5655 = vst [vmem:[#allocation136_spill] sm:$0xff] %v4721_v3  ;;  %5656 = vst [vmem:[#allocation137_spill] sm:$0xff] %v4724_v36  ;;  %v2279_v61 = vsel %vm165_vm0, %v2010_v11, %v5659_v12  ;;  %v1137_v50 = vmul.f32 %v2892_v54, %v4393_v14  ;;  %v2052_v60 = vmax.f32 %v583_v32, %v4393_v14  ;;  %v5661_v4 = vmax.f32 %v4412_v26, 0.0 }
 0x1d3   :  { %5657 = vst [vmem:[#allocation138_spill] sm:$0xff] %v4729_v58  ;;  %v615_v10 = vadd.f32 %v3960_v48, %v5660_v13  ;;  %v4743_v21 = vadd.f32 %v1367_v16, %v1235_v44  ;;  %v4746_v29 = vadd.f32 %v4600_v59, %v2279_v61  ;;  %v1004_v22 = vadd.f32 %v940_v31, %v807_v56  ;;  %v1467_v44 = vld [vmem:[#allocation2 + $0x170] sm:$0xff] }
 0x1d4   :  { %v2438_v8 = vmax.f32 %v5661_v4, %v2382_v51  ;;  %v4749_v24 = vmul.f32 %v3214_v5, %v2052_v60  ;;  %v839_v14 = vmul.f32 %v2883_v41, %v771_v2  ;;  %v972_v32 = vmul.f32 %v4154_v30, %v2886_v42  ;;  %v1664_v16 = vld [vmem:[#allocation2 + $0x190] sm:$0xff] }
 0x1d5   :  { %5662 = vst [vmem:[#allocation118_spill] sm:$0xff] %v4743_v21  ;;  %5663 = vst [vmem:[#allocation139_spill] sm:$0xff] %v4746_v29  ;;  %v1169_v26 = vmul.f32 %v4409_v40, %v2892_v54  ;;  %v1201_v51 = vadd.f32 %v1137_v50, %v1004_v22  ;;  %v2084_v11 = vmax.f32 %v615_v10, %v4409_v40  ;;  %v5667_v22 = vld [vmem:[#allocation70_spill] sm:$0xff]  ;;  %v776_v29 = vld [vmem:[#allocation2 + $0x1f0] sm:$0xff] }
 0x1d6   :  { %5664 = vst [vmem:[#allocation84_spill] sm:$0xff] %v4749_v24  ;;  %706 = vst.msk [vmem:[#allocation2 + $0x228] sm:$0xff] %vm622_vm1, %v615_v10  ;;  %v588_v31 = vadd.f32 %v3960_v48, %v5665_v28  ;;  %v1036_v12 = vadd.f32 %v972_v32, %v839_v14  ;;  %v812_v2 = vmul.f32 %v2883_v41, %v744_v15  ;;  %v5673_v24 = vld [vmem:[#allocation19_spill] sm:$0xff] }
 0x1d7   :  { %2470 = vst.msk [vmem:[#allocation8 + $0x38] sm:$0xff] %vm622_vm1, %v2438_v8  ;;  %v945_v30 = vmul.f32 %v2886_v42, %v4169_v37  ;;  %v1142_v61 = vmul.f32 %v2892_v54, %v4519_v35  ;;  %v4768_v60 = vmul.f32 %v3214_v5, %v2084_v11  ;;  %v1535_v50 = vmul.f32 %v2984_v49, %v1467_v44 }
 0x1d8   :  { %679 = vst.msk [vmem:[#allocation2 + $0x150] sm:$0xff] %vm622_vm1, %v588_v31  ;;  %v1728_v40 = vmul.f32 %v3003_v62, %v1467_v44  ;;  %v4774_v13 = vmul.f32 %v3003_v62, %v1664_v16  ;;  %v751_v10 = vld [vmem:[#allocation2 + $0x128] sm:$0xff]  ;;  %v1233_v4 = vadd.f32 %v1169_v26, %v1036_v12  ;;  %v4777_v37 = vmul.f32 %v2977_v45, %v1664_v16 }
 0x1d9   :  { %5666 = vst [vmem:[#allocation116_spill] sm:$0xff] %v4768_v60  ;;  %v1009_v8 = vadd.f32 %v945_v30, %v812_v2  ;;  %v4781_v15 = vmul.f32 %v2977_v45, %v5667_v22  ;;  %v4784_v14 = vmul.f32 %v2883_v41, %v751_v10  ;;  %v948_v32 = vmul.f32 %v2886_v42, %v751_v10  ;;  %v5672_v60 = vld [vmem:[#allocation18_spill] sm:$0xff] }
 0x1da   :  { %v1333_v44 = vmul.f32 %v2974_v43, %v751_v10  ;;  %v1526_v11 = vmul.f32 %v2984_v49, %v751_v10  ;;  %v1719_v28 = vmul.f32 %v3003_v62, %v751_v10  ;;  %v1912_v26 = vmul.f32 %v2977_v45, %v751_v10 }
 0x1db   :  { %5668 = vst [vmem:[#allocation121_spill] sm:$0xff] %v4784_v14  ;;  %v1206_v12 = vadd.f32 %v1142_v61, %v1009_v8  ;;  %v2057_v16 = vmax.f32 %v588_v31, %v4519_v35  ;;  %v4793_v2 = vadd.f32 %v948_v32, %v4403_v52  ;;  %v5674_v14 = vmax.f32 %v5672_v60, %v5673_v24  ;;  %v5676_v24 = vld [vmem:[#allocation39_spill] sm:$0xff]  ;;  %v5677_v8 = vld [vmem:[#allocation16_spill] sm:$0xff] }
 0x1dc   :  { %v4795_v30 = vadd.f32 %v1333_v44, %v1201_v51  ;;  %v4798_v22 = vadd.f32 %v1526_v11, %v4418_v33  ;;  %v4807_v61 = vadd.f32 %v1719_v28, %v4421_v0  ;;  %v1976_v35 = vadd.f32 %v1912_v26, %v4429_v46  ;;  %v5679_v46 = vld [vmem:[#allocation131_spill] sm:$0xff] }
 0x1dd   :  { %5669 = vst [vmem:[#allocation113_spill] sm:$0xff] %v4793_v2  ;;  %v1297_v56 = vld [vmem:[#allocation2 + $0x228] sm:$0xff]  ;;  %v4804_v58 = vmul.f32 %v3214_v5, %v5674_v14  ;;  %v2198_v10 = vmul.f32 %v3214_v5, %v2057_v16  ;;  %v4817_v60 = vadd.f32 %v3960_v48, %v5676_v24  ;;  %v4827_v11 = vmul.f32 %v2883_v41, %v776_v29  ;;  %v5683_v16 = vld [vmem:[#allocation90_spill] sm:$0xff]  ;;  %v5690_v2 = vld [vmem:[#allocation52_spill] sm:$0xff] }
 0x1de   :  { %5670 = vst [vmem:[#allocation30_spill] sm:$0xff] %v4795_v30  ;;  %5671 = vst [vmem:[#allocation53_spill] sm:$0xff] %v4798_v22  ;;  %v1365_v52 = vmul.f32 %v2974_v43, %v1297_v56  ;;  %v1558_v51 = vmul.f32 %v2984_v49, %v1297_v56  ;;  %v1751_v33 = vmul.f32 %v3003_v62, %v1297_v56  ;;  %v5681_v28 = vld [vmem:[#allocation75_spill] sm:$0xff] }
 0x1df   :  { %5675 = vst [vmem:[#allocation120_spill] sm:$0xff] %v4807_v61  ;;  %v1944_v31 = vmul.f32 %v2977_v45, %v1297_v56  ;;  %v2245_v0 = vsel %vm165_vm0, %v1976_v35, %v5677_v8  ;;  %v756_v44 = vld [vmem:[#allocation2 + $0x150] sm:$0xff]  ;;  %711 = vst.msk [vmem:[#allocation2 + $0x250] sm:$0xff] %vm622_vm1, %v4817_v60  ;;  %v5684_v8 = vld [vmem:[#allocation54_spill] sm:$0xff] }
 0x1e0   :  { %v4821_v14 = vadd.f32 %v1365_v52, %v1233_v4  ;;  %v4824_v32 = vadd.f32 %v1558_v51, %v5679_v46  ;;  %v2316_v56 = vadd.f32 %v4600_v59, %v2245_v0  ;;  %v4831_v26 = vadd.f32 %v1751_v33, %v5681_v28  ;;  %v5685_v0 = vld [vmem:[#allocation21_spill] sm:$0xff]  ;;  %v5688_v61 = vld [vmem:[#allocation143_spill] sm:$0xff] }
 0x1e1   :  { %v2008_v48 = vadd.f32 %v1944_v31, %v5683_v16  ;;  %v824_v24 = vmul.f32 %v2883_v41, %v756_v44  ;;  %v953_v4 = vmul.f32 %v2886_v42, %v756_v44  ;;  %v1146_v35 = vmul.f32 %v2892_v54, %v756_v44  ;;  %v5687_v16 = vld [vmem:[#allocation102_spill] sm:$0xff] }
 0x1e2   :  { %5678 = vst [vmem:[#allocation59_spill] sm:$0xff] %v4821_v14  ;;  %5680 = vst [vmem:[#allocation70_spill] sm:$0xff] %v4824_v32  ;;  %v1338_v52 = vmul.f32 %v2974_v43, %v756_v44  ;;  %v1531_v29 = vmul.f32 %v2984_v49, %v756_v44  ;;  %v2380_v51 = vmax.f32 %v2316_v56, 0.0  ;;  %v1724_v31 = vmul.f32 %v3003_v62, %v756_v44 }
 0x1e3   :  { %5682 = vst [vmem:[#allocation18_spill] sm:$0xff] %v4831_v26  ;;  %v2277_v33 = vsel %vm165_vm0, %v2008_v48, %v5684_v8  ;;  %v1021_v46 = vadd.f32 %v5685_v0, %v824_v24  ;;  %v1017_v26 = vadd.f32 %v953_v4, %v5687_v16  ;;  %v1210_v32 = vadd.f32 %v1146_v35, %v4556_v1  ;;  %v5691_v8 = vld [vmem:[#allocation38_spill] sm:$0xff]  ;;  %v5693_v1 = vld [vmem:[#allocation72_spill] sm:$0xff] }
 0x1e4   :  { %v4846_v28 = vadd.f32 %v4600_v59, %v2277_v33  ;;  %v1402_v14 = vadd.f32 %v1338_v52, %v1206_v12  ;;  %v5689_v22 = vmax.f32 %v5688_v61, 0.0  ;;  %v1595_v36 = vadd.f32 %v1531_v29, %v4558_v39  ;;  %v5692_v33 = vld [vmem:[#allocation22_spill] sm:$0xff]  ;;  %v5694_v61 = vld [vmem:[#allocation23_spill] sm:$0xff] }
 0x1e5   :  { %v1218_v56 = vadd.f32 %v5690_v2, %v1021_v46  ;;  %v1788_v48 = vadd.f32 %v1724_v31, %v4561_v7  ;;  %v1214_v0 = vadd.f32 %v5691_v8, %v1017_v26  ;;  %v1406_v3 = vadd.f32 %v5692_v33, %v1210_v32  ;;  %v5695_v35 = vld [vmem:[#allocation42_spill] sm:$0xff]  ;;  %v5696_v52 = vld [vmem:[#allocation43_spill] sm:$0xff]  ;;  %v909_v33 = vld [vmem:[#allocation2 + $0x210] sm:$0xff] }
 0x1e6   :  { %5686 = vst [vmem:[#allocation19_spill] sm:$0xff] %v4846_v28  ;;  %v2436_v30 = vmax.f32 %v5689_v22, %v2380_v51  ;;  %v1599_v21 = vadd.f32 %v1535_v50, %v1402_v14  ;;  %v1792_v4 = vadd.f32 %v1728_v40, %v1595_v36  ;;  %v1917_v22 = vmul.f32 %v2977_v45, %v756_v44  ;;  %v5697_v51 = vld [vmem:[#allocation12_spill] sm:$0xff]  ;;  %v5698_v46 = vld [vmem:[#allocation110_spill] sm:$0xff]  ;;  %v5700_v40 = vld [vmem:[#allocation73_spill] sm:$0xff] }
 0x1e7   :  { %v1414_v12 = vadd.f32 %v5693_v1, %v1218_v56  ;;  %v1985_v2 = vadd.f32 %v5694_v61, %v1788_v48  ;;  %v1410_v39 = vadd.f32 %v5695_v35, %v1214_v0  ;;  %v1603_v7 = vadd.f32 %v5696_v52, %v1406_v3  ;;  %v5699_v14 = vld [vmem:[#allocation48_spill] sm:$0xff]  ;;  %v5701_v16 = vld [vmem:[#allocation74_spill] sm:$0xff]  ;;  %v5704_v0 = vld [vmem:[#allocation95_spill] sm:$0xff] }
 0x1e8   :  { %2468 = vst.msk [vmem:[#allocation8 + $0x28] sm:$0xff] %vm622_vm1, %v2436_v30  ;;  %v1796_v29 = vadd.f32 %v4774_v13, %v1599_v21  ;;  %v2061_v26 = vmax.f32 %v5697_v51, %v756_v44  ;;  %v1981_v50 = vadd.f32 %v1917_v22, %v4568_v19  ;;  %v1989_v30 = vadd.f32 %v4777_v37, %v1792_v4  ;;  %v5702_v21 = vld [vmem:[#allocation25_spill] sm:$0xff]  ;;  %v5705_v1 = vld [vmem:[#allocation111_spill] sm:$0xff]  ;;  %v5706_v4 = vld [vmem:[#allocation112_spill] sm:$0xff] }
 0x1e9   :  { %v1611_v32 = vadd.f32 %v5698_v46, %v1414_v12  ;;  %v2254_v36 = vsel %vm165_vm0, %v1985_v2, %v5699_v14  ;;  %v1607_v31 = vadd.f32 %v5700_v40, %v1410_v39  ;;  %v1800_v56 = vadd.f32 %v5701_v16, %v1603_v7  ;;  %v5703_v44 = vld [vmem:[#allocation129_spill] sm:$0xff]  ;;  %v5707_v2 = vld [vmem:[#allocation82_spill] sm:$0xff]  ;;  %v1302_v40 = vld [vmem:[#allocation2 + $0x250] sm:$0xff] }
 0x1ea   :  { %v1993_v48 = vadd.f32 %v4781_v15, %v1796_v29  ;;  %v2202_v3 = vmul.f32 %v3214_v5, %v2061_v26  ;;  %v2250_v8 = vsel %vm165_vm0, %v1981_v50, %v5703_v44  ;;  %v2258_v19 = vsel %vm165_vm0, %v1989_v30, %v5704_v0  ;;  %v5708_v29 = vld [vmem:[#allocation68_spill] sm:$0xff]  ;;  %v5729_v24 = vld [vmem:[#allocation58_spill] sm:$0xff] }
 0x1eb   :  { %v1808_v13 = vadd.f32 %v5702_v21, %v1611_v32  ;;  %v2325_v37 = vadd.f32 %v4600_v59, %v2254_v36  ;;  %v1804_v12 = vadd.f32 %v5705_v1, %v1607_v31  ;;  %v1997_v22 = vadd.f32 %v5706_v4, %v1800_v56  ;;  %v5709_v50 = vld [vmem:[#allocation56_spill] sm:$0xff] }
 0x1ec   :  { %v2262_v61 = vsel %vm165_vm0, %v1993_v48, %v2198_v10  ;;  %v2321_v15 = vadd.f32 %v4600_v59, %v2250_v8  ;;  %v2329_v39 = vadd.f32 %v4600_v59, %v2258_v19  ;;  %v977_v32 = vmul.f32 %v2886_v42, %v909_v33  ;;  %v1499_v31 = vld [vmem:[#allocation2 + $0x270] sm:$0xff] }
 0x1ed   :  { %v2005_v35 = vadd.f32 %v5707_v2, %v1808_v13  ;;  %v2333_v52 = vadd.f32 %v4600_v59, %v2262_v61  ;;  %v2389_v7 = vmax.f32 %v2325_v37, 0.0  ;;  %v2001_v51 = vadd.f32 %v5708_v29, %v1804_v12  ;;  %v1696_v0 = vld [vmem:[#allocation2 + $0x290] sm:$0xff]  ;;  %v5711_v2 = vld [vmem:[#allocation103_spill] sm:$0xff] }
 0x1ee   :  { %v2266_v26 = vsel %vm165_vm0, %v1997_v22, %v2202_v3  ;;  %v2385_v46 = vmax.f32 %v2321_v15, 0.0  ;;  %v2393_v14 = vmax.f32 %v2329_v39, 0.0  ;;  %v1041_v3 = vadd.f32 %v977_v32, %v4827_v11  ;;  %v1893_v22 = vld [vmem:[#allocation2 + $0x2b0] sm:$0xff]  ;;  %v742_v32 = vld [vmem:[#allocation2 + $0xe0] sm:$0xff] }
 0x1ef   :  { %v2274_v30 = vsel %vm165_vm0, %v2005_v35, %v5709_v50  ;;  %v2337_v10 = vadd.f32 %v4600_v59, %v2266_v26  ;;  %v2397_v36 = vmax.f32 %v2333_v52, 0.0  ;;  %v2270_v16 = vsel %vm165_vm0, %v2001_v51, %v4804_v58  ;;  %v5712_v51 = vld [vmem:[#allocation144_spill] sm:$0xff]  ;;  %v875_v50 = vld [vmem:[#allocation2 + $0x100] sm:$0xff] }
 0x1f0   :  { %v2345_v56 = vadd.f32 %v4600_v59, %v2274_v30  ;;  %v2441_v48 = vmax.f32 %v2385_v46, %v2389_v7  ;;  %v2341_v21 = vadd.f32 %v4600_v59, %v2270_v16  ;;  %v1174_v8 = vmul.f32 %v4543_v27, %v2892_v54 }
 0x1f1   :  { %v2401_v13 = vmax.f32 %v2337_v10, 0.0  ;;  %v2445_v44 = vmax.f32 %v2393_v14, %v2397_v36  ;;  %v1370_v37 = vmul.f32 %v2974_v43, %v1302_v40  ;;  %v1563_v58 = vmul.f32 %v2984_v49, %v1302_v40  ;;  %v5713_v14 = vld [vmem:[#allocation145_spill] sm:$0xff] }
 0x1f2   :  { %v2409_v19 = vmax.f32 %v2345_v56, 0.0  ;;  %2473 = vst.msk [vmem:[#allocation8 + $0x50] sm:$0xff] %vm622_vm1, %v2441_v48  ;;  %v1567_v33 = vmul.f32 %v2984_v49, %v1499_v31  ;;  %v2405_v1 = vmax.f32 %v2341_v21, 0.0  ;;  %v1238_v11 = vadd.f32 %v1174_v8, %v1041_v3  ;;  %v5714_v48 = vld [vmem:[#allocation117_spill] sm:$0xff] }
 0x1f3   :  { %2477 = vst.msk [vmem:[#allocation8 + $0x70] sm:$0xff] %vm622_vm1, %v2445_v44  ;;  %v1756_v12 = vmul.f32 %v3003_v62, %v1302_v40  ;;  %v1760_v4 = vmul.f32 %v3003_v62, %v1499_v31  ;;  %v5710_v61 = vmax.f32 %v4623_v38, 0.0  ;;  %v1627_v35 = vadd.f32 %v1563_v58, %v5711_v2 }
 0x1f4   :  { %v1764_v39 = vmul.f32 %v3003_v62, %v1696_v0  ;;  %v1949_v52 = vmul.f32 %v2977_v45, %v1302_v40  ;;  %v2449_v7 = vmax.f32 %v2401_v13, %v2405_v1  ;;  %v1434_v29 = vadd.f32 %v1370_v37, %v1238_v11  ;;  %v5715_v13 = vld [vmem:[#allocation60_spill] sm:$0xff]  ;;  %v1662_v1 = vld [vmem:[#allocation2 + $0x180] sm:$0xff] }
 0x1f5   :  { %v2453_v15 = vmax.f32 %v2409_v19, %v5710_v61  ;;  %v1820_v26 = vadd.f32 %v1756_v12, %v5712_v51  ;;  %v1953_v46 = vmul.f32 %v2977_v45, %v1499_v31  ;;  %v1824_v30 = vadd.f32 %v1760_v4, %v1627_v35  ;;  %v4925_v31 = vld [vmem:[%s5340_s2] ss:$0 sm:$0xff]  ;;  %v5717_v11 = vld [vmem:[#allocation64_spill] sm:$0xff] }
 0x1f6   :  { %v1957_v38 = vmul.f32 %v2977_v45, %v1696_v0  ;;  %v1961_v10 = vmul.f32 %v2977_v45, %v1893_v22  ;;  %v2013_v36 = vadd.f32 %v1949_v52, %v5713_v14  ;;  %2481 = vst.msk [vmem:[#allocation8 + $0x90] sm:$0xff] %vm622_vm1, %v2449_v7  ;;  %v1631_v40 = vadd.f32 %v1567_v33, %v1434_v29  ;;  %v1465_v19 = vld [vmem:[#allocation2 + $0x160] sm:$0xff] }
 0x1f7   :  { %2485 = vst.msk [vmem:[#allocation8 + $0xb0] sm:$0xff] %vm622_vm1, %v2453_v15  ;;  %v2017_v16 = vadd.f32 %v1953_v46, %v1820_v26  ;;  %v2089_v56 = vmax.f32 %v4817_v60, %v4543_v27  ;;  %v586_v3 = vadd.f32 %v4925_v31, %v5714_v48  ;;  %v810_v8 = vmul.f32 %v2883_v41, %v742_v32  ;;  %v5716_v60 = vld [vmem:[#allocation71_spill] sm:$0xff]  ;;  %v1859_v15 = vld [vmem:[#allocation2 + $0x1a0] sm:$0xff]  ;;  %v5719_v48 = vld [vmem:[#allocation24_spill] sm:$0xff] }
 0x1f8   :  { %v2021_v21 = vadd.f32 %v1957_v38, %v1824_v30  ;;  %v2282_v44 = vsel %vm165_vm0, %v2013_v36, %v5715_v13  ;;  %v943_v0 = vmul.f32 %v2886_v42, %v875_v50  ;;  %v1828_v37 = vadd.f32 %v1764_v39, %v1631_v40  ;;  %v774_v46 = vld [vmem:[#allocation2 + $0x1e0] sm:$0xff] }
 0x1f9   :  { %v2230_v27 = vmul.f32 %v3214_v5, %v2089_v56  ;;  %v2286_v58 = vsel %vm165_vm0, %v2017_v16, %v5716_v60  ;;  %v2353_v33 = vadd.f32 %v4600_v59, %v2282_v44  ;;  %677 = vst.msk [vmem:[#allocation2 + $0x140] sm:$0xff] %vm622_vm1, %v586_v3  ;;  %v1140_v61 = vmul.f32 %v2892_v54, %v4565_v9  ;;  %v907_v32 = vld [vmem:[#allocation2 + $0x200] sm:$0xff]  ;;  %v5718_v56 = vld [vmem:[#allocation20_spill] sm:$0xff]  ;;  %v5721_v44 = vld [vmem:[#allocation79_spill] sm:$0xff] }
 0x1fa   :  { %v2290_v12 = vsel %vm165_vm0, %v2021_v21, %v5717_v11  ;;  %v2357_v4 = vadd.f32 %v4600_v59, %v2286_v58  ;;  %v1007_v22 = vadd.f32 %v943_v0, %v810_v8  ;;  %v2025_v2 = vadd.f32 %v1961_v10, %v1828_v37  ;;  %v4950_v14 = vld [vmem:[#allocation2 + $0x260] sm:$0xff] }
 0x1fb   :  { %v2361_v35 = vadd.f32 %v4600_v59, %v2290_v12  ;;  %v2417_v39 = vmax.f32 %v2353_v33, 0.0  ;;  %v1533_v52 = vmul.f32 %v2984_v49, %v1465_v19  ;;  %v1726_v51 = vmul.f32 %v3003_v62, %v1465_v19 }
 0x1fc   :  { %v2421_v7 = vmax.f32 %v2357_v4, 0.0  ;;  %v1204_v29 = vadd.f32 %v1140_v61, %v1007_v22  ;;  %v1730_v26 = vmul.f32 %v3003_v62, %v1662_v1  ;;  %v2294_v50 = vsel %vm165_vm0, %v2025_v2, %v2230_v27  ;;  %v5722_v2 = vld [vmem:[#allocation146_spill] sm:$0xff] }
 0x1fd   :  { %v2425_v30 = vmax.f32 %v2361_v35, 0.0  ;;  %v1923_v38 = vmul.f32 %v2977_v45, %v1662_v1  ;;  %v1927_v10 = vmul.f32 %v2977_v45, %v1859_v15  ;;  %v2365_v36 = vadd.f32 %v4600_v59, %v2294_v50  ;;  %v5724_v50 = vld [vmem:[#allocation101_spill] sm:$0xff] }
 0x1fe   :  { %v2457_v40 = vmax.f32 %v2417_v39, %v2421_v7  ;;  %v2055_v16 = vmax.f32 %v586_v3, %v4565_v9  ;;  %v5720_v21 = vmax.f32 %v5718_v56, %v5719_v48  ;;  %v4962_v8 = vadd.f32 %v4925_v31, %v5721_v44  ;;  %v5723_v39 = vld [vmem:[#allocation26_spill] sm:$0xff]  ;;  %v5727_v48 = vld [vmem:[#allocation13_spill] sm:$0xff]  ;;  %v5728_v44 = vld [vmem:[#allocation40_spill] sm:$0xff] }
 0x1ff   :  { %v842_v0 = vmul.f32 %v2883_v41, %v774_v46  ;;  %v975_v19 = vmul.f32 %v2886_v42, %v907_v32  ;;  %v1172_v37 = vmul.f32 %v4595_v53, %v2892_v54  ;;  %v2429_v27 = vmax.f32 %v2365_v36, 0.0 }
 0x200   :  { %v4958_v13 = vmul.f32 %v3214_v5, %v5720_v21  ;;  %2489 = vst.msk [vmem:[#allocation8 + $0xd0] sm:$0xff] %vm622_vm1, %v2457_v40  ;;  %v754_v9 = vld [vmem:[#allocation2 + $0x140] sm:$0xff]  ;;  %v2196_v3 = vmul.f32 %v3214_v5, %v2055_v16  ;;  %v4972_v60 = vmul.f32 %v2984_v49, %v4950_v14  ;;  %v4976_v58 = vmul.f32 %v3003_v62, %v4950_v14  ;;  %v5725_v40 = vld [vmem:[#allocation147_spill] sm:$0xff] }
 0x201   :  { %v822_v33 = vmul.f32 %v2883_v41, %v754_v9  ;;  %v951_v1 = vmul.f32 %v2886_v42, %v754_v9  ;;  %v1144_v11 = vmul.f32 %v2892_v54, %v754_v9  ;;  %v1336_v12 = vmul.f32 %v2974_v43, %v754_v9  ;;  %709 = vst.msk [vmem:[#allocation2 + $0x240] sm:$0xff] %vm622_vm1, %v4962_v8 }
 0x202   :  { %v2461_v4 = vmax.f32 %v2425_v30, %v2429_v27  ;;  %v1529_v22 = vmul.f32 %v2984_v49, %v754_v9  ;;  %v1722_v61 = vmul.f32 %v3003_v62, %v754_v9  ;;  %v1915_v15 = vmul.f32 %v2977_v45, %v754_v9  ;;  %v5726_v30 = vld [vmem:[#allocation148_spill] sm:$0xff] }
 0x203   :  { %v1015_v35 = vadd.f32 %v951_v1, %v5722_v2  ;;  %v1019_v7 = vadd.f32 %v5723_v39, %v822_v33  ;;  %v1208_v46 = vadd.f32 %v1144_v11, %v4605_v17  ;;  %v1400_v32 = vadd.f32 %v1336_v12, %v1204_v29  ;;  %v5730_v1 = vld [vmem:[#allocation27_spill] sm:$0xff]  ;;  %v5731_v17 = vld [vmem:[#allocation28_spill] sm:$0xff] }
 0x204   :  { %2493 = vst.msk [vmem:[#allocation8 + $0xf0] sm:$0xff] %vm622_vm1, %v2461_v4  ;;  %v1593_v36 = vadd.f32 %v1529_v22, %v5724_v50  ;;  %v1786_v16 = vadd.f32 %v1722_v61, %v5725_v40  ;;  %v1979_v56 = vadd.f32 %v1915_v15, %v5726_v30  ;;  %v2059_v21 = vmax.f32 %v5727_v48, %v754_v9  ;;  %v5732_v12 = vld [vmem:[#allocation63_spill] sm:$0xff]  ;;  %v5733_v22 = vld [vmem:[#allocation44_spill] sm:$0xff]  ;;  %v5734_v15 = vld [vmem:[#allocation77_spill] sm:$0xff] }
 0x205   :  { %v1212_v27 = vadd.f32 %v5728_v44, %v1015_v35  ;;  %v1216_v28 = vadd.f32 %v5729_v24, %v1019_v7  ;;  %v1404_v2 = vadd.f32 %v5730_v1, %v1208_v46  ;;  %v1597_v33 = vadd.f32 %v1533_v52, %v1400_v32  ;;  %v5735_v9 = vld [vmem:[#allocation45_spill] sm:$0xff]  ;;  %v5736_v24 = vld [vmem:[#allocation134_spill] sm:$0xff]  ;;  %v5737_v46 = vld [vmem:[#allocation80_spill] sm:$0xff] }
 0x206   :  { %v1790_v39 = vadd.f32 %v1726_v51, %v1593_v36  ;;  %v1983_v29 = vadd.f32 %v5731_v17, %v1786_v16  ;;  %v2200_v11 = vmul.f32 %v3214_v5, %v2059_v21  ;;  %v2248_v4 = vsel %vm165_vm0, %v1979_v56, %v5732_v12  ;;  %v5738_v36 = vld [vmem:[#allocation41_spill] sm:$0xff] }
 0x207   :  { %v1408_v61 = vadd.f32 %v5733_v22, %v1212_v27  ;;  %v1412_v50 = vadd.f32 %v5734_v15, %v1216_v28  ;;  %v1601_v40 = vadd.f32 %v5735_v9, %v1404_v2  ;;  %v1794_v35 = vadd.f32 %v1730_v26, %v1597_v33  ;;  %v5739_v48 = vld [vmem:[#allocation81_spill] sm:$0xff]  ;;  %v5740_v27 = vld [vmem:[#allocation99_spill] sm:$0xff] }
 0x208   :  { %v1987_v30 = vadd.f32 %v1923_v38, %v1790_v39  ;;  %v2252_v7 = vsel %vm165_vm0, %v1983_v29, %v5736_v24  ;;  %v2319_v52 = vadd.f32 %v4600_v59, %v2248_v4  ;;  %v1039_v51 = vadd.f32 %v975_v19, %v842_v0  ;;  %v1300_v44 = vld [vmem:[#allocation2 + $0x240] sm:$0xff]  ;;  %v5741_v2 = vld [vmem:[#allocation51_spill] sm:$0xff] }
 0x209   :  { %v1605_v32 = vadd.f32 %v5737_v46, %v1408_v61  ;;  %v1609_v16 = vadd.f32 %v5738_v36, %v1412_v50  ;;  %v1798_v56 = vadd.f32 %v5739_v48, %v1601_v40  ;;  %v1991_v21 = vadd.f32 %v1927_v10, %v1794_v35  ;;  %v5742_v39 = vld [vmem:[#allocation114_spill] sm:$0xff]  ;;  %v5743_v0 = vld [vmem:[#allocation119_spill] sm:$0xff]  ;;  %v5744_v61 = vld [vmem:[#allocation92_spill] sm:$0xff] }
 0x20a   :  { %v2256_v28 = vsel %vm165_vm0, %v1987_v30, %v5740_v27  ;;  %v2323_v26 = vadd.f32 %v4600_v59, %v2252_v7  ;;  %v2383_v38 = vmax.f32 %v2319_v52, 0.0  ;;  %v1236_v1 = vadd.f32 %v1172_v37, %v1039_v51  ;;  %v5745_v50 = vld [vmem:[#allocation87_spill] sm:$0xff]  ;;  %v1694_v7 = vld [vmem:[#allocation2 + $0x280] sm:$0xff]  ;;  %v5746_v51 = vld [vmem:[#allocation69_spill] sm:$0xff] }
 0x20b   :  { %v1802_v33 = vadd.f32 %v5741_v2, %v1605_v32  ;;  %v1806_v17 = vadd.f32 %v5742_v39, %v1609_v16  ;;  %v1995_v19 = vadd.f32 %v5743_v0, %v1798_v56  ;;  %v2260_v29 = vsel %vm165_vm0, %v1991_v21, %v2196_v3  ;;  %v1891_v21 = vld [vmem:[#allocation2 + $0x2a0] sm:$0xff]  ;;  %v745_v0 = vld [vmem:[#allocation2 + $0xf8] sm:$0xff] }
 0x20c   :  { %v2327_v12 = vadd.f32 %v4600_v59, %v2256_v28  ;;  %v2331_v10 = vadd.f32 %v4600_v59, %v2260_v29  ;;  %v2387_v4 = vmax.f32 %v2323_v26, 0.0  ;;  %v1368_v22 = vmul.f32 %v2974_v43, %v1300_v44 }
 0x20d   :  { %v1999_v15 = vadd.f32 %v5744_v61, %v1802_v33  ;;  %v2003_v9 = vadd.f32 %v5745_v50, %v1806_v17  ;;  %v2264_v37 = vsel %vm165_vm0, %v1995_v19, %v2200_v11  ;;  %v1561_v40 = vmul.f32 %v2984_v49, %v1300_v44  ;;  %v878_v19 = vld [vmem:[#allocation2 + $0x118] sm:$0xff]  ;;  %v5749_v50 = vld [vmem:[#allocation67_spill] sm:$0xff] }
 0x20e   :  { %v2335_v35 = vadd.f32 %v4600_v59, %v2264_v37  ;;  %v2391_v30 = vmax.f32 %v2327_v12, 0.0  ;;  %v2395_v24 = vmax.f32 %v2331_v10, 0.0  ;;  %v2439_v3 = vmax.f32 %v2383_v38, %v2387_v4 }
 0x20f   :  { %v2268_v52 = vsel %vm165_vm0, %v1999_v15, %v4958_v13  ;;  %v2272_v46 = vsel %vm165_vm0, %v2003_v9, %v5746_v51  ;;  %v1432_v32 = vadd.f32 %v1368_v22, %v1236_v1  ;;  %v1625_v36 = vadd.f32 %v1561_v40, %v4637_v25  ;;  %v5751_v40 = vld [vmem:[#allocation108_spill] sm:$0xff] }
 0x210   :  { %v2339_v16 = vadd.f32 %v4600_v59, %v2268_v52  ;;  %v2343_v11 = vadd.f32 %v4600_v59, %v2272_v46  ;;  %v2399_v48 = vmax.f32 %v2335_v35, 0.0  ;;  %v2443_v56 = vmax.f32 %v2391_v30, %v2395_v24  ;;  %2471 = vst.msk [vmem:[#allocation8 + $0x40] sm:$0xff] %vm622_vm1, %v2439_v3  ;;  %v1665_v3 = vld [vmem:[#allocation2 + $0x198] sm:$0xff] }
 0x211   :  { %v1629_v27 = vadd.f32 %v4972_v60, %v1432_v32  ;;  %v1754_v28 = vmul.f32 %v3003_v62, %v1300_v44  ;;  %v1762_v13 = vmul.f32 %v3003_v62, %v1694_v7  ;;  %v1822_v26 = vadd.f32 %v4976_v58, %v1625_v36  ;;  %v1862_v32 = vld [vmem:[#allocation2 + $0x1b8] sm:$0xff] }
 0x212   :  { %v2403_v38 = vmax.f32 %v2339_v16, 0.0  ;;  %v2407_v1 = vmax.f32 %v2343_v11, 0.0  ;;  %2475 = vst.msk [vmem:[#allocation8 + $0x60] sm:$0xff] %vm622_vm1, %v2443_v56  ;;  %v1947_v25 = vmul.f32 %v2977_v45, %v1300_v44  ;;  %v1951_v2 = vmul.f32 %v2977_v45, %v4950_v14  ;;  %v777_v56 = vld [vmem:[#allocation2 + $0x1f8] sm:$0xff] }
 0x213   :  { %v1818_v33 = vadd.f32 %v1754_v28, %v4645_v20  ;;  %v1826_v39 = vadd.f32 %v1762_v13, %v1629_v27  ;;  %v1955_v60 = vmul.f32 %v2977_v45, %v1694_v7  ;;  %v1959_v17 = vmul.f32 %v2977_v45, %v1891_v21  ;;  %v5748_v20 = vld [vmem:[#allocation135_spill] sm:$0xff] }
 0x214   :  { %v2447_v29 = vmax.f32 %v2399_v48, %v2403_v38  ;;  %v5747_v58 = vmax.f32 %v4679_v23, 0.0  ;;  %v2011_v10 = vadd.f32 %v1947_v25, %v4648_v57  ;;  %v2087_v44 = vmax.f32 %v4962_v8, %v4595_v53  ;;  %v1468_v53 = vld [vmem:[#allocation2 + $0x178] sm:$0xff] }
 0x215   :  { %v2015_v4 = vadd.f32 %v1951_v2, %v1818_v33  ;;  %v2019_v14 = vadd.f32 %v1955_v60, %v1822_v26  ;;  %v2023_v22 = vadd.f32 %v1959_v17, %v1826_v39  ;;  %v589_v61 = vadd.f32 %v4925_v31, %v5748_v20  ;;  %v5750_v8 = vld [vmem:[#allocation57_spill] sm:$0xff]  ;;  %v5752_v17 = vld [vmem:[#allocation46_spill] sm:$0xff] }
 0x216   :  { %v2451_v12 = vmax.f32 %v2407_v1, %v5747_v58  ;;  %2479 = vst.msk [vmem:[#allocation8 + $0x80] sm:$0xff] %vm622_vm1, %v2447_v29  ;;  %v2228_v15 = vmul.f32 %v3214_v5, %v2087_v44  ;;  %v2280_v23 = vsel %vm165_vm0, %v2011_v10, %v5749_v50  ;;  %v813_v57 = vmul.f32 %v2883_v41, %v745_v0  ;;  %v910_v26 = vld [vmem:[#allocation2 + $0x218] sm:$0xff]  ;;  %v5755_v58 = vld [vmem:[#allocation94_spill] sm:$0xff] }
 0x217   :  { %v946_v9 = vmul.f32 %v2886_v42, %v878_v19  ;;  %v2284_v37 = vsel %vm165_vm0, %v2015_v4, %v5750_v8  ;;  %v2288_v35 = vsel %vm165_vm0, %v2019_v14, %v5751_v40  ;;  %v2351_v30 = vadd.f32 %v4600_v59, %v2280_v23  ;;  %680 = vst.msk [vmem:[#allocation2 + $0x158] sm:$0xff] %vm622_vm1, %v589_v61  ;;  %v1500_v33 = vld [vmem:[#allocation2 + $0x278] sm:$0xff] }
 0x218   :  { %2483 = vst.msk [vmem:[#allocation8 + $0xa0] sm:$0xff] %vm622_vm1, %v2451_v12  ;;  %v1143_v24 = vmul.f32 %v2892_v54, %v4631_v55  ;;  %v2292_v7 = vsel %vm165_vm0, %v2023_v22, %v2228_v15  ;;  %v2355_v52 = vadd.f32 %v4600_v59, %v2284_v37  ;;  %v2359_v51 = vadd.f32 %v4600_v59, %v2288_v35  ;;  %v5077_v39 = vld [vmem:[#allocation2 + $0x298] sm:$0xff]  ;;  %v5756_v35 = vld [vmem:[#allocation15_spill] sm:$0xff] }
 0x219   :  { %v1010_v46 = vadd.f32 %v946_v9, %v813_v57  ;;  %v2363_v36 = vadd.f32 %v4600_v59, %v2292_v7  ;;  %v2415_v16 = vmax.f32 %v2351_v30, 0.0  ;;  %v1536_v11 = vmul.f32 %v2984_v49, %v1468_v53  ;;  %v5753_v0 = vld [vmem:[#allocation29_spill] sm:$0xff]  ;;  %v5758_v7 = vld [vmem:[#allocation31_spill] sm:$0xff] }
 0x21a   :  { %v1729_v48 = vmul.f32 %v3003_v62, %v1468_v53  ;;  %v2419_v21 = vmax.f32 %v2355_v52, 0.0  ;;  %v2423_v27 = vmax.f32 %v2359_v51, 0.0  ;;  %v1733_v13 = vmul.f32 %v3003_v62, %v1665_v3 }
 0x21b   :  { %v1207_v28 = vadd.f32 %v1143_v24, %v1010_v46  ;;  %v2427_v38 = vmax.f32 %v2363_v36, 0.0  ;;  %v1926_v1 = vmul.f32 %v2977_v45, %v1665_v3  ;;  %v1930_v25 = vmul.f32 %v2977_v45, %v1862_v32  ;;  %v5757_v24 = vld [vmem:[#allocation83_spill] sm:$0xff] }
 0x21c   :  { %v2058_v2 = vmax.f32 %v589_v61, %v4631_v55  ;;  %v2455_v60 = vmax.f32 %v2415_v16, %v2419_v21  ;;  %v5754_v19 = vmax.f32 %v5752_v17, %v5753_v0  ;;  %v5087_v12 = vadd.f32 %v4925_v31, %v5755_v58  ;;  %v5759_v21 = vld [vmem:[#allocation47_spill] sm:$0xff]  ;;  %v5762_v0 = vld [vmem:[#allocation34_spill] sm:$0xff]  ;;  %v5764_v58 = vld [vmem:[#allocation61_spill] sm:$0xff] }
 0x21d   :  { %v845_v10 = vmul.f32 %v2883_v41, %v777_v56  ;;  %v2459_v44 = vmax.f32 %v2423_v27, %v2427_v38  ;;  %v978_v55 = vmul.f32 %v2886_v42, %v910_v26  ;;  %v1175_v14 = vmul.f32 %v4674_v63, %v2892_v54  ;;  %v5760_v26 = vld [vmem:[#allocation76_spill] sm:$0xff] }
 0x21e   :  { %v5083_v29 = vmul.f32 %v3214_v5, %v5754_v19  ;;  %v2199_v4 = vmul.f32 %v3214_v5, %v2058_v2  ;;  %2487 = vst.msk [vmem:[#allocation8 + $0xc0] sm:$0xff] %vm622_vm1, %v2455_v60  ;;  %v757_v22 = vld [vmem:[#allocation2 + $0x158] sm:$0xff]  ;;  %712 = vst.msk [vmem:[#allocation2 + $0x258] sm:$0xff] %vm622_vm1, %v5087_v12  ;;  %v5098_v20 = vmul.f32 %v2984_v49, %v1500_v33  ;;  %v5761_v2 = vld [vmem:[#allocation32_spill] sm:$0xff] }
 0x21f   :  { %v5101_v61 = vmul.f32 %v3003_v62, %v1500_v33  ;;  %v5105_v15 = vmul.f32 %v3003_v62, %v5077_v39  ;;  %v5108_v50 = vmul.f32 %v2977_v45, %v1500_v33  ;;  %2491 = vst.msk [vmem:[#allocation8 + $0xe0] sm:$0xff] %vm622_vm1, %v2459_v44  ;;  %v825_v23 = vmul.f32 %v2883_v41, %v757_v22  ;;  %v5765_v44 = vld [vmem:[#allocation96_spill] sm:$0xff] }
 0x220   :  { %v954_v57 = vmul.f32 %v2886_v42, %v757_v22  ;;  %v1147_v9 = vmul.f32 %v2892_v54, %v757_v22  ;;  %v1339_v53 = vmul.f32 %v2974_v43, %v757_v22  ;;  %v1532_v8 = vmul.f32 %v2984_v49, %v757_v22 }
 0x221   :  { %v1725_v37 = vmul.f32 %v3003_v62, %v757_v22  ;;  %v1918_v40 = vmul.f32 %v2977_v45, %v757_v22  ;;  %v2062_v30 = vmax.f32 %v5756_v35, %v757_v22  ;;  %v1022_v52 = vadd.f32 %v5758_v7, %v825_v23  ;;  %v5766_v22 = vld [vmem:[#allocation62_spill] sm:$0xff]  ;;  %v5771_v7 = vld [vmem:[#allocation55_spill] sm:$0xff] }
 0x222   :  { %v1018_v3 = vadd.f32 %v954_v57, %v5757_v24  ;;  %v1211_v51 = vadd.f32 %v1147_v9, %v4669_v18  ;;  %v1403_v46 = vadd.f32 %v1339_v53, %v1207_v28  ;;  %v1596_v32 = vadd.f32 %v1532_v8, %v4687_v47  ;;  %v5763_v18 = vld [vmem:[#allocation130_spill] sm:$0xff]  ;;  %v5767_v8 = vld [vmem:[#allocation85_spill] sm:$0xff] }
 0x223   :  { %v1789_v36 = vadd.f32 %v1725_v37, %v4682_v34  ;;  %v1982_v16 = vadd.f32 %v1918_v40, %v4685_v6  ;;  %v2203_v56 = vmul.f32 %v3214_v5, %v2062_v30  ;;  %v1219_v38 = vadd.f32 %v5760_v26, %v1022_v52  ;;  %v5768_v40 = vld [vmem:[#allocation97_spill] sm:$0xff]  ;;  %v5769_v30 = vld [vmem:[#allocation123_spill] sm:$0xff] }
 0x224   :  { %v1215_v27 = vadd.f32 %v5759_v21, %v1018_v3  ;;  %v1407_v33 = vadd.f32 %v5761_v2, %v1211_v51  ;;  %v1600_v60 = vadd.f32 %v1536_v11, %v1403_v46  ;;  %v1793_v17 = vadd.f32 %v1729_v48, %v1596_v32  ;;  %v5772_v46 = vld [vmem:[#allocation124_spill] sm:$0xff] }
 0x225   :  { %v1986_v19 = vadd.f32 %v5762_v0, %v1789_v36  ;;  %v2251_v28 = vsel %vm165_vm0, %v1982_v16, %v5763_v18  ;;  %v1042_v47 = vadd.f32 %v978_v55, %v845_v10  ;;  %v1415_v6 = vadd.f32 %v5765_v44, %v1219_v38  ;;  %v1303_v9 = vld [vmem:[#allocation2 + $0x258] sm:$0xff]  ;;  %v5770_v10 = vld [vmem:[#allocation98_spill] sm:$0xff]  ;;  %v5773_v36 = vld [vmem:[#allocation132_spill] sm:$0xff] }
 0x226   :  { %v1411_v34 = vadd.f32 %v5764_v58, %v1215_v27  ;;  %v1604_v23 = vadd.f32 %v5766_v22, %v1407_v33  ;;  %v1797_v57 = vadd.f32 %v1733_v13, %v1600_v60  ;;  %v1990_v53 = vadd.f32 %v1926_v1, %v1793_v17  ;;  %v5775_v33 = vld [vmem:[#allocation133_spill] sm:$0xff]  ;;  %v5776_v17 = vld [vmem:[#allocation140_spill] sm:$0xff]  ;;  %v5778_v22 = vld [vmem:[#allocation118_spill] sm:$0xff] }
 0x227   :  { %v2255_v37 = vsel %vm165_vm0, %v1986_v19, %v5767_v8  ;;  %v2322_v11 = vadd.f32 %v4600_v59, %v2251_v28  ;;  %v1239_v48 = vadd.f32 %v1175_v14, %v1042_v47  ;;  %v1612_v24 = vadd.f32 %v5769_v30, %v1415_v6  ;;  %v5774_v14 = vld [vmem:[#allocation125_spill] sm:$0xff]  ;;  %v5777_v44 = vld [vmem:[#allocation88_spill] sm:$0xff] }
 0x228   :  { %v1608_v35 = vadd.f32 %v5768_v40, %v1411_v34  ;;  %v1801_v55 = vadd.f32 %v5770_v10, %v1604_v23  ;;  %v1994_v3 = vadd.f32 %v1930_v25, %v1797_v57  ;;  %v2259_v52 = vsel %vm165_vm0, %v1990_v53, %v5771_v7  ;;  %v1894_v53 = vld [vmem:[#allocation2 + $0x2b8] sm:$0xff]  ;;  %v743_v10 = vld [vmem:[#allocation2 + $0xe8] sm:$0xff] }
 0x229   :  { %v2326_v13 = vadd.f32 %v4600_v59, %v2255_v37  ;;  %v2386_v51 = vmax.f32 %v2322_v11, 0.0  ;;  %v1371_v1 = vmul.f32 %v2974_v43, %v1303_v9  ;;  %v1809_v16 = vadd.f32 %v5773_v36, %v1612_v24  ;;  %v5780_v7 = vld [vmem:[#allocation137_spill] sm:$0xff] }
 0x22a   :  { %v1805_v32 = vadd.f32 %v5772_v46, %v1608_v35  ;;  %v1998_v21 = vadd.f32 %v5774_v14, %v1801_v55  ;;  %v2263_v27 = vsel %vm165_vm0, %v1994_v3, %v2199_v4  ;;  %v2330_v26 = vadd.f32 %v4600_v59, %v2259_v52  ;;  %v5779_v55 = vld [vmem:[#allocation136_spill] sm:$0xff]  ;;  %v5782_v46 = vld [vmem:[#allocation139_spill] sm:$0xff] }
 0x22b   :  { %v2334_v25 = vadd.f32 %v4600_v59, %v2263_v27  ;;  %v2390_v38 = vmax.f32 %v2326_v13, 0.0  ;;  %v1435_v2 = vadd.f32 %v1371_v1, %v1239_v48  ;;  %v2006_v0 = vadd.f32 %v5776_v17, %v1809_v16  ;;  %v876_v13 = vld [vmem:[#allocation2 + $0x108] sm:$0xff] }
 0x22c   :  { %v2002_v60 = vadd.f32 %v5775_v33, %v1805_v32  ;;  %v2267_v19 = vsel %vm165_vm0, %v1998_v21, %v2203_v56  ;;  %v1564_v18 = vmul.f32 %v2984_v49, %v1303_v9  ;;  %v2394_v47 = vmax.f32 %v2330_v26, 0.0  ;;  %v1466_v14 = vld [vmem:[#allocation2 + $0x168] sm:$0xff] }
 0x22d   :  { %v2338_v28 = vadd.f32 %v4600_v59, %v2267_v19  ;;  %v2398_v58 = vmax.f32 %v2334_v25, 0.0  ;;  %v2442_v34 = vmax.f32 %v2386_v51, %v2390_v38  ;;  %v2275_v6 = vsel %vm165_vm0, %v2006_v0, %v5777_v44  ;;  %v5181_v51 = vld [vmem:[#allocation2 + $0x128] sm:$0xff]  ;;  %v5785_v25 = vld [vmem:[#allocation138_spill] sm:$0xff] }
 0x22e   :  { %v2271_v4 = vsel %vm165_vm0, %v2002_v60, %v5083_v29  ;;  %v1628_v23 = vadd.f32 %v1564_v18, %v5778_v22  ;;  %v1632_v57 = vadd.f32 %v5098_v20, %v1435_v2  ;;  %v2346_v8 = vadd.f32 %v4600_v59, %v2275_v6  ;;  %v5784_v26 = vld [vmem:[#allocation115_spill] sm:$0xff]  ;;  %v5786_v0 = vld [vmem:[#allocation86_spill] sm:$0xff] }
 0x22f   :  { %v2342_v56 = vadd.f32 %v4600_v59, %v2271_v4  ;;  %v2402_v37 = vmax.f32 %v2338_v28, 0.0  ;;  %v2446_v11 = vmax.f32 %v2394_v47, %v2398_v58  ;;  %2474 = vst.msk [vmem:[#allocation8 + $0x58] sm:$0xff] %vm622_vm1, %v2442_v34  ;;  %v1757_v48 = vmul.f32 %v3003_v62, %v1303_v9  ;;  %v1663_v17 = vld [vmem:[#allocation2 + $0x188] sm:$0xff] }
 0x230   :  { %v1825_v29 = vadd.f32 %v5101_v61, %v1628_v23  ;;  %v1829_v40 = vadd.f32 %v5105_v15, %v1632_v57  ;;  %v1950_v35 = vmul.f32 %v2977_v45, %v1303_v9  ;;  %v2410_v24 = vmax.f32 %v2346_v8, 0.0  ;;  %v5781_v15 = vld [vmem:[#allocation100_spill] sm:$0xff]  ;;  %v1860_v58 = vld [vmem:[#allocation2 + $0x1a8] sm:$0xff] }
 0x231   :  { %v2406_v30 = vmax.f32 %v2342_v56, 0.0  ;;  %2478 = vst.msk [vmem:[#allocation8 + $0x78] sm:$0xff] %vm622_vm1, %v2446_v11  ;;  %v1958_v20 = vmul.f32 %v2977_v45, %v5077_v39  ;;  %v1962_v59 = vmul.f32 %v2977_v45, %v1894_v53  ;;  %v1821_v3 = vadd.f32 %v1757_v48, %v5779_v55  ;;  %v775_v22 = vld [vmem:[#allocation2 + $0x1e8] sm:$0xff] }
 0x232   :  { %v2014_v52 = vadd.f32 %v1950_v35, %v5780_v7  ;;  %v2090_v61 = vmax.f32 %v5087_v12, %v4674_v63  ;;  %v5179_v9 = vadd.f32 %v4925_v31, %v5781_v15  ;;  %v5783_v39 = vmax.f32 %v5782_v46, 0.0  ;;  %v908_v8 = vld [vmem:[#allocation2 + $0x208] sm:$0xff] }
 0x233   :  { %v2450_v1 = vmax.f32 %v2402_v37, %v2406_v30  ;;  %v2022_v36 = vadd.f32 %v1958_v20, %v1825_v29  ;;  %v2026_v16 = vadd.f32 %v1962_v59, %v1829_v40  ;;  %v2018_v21 = vadd.f32 %v5108_v50, %v1821_v3  ;;  %v5199_v50 = vld [vmem:[%s5343_s5] ss:$0 sm:$0xff]  ;;  %v5215_v37 = vld [vmem:[#allocation2 + $0x228] sm:$0xff]  ;;  %v5787_v30 = vld [vmem:[#allocation49_spill] sm:$0xff]  ;;  %s2751_s5 = smov [#allocation8]  }
 0x234   :  { %v2454_v32 = vmax.f32 %v2410_v24, %v5783_v39  ;;  %v2231_v27 = vmul.f32 %v3214_v5, %v2090_v61  ;;  %v2283_v63 = vsel %vm165_vm0, %v2014_v52, %v5784_v26  ;;  %678 = vst.msk [vmem:[#allocation2 + $0x148] sm:$0xff] %vm622_vm1, %v5179_v9  ;;  %v811_v12 = vmul.f32 %v2883_v41, %v743_v10  ;;  %v5788_v24 = vld [vmem:[#allocation33_spill] sm:$0xff]  ;;  %s2500_s15 = sshll.u32 %s2751_s5, 4  ;;  %s2501_s15 = int_to_ptr.vmem [resolvable:$true] %s2500_s15 }
 0x235   :  { %2482 = vst.msk [vmem:[#allocation8 + $0x98] sm:$0xff] %vm622_vm1, %v2450_v1  ;;  %v2291_v38 = vsel %vm165_vm0, %v2022_v36, %v5785_v25  ;;  %v2354_v2 = vadd.f32 %v5199_v50, %v2283_v63  ;;  %v944_v33 = vmul.f32 %v2886_v42, %v876_v13  ;;  %v1141_v60 = vmul.f32 %v2892_v54, %v5181_v51  ;;  %v5790_v10 = vld [vmem:[#allocation109_spill] sm:$0xff]  ;;  %v5795_v63 = vld [vmem:[#allocation30_spill] sm:$0xff]  ;;  %s2715_s16 = scalar_lea.vmem %s2501_s15, 4096  ;;  %p2720_p3 = scmp.lt.s32.totalorder %s2501_s15, %s2501_s15 }
 0x236   :  { %2486 = vst.msk [vmem:[#allocation8 + $0xb8] sm:$0xff] %vm622_vm1, %v2454_v32  ;;  %v2287_v19 = vsel %vm165_vm0, %v2018_v21, %v5786_v0  ;;  %v2295_v18 = vsel %vm165_vm0, %v2026_v16, %v2231_v27  ;;  %v2362_v28 = vadd.f32 %v5199_v50, %v2291_v38  ;;  %v1534_v47 = vmul.f32 %v2984_v49, %v1466_v14  ;;  %v5794_v21 = vld [vmem:[#allocation113_spill] sm:$0xff]  ;;  %p2716_p2 = scmp.ne.s32.totalorder %s2501_s15, %s2715_s16  ;;  %p2721_p4 = scmp.lt.s32.totalorder %s2715_s16, %s2715_s16 }
 0x237   :  { %v2358_v34 = vadd.f32 %v5199_v50, %v2287_v19  ;;  %v2366_v4 = vadd.f32 %v5199_v50, %v2295_v18  ;;  %v2418_v44 = vmax.f32 %v2354_v2, 0.0  ;;  %v1008_v6 = vadd.f32 %v944_v33, %v811_v12  ;;  %v5796_v25 = vld [vmem:[#allocation53_spill] sm:$0xff]  ;;  %v5797_v2 = vld [vmem:[#allocation120_spill] sm:$0xff] }
 0x238   :  { %v2426_v23 = vmax.f32 %v2362_v28, 0.0  ;;  %v1727_v57 = vmul.f32 %v3003_v62, %v1466_v14  ;;  %v1731_v53 = vmul.f32 %v3003_v62, %v1663_v17  ;;  %v1924_v56 = vmul.f32 %v2977_v45, %v1663_v17  ;;  %v5798_v17 = vld [vmem:[#allocation50_spill] sm:$0xff]  ;;  %v5799_v19 = vld [vmem:[#allocation89_spill] sm:$0xff]  ;;  %v5800_v28 = vld [vmem:[#allocation36_spill] sm:$0xff]  ;;  %p2722_p5 = por %p2721_p4, %p2720_p3 }
 0x239   :  { %v2422_v11 = vmax.f32 %v2358_v34, 0.0  ;;  %v2430_v48 = vmax.f32 %v2366_v4, 0.0  ;;  %v1205_v29 = vadd.f32 %v1141_v60, %v1008_v6  ;;  %v1928_v40 = vmul.f32 %v2977_v45, %v1860_v58 }
 0x23a   :  { %v2056_v35 = vmax.f32 %v5179_v9, %v5181_v51  ;;  %v5789_v20 = vmax.f32 %v5787_v30, %v5788_v24  ;;  %v5228_v55 = vadd.f32 %v4925_v31, %v5790_v10  ;;  %v843_v3 = vmul.f32 %v2883_v41, %v775_v22  ;;  %p2723_p6 = pnand %p2722_p5, %p2716_p2 }
 0x23b   :  { %v2458_v7 = vmax.f32 %v2418_v44, %v2422_v11  ;;  %v2462_v52 = vmax.f32 %v2426_v23, %v2430_v48  ;;  %v755_v61 = vld [vmem:[#allocation2 + $0x148] sm:$0xff]  ;;  %v976_v15 = vmul.f32 %v2886_v42, %v908_v8  ;;  %v1173_v9 = vmul.f32 %v2892_v54, %v5215_v37  ;;  %v5801_v44 = vld [vmem:[#allocation37_spill] sm:$0xff]  ;;  %v5802_v23 = vld [vmem:[#allocation14_spill] sm:$0xff] }
 0x23c   :  { %v5224_v59 = vmul.f32 %v3214_v5, %v5789_v20  ;;  %v823_v13 = vmul.f32 %v2883_v41, %v755_v61  ;;  %v952_v51 = vmul.f32 %v2886_v42, %v755_v61  ;;  %v1145_v1 = vmul.f32 %v2892_v54, %v755_v61  ;;  %710 = vst.msk [vmem:[#allocation2 + $0x248] sm:$0xff] %vm622_vm1, %v5228_v55  ;;  %v5791_v41 = vld [vmem:[#allocation17_spill] sm:$0xff]  ;;  %v5793_v54 = vld [vmem:[#allocation35_spill] sm:$0xff] }
 0x23d   :  { %v1337_v46 = vmul.f32 %v2974_v43, %v755_v61  ;;  %2490 = vst.msk [vmem:[#allocation8 + $0xd8] sm:$0xff] %vm622_vm1, %v2458_v7  ;;  %2494 = vst.msk [vmem:[#allocation8 + $0xf8] sm:$0xff] %vm622_vm1, %v2462_v52  ;;  %v1530_v31 = vmul.f32 %v2984_v49, %v755_v61  ;;  %v1723_v39 = vmul.f32 %v3003_v62, %v755_v61  ;;  %v5792_v42 = vld [vmem:[#allocation121_spill] sm:$0xff]  ;;  %v5806_v7 = vld [vmem:[#allocation122_spill] sm:$0xff] }
 0x23e   :  { %v1916_v32 = vmul.f32 %v2977_v45, %v755_v61  ;;  %v2060_v36 = vmax.f32 %v5791_v41, %v755_v61  ;;  %v1016_v16 = vadd.f32 %v952_v51, %v5792_v42  ;;  %v1020_v14 = vadd.f32 %v5793_v54, %v823_v13  ;;  %v5803_v11 = vld [vmem:[#allocation65_spill] sm:$0xff]  ;;  %v5807_v61 = vld [vmem:[#allocation106_spill] sm:$0xff]  ;;  %v5810_v41 = vld [vmem:[#allocation84_spill] sm:$0xff] }
 0x23f   :  { %v1209_v27 = vadd.f32 %v1145_v1, %v5794_v21  ;;  %v1401_v26 = vadd.f32 %v1337_v46, %v1205_v29  ;;  %v1594_v12 = vadd.f32 %v1530_v31, %v5795_v63  ;;  %v1787_v38 = vadd.f32 %v1723_v39, %v5796_v25  ;;  %v5804_v29 = vld [vmem:[#allocation105_spill] sm:$0xff]  ;;  %v5808_v51 = vld [vmem:[#allocation126_spill] sm:$0xff]  ;;  %v5809_v46 = vld [vmem:[#allocation107_spill] sm:$0xff] }
 0x240   :  { %v1980_v33 = vadd.f32 %v1916_v32, %v5797_v2  ;;  %v2197_v60 = vmul.f32 %v3214_v5, %v2056_v35  ;;  %v1213_v0 = vadd.f32 %v5798_v17, %v1016_v16  ;;  %v1217_v18 = vadd.f32 %v5799_v19, %v1020_v14  ;;  %v5805_v35 = vld [vmem:[#allocation66_spill] sm:$0xff]  ;;  %v5811_v16 = vld [vmem:[#allocation127_spill] sm:$0xff]  ;;  %v5812_v14 = vld [vmem:[#allocation104_spill] sm:$0xff] }
 0x241   :  { %v1405_v58 = vadd.f32 %v5800_v28, %v1209_v27  ;;  %v1598_v34 = vadd.f32 %v1534_v47, %v1401_v26  ;;  %v1791_v4 = vadd.f32 %v1727_v57, %v1594_v12  ;;  %v1984_v6 = vadd.f32 %v5801_v44, %v1787_v38  ;;  %v1498_v25 = vld [vmem:[#allocation2 + $0x268] sm:$0xff]  ;;  %v5814_v38 = vld [vmem:[#allocation78_spill] sm:$0xff] }
 0x242   :  { %v2201_v22 = vmul.f32 %v3214_v5, %v2060_v36  ;;  %v2249_v8 = vsel %vm165_vm0, %v1980_v33, %v5802_v23  ;;  %v1409_v48 = vadd.f32 %v5803_v11, %v1213_v0  ;;  %v1413_v30 = vadd.f32 %v5804_v29, %v1217_v18  ;;  %v5815_v33 = vld [vmem:[#allocation141_spill] sm:$0xff] }
 0x243   :  { %v1602_v24 = vadd.f32 %v5805_v35, %v1405_v58  ;;  %v1795_v20 = vadd.f32 %v1731_v53, %v1598_v34  ;;  %v1988_v10 = vadd.f32 %v1924_v56, %v1791_v4  ;;  %v2253_v52 = vsel %vm165_vm0, %v1984_v6, %v5806_v7  ;;  %v1301_v32 = vld [vmem:[#allocation2 + $0x248] sm:$0xff] }
 0x244   :  { %v2320_v47 = vadd.f32 %v5199_v50, %v2249_v8  ;;  %v1040_v57 = vadd.f32 %v976_v15, %v843_v3  ;;  %v1606_v13 = vadd.f32 %v5807_v61, %v1409_v48  ;;  %v1610_v1 = vadd.f32 %v5808_v51, %v1413_v30  ;;  %v5813_v3 = vld [vmem:[#allocation128_spill] sm:$0xff]  ;;  %v5816_v34 = vld [vmem:[#allocation91_spill] sm:$0xff] }
 0x245   :  { %v1799_v31 = vadd.f32 %v5809_v46, %v1602_v24  ;;  %v1992_v39 = vadd.f32 %v1928_v40, %v1795_v20  ;;  %v2257_v36 = vsel %vm165_vm0, %v1988_v10, %v5810_v41  ;;  %v2324_v53 = vadd.f32 %v5199_v50, %v2253_v52  ;;  %v1695_v6 = vld [vmem:[#allocation2 + $0x288] sm:$0xff]  ;;  %v5818_v52 = vld [vmem:[#allocation70_spill] sm:$0xff] }
 0x246   :  { %v2384_v56 = vmax.f32 %v2320_v47, 0.0  ;;  %v1237_v42 = vadd.f32 %v1173_v9, %v1040_v57  ;;  %v1803_v54 = vadd.f32 %v5811_v16, %v1606_v13  ;;  %v1807_v21 = vadd.f32 %v5812_v14, %v1610_v1  ;;  %v5817_v48 = vld [vmem:[#allocation59_spill] sm:$0xff] }
 0x247   :  { %v1996_v15 = vadd.f32 %v5813_v3, %v1799_v31  ;;  %v2261_v27 = vsel %vm165_vm0, %v1992_v39, %v2197_v60  ;;  %v2328_v26 = vadd.f32 %v5199_v50, %v2257_v36  ;;  %v2388_v63 = vmax.f32 %v2324_v53, 0.0  ;;  %v1892_v24 = vld [vmem:[#allocation2 + $0x2a8] sm:$0xff]  ;;  %v5821_v36 = vld [vmem:[#allocation18_spill] sm:$0xff]  ;;  %v5824_v3 = vld [vmem:[#allocation116_spill] sm:$0xff] }
 0x248   :  { %v2332_v40 = vadd.f32 %v5199_v50, %v2261_v27  ;;  %v1369_v12 = vmul.f32 %v2974_v43, %v1301_v32  ;;  %v2000_v2 = vadd.f32 %v5814_v38, %v1803_v54  ;;  %v2004_v9 = vadd.f32 %v5815_v33, %v1807_v21  ;;  %v5819_v1 = vld [vmem:[#allocation19_spill] sm:$0xff]  ;;  %v5822_v54 = vld [vmem:[#allocation93_spill] sm:$0xff]  ;;  %v5823_v21 = vld [vmem:[#allocation142_spill] sm:$0xff] }
 0x249   :  { %v2265_v17 = vsel %vm165_vm0, %v1996_v15, %v2201_v22  ;;  %v1562_v0 = vmul.f32 %v2984_v49, %v1301_v32  ;;  %v2392_v18 = vmax.f32 %v2328_v26, 0.0  ;;  %v2440_v28 = vmax.f32 %v2384_v56, %v2388_v63 }
 0x24a   :  { %v2336_v19 = vadd.f32 %v5199_v50, %v2265_v17  ;;  %v2396_v60 = vmax.f32 %v2332_v40, 0.0  ;;  %v2269_v58 = vsel %vm165_vm0, %v2000_v2, %v5224_v59  ;;  %v2273_v43 = vsel %vm165_vm0, %v2004_v9, %v5816_v34 }
 0x24b   :  { %v1433_v4 = vadd.f32 %v1369_v12, %v1237_v42  ;;  %v1566_v44 = vmul.f32 %v2984_v49, %v1498_v25  ;;  %v2340_v23 = vadd.f32 %v5199_v50, %v2269_v58  ;;  %v2344_v22 = vadd.f32 %v5199_v50, %v2273_v43  ;;  %2472 = vst.msk [vmem:[#allocation8 + $0x48] sm:$0xff] %vm622_vm1, %v2440_v28 }
 0x24c   :  { %v2400_v8 = vmax.f32 %v2336_v19, 0.0  ;;  %v2444_v11 = vmax.f32 %v2392_v18, %v2396_v60  ;;  %v1626_v29 = vadd.f32 %v1562_v0, %v5817_v48  ;;  %v1755_v59 = vmul.f32 %v3003_v62, %v1301_v32 }
 0x24d   :  { %v1630_v30 = vadd.f32 %v1566_v44, %v1433_v4  ;;  %v1759_v35 = vmul.f32 %v3003_v62, %v1498_v25  ;;  %v2404_v20 = vmax.f32 %v2340_v23, 0.0  ;;  %v2408_v10 = vmax.f32 %v2344_v22, 0.0 }
 0x24e   :  { %2476 = vst.msk [vmem:[#allocation8 + $0x68] sm:$0xff] %vm622_vm1, %v2444_v11  ;;  %v1763_v49 = vmul.f32 %v3003_v62, %v1695_v6  ;;  %v1948_v7 = vmul.f32 %v2977_v45, %v1301_v32  ;;  %v1819_v47 = vadd.f32 %v1755_v59, %v5818_v52  ;;  %v1952_v61 = vmul.f32 %v2977_v45, %v1498_v25 }
 0x24f   :  { %v1823_v57 = vadd.f32 %v1759_v35, %v1626_v29  ;;  %v1956_v13 = vmul.f32 %v2977_v45, %v1695_v6  ;;  %v2448_v51 = vmax.f32 %v2400_v8, %v2404_v20  ;;  %v5820_v46 = vmax.f32 %v5819_v1, 0.0 }
 0x250   :  { %v1827_v39 = vadd.f32 %v1763_v49, %v1630_v30  ;;  %v1960_v41 = vmul.f32 %v2977_v45, %v1892_v24  ;;  %v2012_v53 = vadd.f32 %v1948_v7, %v5821_v36  ;;  %v2016_v56 = vadd.f32 %v1952_v61, %v1819_v47 }
 0x251   :  { %v2452_v31 = vmax.f32 %v2408_v10, %v5820_v46  ;;  %v2020_v62 = vadd.f32 %v1956_v13, %v1823_v57  ;;  %v2088_v32 = vmax.f32 %v5228_v55, %v5215_v37  ;;  %2480 = vst.msk [vmem:[#allocation8 + $0x88] sm:$0xff] %vm622_vm1, %v2448_v51 }
 0x252   :  { %v2024_v42 = vadd.f32 %v1960_v41, %v1827_v39  ;;  %v2281_v14 = vsel %vm165_vm0, %v2012_v53, %v5822_v54  ;;  %v2285_v45 = vsel %vm165_vm0, %v2016_v56, %v5823_v21 }
 0x253   :  { %2484 = vst.msk [vmem:[#allocation8 + $0xa8] sm:$0xff] %vm622_vm1, %v2452_v31  ;;  %v2229_v16 = vmul.f32 %v3214_v5, %v2088_v32  ;;  %v2289_v15 = vsel %vm165_vm0, %v2020_v62, %v5824_v3  ;;  %v2352_v27 = vadd.f32 %v5199_v50, %v2281_v14  ;;  %v2356_v37 = vadd.f32 %v5199_v50, %v2285_v45 }
 0x254   :  { %v2360_v55 = vadd.f32 %v5199_v50, %v2289_v15 }
 0x255   :  { %v2293_v26 = vsel %vm165_vm0, %v2024_v42, %v2229_v16  ;;  %v2416_v5 = vmax.f32 %v2352_v27, 0.0  ;;  %v2420_v63 = vmax.f32 %v2356_v37, 0.0 }
 0x256   :  { %v2364_v40 = vadd.f32 %v5199_v50, %v2293_v26  ;;  %v2424_v12 = vmax.f32 %v2360_v55, 0.0 }
 0x257   :  { %v2456_v38 = vmax.f32 %v2416_v5, %v2420_v63 }
 0x258   :  { %v2428_v25 = vmax.f32 %v2364_v40, 0.0 }
 0x259   :  { %2488 = vst.msk [vmem:[#allocation8 + $0xc8] sm:$0xff] %vm622_vm1, %v2456_v38 }
 0x25a   :  { %v2460_v2 = vmax.f32 %v2424_v12, %v2428_v25 }
 0x25c   :  { %2492 = vst.msk [vmem:[#allocation8 + $0xe8] sm:$0xff] %vm622_vm1, %v2460_v2 }
 0x25d   :  { %2726 = shalt.err (!%p2723_p6)
}
 0x25e   :  { %s2727_s19 = scalar_lea.hbm %s5344_s6, 4096 }
 0x25f   :  { %p2728_p7 = scmp.ne.s32.totalorder %s5344_s6, %s2727_s19  ;;  %p2731_p8 = scmp.lt.u32.totalorder %s2727_s19, %s5344_s6 }
 0x261   :  { %p2733_p9 = pnand %p2731_p8, %p2728_p7 }
 0x263   :  { %2736 = shalt.err (!%p2733_p9)
}
 0x264   :  { %2506 = dma.vmem_to_hbm [thread:$0]  %s2501_s15, 4096, %s5344_s6, [#allocation5], %s2744_s7, %s2744_s7, %s2745_s8  }
 0x265   :  { %2741 = dma.done.wait [#allocation5], 4096  }
 0x266   :  { %2742 = vsyncadd [#allocation5], 4294963200 }
 0x267   :  { %2510 = vsyncpa [#allocation4], 1 }
 0x268   :  { %2511 = vsyncpa [#allocation7], 1 }
 0x269   :  { %2512 = vsyncpa [#allocation5], 1 }

</bundles_post_ra>
